<compile_context>
chip_gen: v7x
topology: tpu7x:2x2x1
jax: 0.10.0
libtpu: 0.0.40
codegen_flags: <defaults>
</compile_context>

<pallas_src>
import functools

import numpy as np
import jax
import jax.numpy as jnp
from jax import lax
from jax.experimental import pallas as pl
from jax.experimental.pallas import tpu as pltpu


def _round_up(x, m):
    return (x + m - 1) // m * m


# ----------------------------------------------------------------------------
# The fused whole-network kernel (one sample per grid step).
# ----------------------------------------------------------------------------
def _dqn_fused_kernel(x_ref, w1_ref, b1_ref, w2_ref, b2_ref, w3_ref, b3_ref,
                      wfc1_ref, bfc1_ref, wout_ref, bout_ref, o_ref,
                      *, hs1, ws1, oh2, ow2, oh3, ow3):
    f32 = jnp.float32
    bf16 = jnp.bfloat16
    c1 = w1_ref.shape[3]          # 128 = 4 spatial parities * 32 channels
    c2 = w2_ref.shape[3]          # 64
    c3 = w3_ref.shape[3]          # 64

    # --- conv1 (+ fused space-to-depth-2 of its output), row by row ----------
    # Input is the space-to-depth-8 image; conv1 is a 2x2 stride-1 block conv.
    b1_full = b1_ref[...] + jnp.zeros((ws1, c1), f32)
    y1 = []                        # hs1 rows of [ws1, 128] (ReLU'd, bf16)
    for a in range(hs1):
        acc = b1_full
        for da in range(2):
            for db in range(2):
                lhs = x_ref[0, a + da, db:db + ws1, :]          # [ws1, 256]
                acc = acc + jnp.dot(lhs, w1_ref[da, db],
                                    preferred_element_type=f32)
        y1.append(jnp.maximum(acc, 0.0).astype(bf16))

    # --- conv2: 2x2 stride-1 conv on the space-to-depth-2 activation ---------
    b2_full = b2_ref[...] + jnp.zeros((ow2, c2), f32)
    y2 = []                        # oh2 rows of [ow2, 64]
    for a in range(oh2):
        acc = b2_full
        for pi in range(2):
            for pj in range(2):
                acc = acc + jnp.dot(y1[a + pi][pj:pj + ow2, :],
                                    w2_ref[pi, pj],
                                    preferred_element_type=f32)
        y2.append(jnp.maximum(acc, 0.0).astype(bf16))

    # --- conv3 (3x3 stride-1) with fc1 accumulation fused per output row -----
    b3_full = b3_ref[...] + jnp.zeros((ow3, c3), f32)
    h_acc = bfc1_ref[...]                                       # [1, 512] f32
    for i in range(oh3):
        acc = b3_full
        for ki in range(3):
            for kj in range(3):
                acc = acc + jnp.dot(y2[i + ki][kj:kj + ow3, :],
                                    w3_ref[ki, kj],
                                    preferred_element_type=f32)
        y3_row = jnp.maximum(acc, 0.0).astype(bf16)             # [ow3, 64]
        for j in range(ow3):
            h_acc = h_acc + jnp.dot(y3_row[j:j + 1, :], wfc1_ref[i, j],
                                    preferred_element_type=f32)
    h = jnp.maximum(h_acc, 0.0)                                 # [1, 512] f32

    # --- output head, kept in f32 (tiny; avoids extra bf16 rounding) ---------
    q = jnp.dot(h, wout_ref[...], preferred_element_type=f32) + bout_ref[...]
    o_ref[0] = q


# ----------------------------------------------------------------------------
# Forward wrapper: one transpose/pad/space-to-depth of the raw input, then a
# single pallas_call for the entire network.
# ----------------------------------------------------------------------------
def dqn_forward(prepared, x):
    """x: [N, 4, H, W] (PyTorch NCHW) -> [N, n_actions]."""
    n, c, h, w = x.shape
    oh1, ow1 = (h - 8) // 4 + 1, (w - 8) // 4 + 1
    assert oh1 % 2 == 0 and ow1 % 2 == 0 and oh1 >= 8 and ow1 >= 8, (oh1, ow1)
    hs1, ws1 = oh1 // 2, ow1 // 2          # conv1 output in 2x2 blocks
    oh2, ow2 = hs1 - 1, ws1 - 1            # == (oh1-4)//2 + 1 for even oh1
    oh3, ow3 = oh2 - 2, ow2 - 2
    hb, wb = hs1 + 1, ws1 + 1              # number of 8x8 input blocks
    hp, wp = 8 * hb, 8 * wb                # padded spatial size
    cin_s2d = 8 * 8 * c

    w1, b1 = prepared["conv1_w"], prepared["conv1_b"]
    w2, b2 = prepared["conv2_w"], prepared["conv2_b"]
    w3, b3 = prepared["conv3_w"], prepared["conv3_b"]
    wfc1, bfc1 = prepared["fc1_w"], prepared["fc1_b"]
    wout = prepared["out_w"]
    n_actions = prepared["out_b"].shape[0]
    n_out_pad = wout.shape[1]
    bout = jnp.pad(prepared["out_b"],
                   (0, n_out_pad - n_actions)).reshape(1, n_out_pad)

    assert w1.shape[2] == cin_s2d, (w1.shape, cin_s2d)
    assert wfc1.shape[:2] == (oh3, ow3), (wfc1.shape, oh3, ow3)

    # Input prep (one-time, cheap, no data inflation):
    #   NCHW -> NHWC -> zero-pad spatially -> space-to-depth by 8 -> bf16.
    xx = jnp.transpose(x, (0, 2, 3, 1))
    xx = jnp.pad(xx, ((0, 0), (0, hp - h), (0, wp - w), (0, 0)))
    xx = xx.reshape(n, hb, 8, wb, 8, c).transpose(0, 1, 3, 2, 4, 5)
    xx = xx.reshape(n, hb, wb, cin_s2d).astype(jnp.bfloat16)

    kernel = functools.partial(_dqn_fused_kernel, hs1=hs1, ws1=ws1,
                               oh2=oh2, ow2=ow2, oh3=oh3, ow3=ow3)

    def whole(arr):  # grid-invariant, fully VMEM-resident block
        nd = arr.ndim
        return pl.BlockSpec(arr.shape, lambda i, _nd=nd: (0,) * _nd)

    flops = 2 * n * (hs1 * ws1 * 4 * cin_s2d * w1.shape[3]
                     + oh2 * ow2 * 4 * w2.shape[2] * w2.shape[3]
                     + oh3 * ow3 * 9 * w3.shape[2] * w3.shape[3]
                     + oh3 * ow3 * wfc1.shape[2] * wfc1.shape[3]
                     + wout.shape[0] * wout.shape[1])
    bytes_accessed = (xx.size * 2
                      + 2 * (w1.size + w2.size + w3.size + wfc1.size)
                      + 4 * (wout.size + b1.size + b2.size + b3.size
                             + bfc1.size + bout.size)
                      + 4 * n * n_out_pad)

    out = pl.pallas_call(
        kernel,
        out_shape=jax.ShapeDtypeStruct((n, 1, n_out_pad), jnp.float32),
        grid_spec=pltpu.PrefetchScalarGridSpec(
            num_scalar_prefetch=0,
            grid=(n,),
            in_specs=[
                pl.BlockSpec((1, hb, wb, cin_s2d), lambda i: (i, 0, 0, 0)),
                whole(w1), whole(b1),
                whole(w2), whole(b2),
                whole(w3), whole(b3),
                whole(wfc1), whole(bfc1),
                whole(wout), whole(bout),
            ],
            out_specs=pl.BlockSpec((1, 1, n_out_pad), lambda i: (i, 0, 0)),
        ),
        compiler_params=pltpu.CompilerParams(
            dimension_semantics=("parallel",)),
        cost_estimate=pl.CostEstimate(
            flops=flops, transcendentals=0, bytes_accessed=bytes_accessed),
    )(xx, w1, b1, w2, b2, w3, b3, wfc1, bfc1, wout, bout)

    return out.reshape(n, n_out_pad)[:, :n_actions]


# ----------------------------------------------------------------------------
# DQN parameters (PyTorch layout) + one-time kernel-layout preparation
# ----------------------------------------------------------------------------
def init_params(key, input_shape, n_actions):
    c, h, w = input_shape

    def conv_out(size, k, s):
        return (size - k) // s + 1

    h1, w1 = conv_out(h, 8, 4), conv_out(w, 8, 4)
    h2, w2 = conv_out(h1, 4, 2), conv_out(w1, 4, 2)
    h3, w3 = conv_out(h2, 3, 1), conv_out(w2, 3, 1)
    flatten_size = 64 * h3 * w3

    keys = jax.random.split(key, 10)

    def init_layer(kw_key, kb_key, shape, fan_in):
        scale = 1.0 / jnp.sqrt(fan_in)
        w_ = jax.random.uniform(kw_key, shape, jnp.float32, -scale, scale)
        b_ = jax.random.uniform(kb_key, (shape[0],), jnp.float32, -scale, scale)
        return w_, b_

    p = {}
    p["conv1_w"], p["conv1_b"] = init_layer(keys[0], keys[1], (32, 4, 8, 8), 4 * 8 * 8)
    p["conv2_w"], p["conv2_b"] = init_layer(keys[2], keys[3], (64, 32, 4, 4), 32 * 4 * 4)
    p["conv3_w"], p["conv3_b"] = init_layer(keys[4], keys[5], (64, 64, 3, 3), 64 * 3 * 3)
    p["fc1_w"], p["fc1_b"] = init_layer(keys[6], keys[7], (512, flatten_size), flatten_size)
    p["out_w"], p["out_b"] = init_layer(keys[8], keys[9], (n_actions, 512), 512)
    return p


def prepare_params(params, input_hw):
    """One-time conversion: PyTorch layout -> fused-kernel layout.

    conv1's stride-4 8x8 kernel is re-blocked (together with the
    space-to-depth-by-2 of its output) into a 2x2 stride-1 block conv acting
    on the space-to-depth-by-8 input; conv2's stride-2 4x4 kernel is
    re-blocked into a 2x2 stride-1 conv on that activation.
    """
    h, w = input_hw
    oh1, ow1 = (h - 8) // 4 + 1, (w - 8) // 4 + 1
    assert oh1 % 2 == 0 and ow1 % 2 == 0 and oh1 >= 8 and ow1 >= 8, (oh1, ow1)
    oh2, ow2 = oh1 // 2 - 1, ow1 // 2 - 1
    oh3, ow3 = oh2 - 2, ow2 - 2

    bf16, f32 = jnp.bfloat16, jnp.float32

    # conv1: W1''[da,db][p*32 + q*4 + c, (dh*2+dw)*32 + co]
    #          = K1[co, c, ki=8da+p-4dh, kj=8db+q-4dw]   (0 if out of range)
    w1 = np.asarray(params["conv1_w"], np.float32)          # [32, 4, 8, 8]
    cin = w1.shape[1]
    blk1 = np.zeros((2, 2, 8, 8, cin, 2, 2, 32), np.float32)
    for da in range(2):
        for db in range(2):
            for p in range(8):
                for q in range(8):
                    for dh in range(2):
                        for dw in range(2):
                            ki = 8 * da + p - 4 * dh
                            kj = 8 * db + q - 4 * dw
                            if 0 <= ki < 8 and 0 <= kj < 8:
                                blk1[da, db, p, q, :, dh, dw, :] = w1[:, :, ki, kj].T
    conv1_w = jnp.asarray(blk1.reshape(2, 2, 8 * 8 * cin, 4 * 32), bf16)
    conv1_b = jnp.tile(jnp.asarray(params["conv1_b"], f32), 4).reshape(1, 4 * 32)

    # conv2: W2'[pi,pj][(dh*2+dw)*32 + c, co] = K2[co, c, 2pi+dh, 2pj+dw]
    w2 = np.asarray(params["conv2_w"], np.float32)          # [64, 32, 4, 4]
    blk2 = np.zeros((2, 2, 2, 2, 32, 64), np.float32)
    for pi in range(2):
        for pj in range(2):
            for dh in range(2):
                for dw in range(2):
                    blk2[pi, pj, dh, dw] = w2[:, :, 2 * pi + dh, 2 * pj + dw].T
    conv2_w = jnp.asarray(blk2.reshape(2, 2, 4 * 32, 64), bf16)
    conv2_b = jnp.asarray(params["conv2_b"], f32).reshape(1, 64)

    # conv3: plain 3x3 stride-1, stored [ki, kj, Cin, Cout].
    w3 = np.asarray(params["conv3_w"], np.float32)          # [64, 64, 3, 3]
    conv3_w = jnp.asarray(np.transpose(w3, (2, 3, 1, 0)), bf16)
    conv3_b = jnp.asarray(params["conv3_b"], f32).reshape(1, 64)

    # fc1: PyTorch flattens conv3 output as (C, H, W); store as [i, j, C, 512].
    fc1 = np.asarray(params["fc1_w"], np.float32)           # [512, 64*oh3*ow3]
    assert fc1.shape[1] == 64 * oh3 * ow3, (fc1.shape, oh3, ow3)
    fc1 = fc1.reshape(512, 64, oh3, ow3).transpose(2, 3, 1, 0)
    fc1_w = jnp.asarray(fc1, bf16)
    fc1_b = jnp.asarray(params["fc1_b"], f32).reshape(1, 512)

    # Output head: kept f32 (tiny), lane-padded to a multiple of 128 columns.
    out_w = np.asarray(params["out_w"], np.float32).T       # [512, n_actions]
    n_actions = out_w.shape[1]
    n_out_pad = _round_up(n_actions, 128)
    out_w = np.pad(out_w, ((0, 0), (0, n_out_pad - n_actions)))

    return {
        "conv1_w": conv1_w, "conv1_b": conv1_b,
        "conv2_w": conv2_w, "conv2_b": conv2_b,
        "conv3_w": conv3_w, "conv3_b": conv3_b,
        "fc1_w": fc1_w, "fc1_b": fc1_b,
        "out_w": jnp.asarray(out_w, f32),
        "out_b": jnp.asarray(params["out_b"], f32),
    }


# ----------------------------------------------------------------------------
# Pure-JAX reference (lax.conv, f32, PyTorch layout) for the correctness check
# ----------------------------------------------------------------------------
def dqn_forward_ref(params, x):
    def conv(x, w, b, s):
        y = lax.conv_general_dilated(
            x, w, window_strides=(s, s), padding="VALID",
            dimension_numbers=("NCHW", "OIHW", "NCHW"))
        return jax.nn.relu(y + b[None, :, None, None])

    x = conv(x, params["conv1_w"], params["conv1_b"], 4)
    x = conv(x, params["conv2_w"], params["conv2_b"], 2)
    x = conv(x, params["conv3_w"], params["conv3_b"], 1)
    x = x.reshape(x.shape[0], -1)
    x = jax.nn.relu(x @ params["fc1_w"].T + params["fc1_b"])
    return x @ params["out_w"].T + params["out_b"]


if __name__ == "__main__":
    # Small shapes consistent with the module: the PyTorch __init__ computes
    # flatten_size from input_shape, so any H,W that survives the conv stack
    # is valid. 36x36 is the smallest such size: 36 -> 8 -> 3 -> 1.
    batch = 2
    input_shape = (4, 36, 36)
    n_valid_actions = 6

    key = jax.random.PRNGKey(0)
    pkey, xkey = jax.random.split(key)
    params = init_params(pkey, input_shape, n_valid_actions)
    prepared = prepare_params(params, input_shape[1:])

    x = jax.random.uniform(xkey, (batch,) + input_shape, jnp.float32)

    fwd = jax.jit(dqn_forward)
    out = jax.block_until_ready(fwd(prepared, x))
    assert out.shape == (batch, n_valid_actions), out.shape

    ref = jax.block_until_ready(dqn_forward_ref(params, x))
    max_err = float(jnp.max(jnp.abs(out - ref)))
    # bf16 MXU inputs (f32 accumulation) -> slightly looser tolerance than f32.
    assert jnp.allclose(out, ref, rtol=2e-2, atol=2e-2), max_err

    print("KERNEL_OK")
</pallas_src>

<mosaic_0001>
module attributes {stable_mosaic.version = 11 : i64} {
  func.func @_dqn_fused_kernel(%arg0: i32, %arg1: memref<1x5x5x256xbf16, #tpu.memory_space<vmem>>, %arg2: memref<2x2x256x128xbf16, #tpu.memory_space<vmem>>, %arg3: memref<1x128xf32, #tpu.memory_space<vmem>>, %arg4: memref<2x2x128x64xbf16, #tpu.memory_space<vmem>>, %arg5: memref<1x64xf32, #tpu.memory_space<vmem>>, %arg6: memref<3x3x64x64xbf16, #tpu.memory_space<vmem>>, %arg7: memref<1x64xf32, #tpu.memory_space<vmem>>, %arg8: memref<1x1x64x512xbf16, #tpu.memory_space<vmem>>, %arg9: memref<1x512xf32, #tpu.memory_space<vmem>>, %arg10: memref<512x128xf32, #tpu.memory_space<vmem>>, %arg11: memref<1x128xf32, #tpu.memory_space<vmem>>, %arg12: memref<1x1x128xf32, #tpu.memory_space<vmem>>) attributes {dimension_semantics = [#tpu.dimension_semantics<parallel>], iteration_bounds = array<i64: 2>, scalar_prefetch = 0 : i64, scratch_operands = 0 : i64, tpu.core_type = #tpu.core_type<tc>, window_params = [{transform_indices = @transform_0, window_bounds = array<i64: 1, 5, 5, 256>}, {pipeline_mode = #tpu.pipeline_mode<synchronous>, transform_indices = @transform_1, window_bounds = array<i64: 2, 2, 256, 128>}, {pipeline_mode = #tpu.pipeline_mode<synchronous>, transform_indices = @transform_2, window_bounds = array<i64: 1, 128>}, {pipeline_mode = #tpu.pipeline_mode<synchronous>, transform_indices = @transform_3, window_bounds = array<i64: 2, 2, 128, 64>}, {pipeline_mode = #tpu.pipeline_mode<synchronous>, transform_indices = @transform_4, window_bounds = array<i64: 1, 64>}, {pipeline_mode = #tpu.pipeline_mode<synchronous>, transform_indices = @transform_5, window_bounds = array<i64: 3, 3, 64, 64>}, {pipeline_mode = #tpu.pipeline_mode<synchronous>, transform_indices = @transform_6, window_bounds = array<i64: 1, 64>}, {pipeline_mode = #tpu.pipeline_mode<synchronous>, transform_indices = @transform_7, window_bounds = array<i64: 1, 1, 64, 512>}, {pipeline_mode = #tpu.pipeline_mode<synchronous>, transform_indices = @transform_8, window_bounds = array<i64: 1, 512>}, {pipeline_mode = #tpu.pipeline_mode<synchronous>, transform_indices = @transform_9, window_bounds = array<i64: 512, 128>}, {pipeline_mode = #tpu.pipeline_mode<synchronous>, transform_indices = @transform_10, window_bounds = array<i64: 1, 128>}, {transform_indices = @transform_11, window_bounds = array<i64: 1, 1, 128>}]} {
    %c0 = arith.constant 0 : index
    %c0_0 = arith.constant 0 : index
    %0 = vector.load %arg3[%c0, %c0_0] : memref<1x128xf32, #tpu.memory_space<vmem>>, vector<1x128xf32>
    %cst = arith.constant 0.000000e+00 : f32
    %1 = vector.broadcast %cst : f32 to vector<4x128xf32>
    %2 = vector.broadcast %0 : vector<1x128xf32> to vector<4x128xf32>
    %3 = arith.addf %2, %1 : vector<4x128xf32>
    %c0_1 = arith.constant 0 : index
    %c0_2 = arith.constant 0 : index
    %c0_3 = arith.constant 0 : index
    %c0_4 = arith.constant 0 : index
    %4 = vector.load %arg1[%c0_1, %c0_2, %c0_3, %c0_4] : memref<1x5x5x256xbf16, #tpu.memory_space<vmem>>, vector<1x1x4x256xbf16>
    %5 = vector.shape_cast %4 : vector<1x1x4x256xbf16> to vector<4x256xbf16>
    %c0_5 = arith.constant 0 : index
    %c0_6 = arith.constant 0 : index
    %c0_7 = arith.constant 0 : index
    %c0_8 = arith.constant 0 : index
    %6 = vector.load %arg2[%c0_5, %c0_6, %c0_7, %c0_8] : memref<2x2x256x128xbf16, #tpu.memory_space<vmem>>, vector<1x1x256x128xbf16>
    %7 = vector.shape_cast %6 : vector<1x1x256x128xbf16> to vector<256x128xbf16>
    %cst_9 = arith.constant dense<0.000000e+00> : vector<4x128xf32>
    %8 = tpu.matmul %5, %7, %cst_9 {dimension_numbers = #tpu.dot_dimension_numbers<[1], [0], [0], [1], [0, 0, 1, 1], [], []>} : vector<4x256xbf16>, vector<256x128xbf16>, vector<4x128xf32> -> vector<4x128xf32>
    %9 = arith.addf %3, %8 : vector<4x128xf32>
    %c0_10 = arith.constant 0 : index
    %c0_11 = arith.constant 0 : index
    %c1 = arith.constant 1 : index
    %c0_12 = arith.constant 0 : index
    %10 = vector.load %arg1[%c0_10, %c0_11, %c1, %c0_12] : memref<1x5x5x256xbf16, #tpu.memory_space<vmem>>, vector<1x1x4x256xbf16>
    %11 = vector.shape_cast %10 : vector<1x1x4x256xbf16> to vector<4x256xbf16>
    %c0_13 = arith.constant 0 : index
    %c1_14 = arith.constant 1 : index
    %c0_15 = arith.constant 0 : index
    %c0_16 = arith.constant 0 : index
    %12 = vector.load %arg2[%c0_13, %c1_14, %c0_15, %c0_16] : memref<2x2x256x128xbf16, #tpu.memory_space<vmem>>, vector<1x1x256x128xbf16>
    %13 = vector.shape_cast %12 : vector<1x1x256x128xbf16> to vector<256x128xbf16>
    %cst_17 = arith.constant dense<0.000000e+00> : vector<4x128xf32>
    %14 = tpu.matmul %11, %13, %cst_17 {dimension_numbers = #tpu.dot_dimension_numbers<[1], [0], [0], [1], [0, 0, 1, 1], [], []>} : vector<4x256xbf16>, vector<256x128xbf16>, vector<4x128xf32> -> vector<4x128xf32>
    %15 = arith.addf %9, %14 : vector<4x128xf32>
    %c0_18 = arith.constant 0 : index
    %c1_19 = arith.constant 1 : index
    %c0_20 = arith.constant 0 : index
    %c0_21 = arith.constant 0 : index
    %16 = vector.load %arg1[%c0_18, %c1_19, %c0_20, %c0_21] : memref<1x5x5x256xbf16, #tpu.memory_space<vmem>>, vector<1x1x4x256xbf16>
    %17 = vector.shape_cast %16 : vector<1x1x4x256xbf16> to vector<4x256xbf16>
    %c1_22 = arith.constant 1 : index
    %c0_23 = arith.constant 0 : index
    %c0_24 = arith.constant 0 : index
    %c0_25 = arith.constant 0 : index
    %18 = vector.load %arg2[%c1_22, %c0_23, %c0_24, %c0_25] : memref<2x2x256x128xbf16, #tpu.memory_space<vmem>>, vector<1x1x256x128xbf16>
    %19 = vector.shape_cast %18 : vector<1x1x256x128xbf16> to vector<256x128xbf16>
    %cst_26 = arith.constant dense<0.000000e+00> : vector<4x128xf32>
    %20 = tpu.matmul %17, %19, %cst_26 {dimension_numbers = #tpu.dot_dimension_numbers<[1], [0], [0], [1], [0, 0, 1, 1], [], []>} : vector<4x256xbf16>, vector<256x128xbf16>, vector<4x128xf32> -> vector<4x128xf32>
    %21 = arith.addf %15, %20 : vector<4x128xf32>
    %c0_27 = arith.constant 0 : index
    %c1_28 = arith.constant 1 : index
    %c1_29 = arith.constant 1 : index
    %c0_30 = arith.constant 0 : index
    %22 = vector.load %arg1[%c0_27, %c1_28, %c1_29, %c0_30] : memref<1x5x5x256xbf16, #tpu.memory_space<vmem>>, vector<1x1x4x256xbf16>
    %23 = vector.shape_cast %22 : vector<1x1x4x256xbf16> to vector<4x256xbf16>
    %c1_31 = arith.constant 1 : index
    %c1_32 = arith.constant 1 : index
    %c0_33 = arith.constant 0 : index
    %c0_34 = arith.constant 0 : index
    %24 = vector.load %arg2[%c1_31, %c1_32, %c0_33, %c0_34] : memref<2x2x256x128xbf16, #tpu.memory_space<vmem>>, vector<1x1x256x128xbf16>
    %25 = vector.shape_cast %24 : vector<1x1x256x128xbf16> to vector<256x128xbf16>
    %cst_35 = arith.constant dense<0.000000e+00> : vector<4x128xf32>
    %26 = tpu.matmul %23, %25, %cst_35 {dimension_numbers = #tpu.dot_dimension_numbers<[1], [0], [0], [1], [0, 0, 1, 1], [], []>} : vector<4x256xbf16>, vector<256x128xbf16>, vector<4x128xf32> -> vector<4x128xf32>
    %27 = arith.addf %21, %26 : vector<4x128xf32>
    %cst_36 = arith.constant 0.000000e+00 : f32
    %28 = vector.broadcast %cst_36 : f32 to vector<4x128xf32>
    %29 = arith.maximumf %27, %28 : vector<4x128xf32>
    %30 = arith.truncf %29 : vector<4x128xf32> to vector<4x128xbf16>
    %c0_37 = arith.constant 0 : index
    %c1_38 = arith.constant 1 : index
    %c0_39 = arith.constant 0 : index
    %c0_40 = arith.constant 0 : index
    %31 = vector.load %arg1[%c0_37, %c1_38, %c0_39, %c0_40] : memref<1x5x5x256xbf16, #tpu.memory_space<vmem>>, vector<1x1x4x256xbf16>
    %32 = vector.shape_cast %31 : vector<1x1x4x256xbf16> to vector<4x256xbf16>
    %c0_41 = arith.constant 0 : index
    %c0_42 = arith.constant 0 : index
    %c0_43 = arith.constant 0 : index
    %c0_44 = arith.constant 0 : index
    %33 = vector.load %arg2[%c0_41, %c0_42, %c0_43, %c0_44] : memref<2x2x256x128xbf16, #tpu.memory_space<vmem>>, vector<1x1x256x128xbf16>
    %34 = vector.shape_cast %33 : vector<1x1x256x128xbf16> to vector<256x128xbf16>
    %cst_45 = arith.constant dense<0.000000e+00> : vector<4x128xf32>
    %35 = tpu.matmul %32, %34, %cst_45 {dimension_numbers = #tpu.dot_dimension_numbers<[1], [0], [0], [1], [0, 0, 1, 1], [], []>} : vector<4x256xbf16>, vector<256x128xbf16>, vector<4x128xf32> -> vector<4x128xf32>
    %36 = arith.addf %3, %35 : vector<4x128xf32>
    %c0_46 = arith.constant 0 : index
    %c1_47 = arith.constant 1 : index
    %c1_48 = arith.constant 1 : index
    %c0_49 = arith.constant 0 : index
    %37 = vector.load %arg1[%c0_46, %c1_47, %c1_48, %c0_49] : memref<1x5x5x256xbf16, #tpu.memory_space<vmem>>, vector<1x1x4x256xbf16>
    %38 = vector.shape_cast %37 : vector<1x1x4x256xbf16> to vector<4x256xbf16>
    %c0_50 = arith.constant 0 : index
    %c1_51 = arith.constant 1 : index
    %c0_52 = arith.constant 0 : index
    %c0_53 = arith.constant 0 : index
    %39 = vector.load %arg2[%c0_50, %c1_51, %c0_52, %c0_53] : memref<2x2x256x128xbf16, #tpu.memory_space<vmem>>, vector<1x1x256x128xbf16>
    %40 = vector.shape_cast %39 : vector<1x1x256x128xbf16> to vector<256x128xbf16>
    %cst_54 = arith.constant dense<0.000000e+00> : vector<4x128xf32>
    %41 = tpu.matmul %38, %40, %cst_54 {dimension_numbers = #tpu.dot_dimension_numbers<[1], [0], [0], [1], [0, 0, 1, 1], [], []>} : vector<4x256xbf16>, vector<256x128xbf16>, vector<4x128xf32> -> vector<4x128xf32>
    %42 = arith.addf %36, %41 : vector<4x128xf32>
    %c0_55 = arith.constant 0 : index
    %c2 = arith.constant 2 : index
    %c0_56 = arith.constant 0 : index
    %c0_57 = arith.constant 0 : index
    %43 = vector.load %arg1[%c0_55, %c2, %c0_56, %c0_57] : memref<1x5x5x256xbf16, #tpu.memory_space<vmem>>, vector<1x1x4x256xbf16>
    %44 = vector.shape_cast %43 : vector<1x1x4x256xbf16> to vector<4x256xbf16>
    %c1_58 = arith.constant 1 : index
    %c0_59 = arith.constant 0 : index
    %c0_60 = arith.constant 0 : index
    %c0_61 = arith.constant 0 : index
    %45 = vector.load %arg2[%c1_58, %c0_59, %c0_60, %c0_61] : memref<2x2x256x128xbf16, #tpu.memory_space<vmem>>, vector<1x1x256x128xbf16>
    %46 = vector.shape_cast %45 : vector<1x1x256x128xbf16> to vector<256x128xbf16>
    %cst_62 = arith.constant dense<0.000000e+00> : vector<4x128xf32>
    %47 = tpu.matmul %44, %46, %cst_62 {dimension_numbers = #tpu.dot_dimension_numbers<[1], [0], [0], [1], [0, 0, 1, 1], [], []>} : vector<4x256xbf16>, vector<256x128xbf16>, vector<4x128xf32> -> vector<4x128xf32>
    %48 = arith.addf %42, %47 : vector<4x128xf32>
    %c0_63 = arith.constant 0 : index
    %c2_64 = arith.constant 2 : index
    %c1_65 = arith.constant 1 : index
    %c0_66 = arith.constant 0 : index
    %49 = vector.load %arg1[%c0_63, %c2_64, %c1_65, %c0_66] : memref<1x5x5x256xbf16, #tpu.memory_space<vmem>>, vector<1x1x4x256xbf16>
    %50 = vector.shape_cast %49 : vector<1x1x4x256xbf16> to vector<4x256xbf16>
    %c1_67 = arith.constant 1 : index
    %c1_68 = arith.constant 1 : index
    %c0_69 = arith.constant 0 : index
    %c0_70 = arith.constant 0 : index
    %51 = vector.load %arg2[%c1_67, %c1_68, %c0_69, %c0_70] : memref<2x2x256x128xbf16, #tpu.memory_space<vmem>>, vector<1x1x256x128xbf16>
    %52 = vector.shape_cast %51 : vector<1x1x256x128xbf16> to vector<256x128xbf16>
    %cst_71 = arith.constant dense<0.000000e+00> : vector<4x128xf32>
    %53 = tpu.matmul %50, %52, %cst_71 {dimension_numbers = #tpu.dot_dimension_numbers<[1], [0], [0], [1], [0, 0, 1, 1], [], []>} : vector<4x256xbf16>, vector<256x128xbf16>, vector<4x128xf32> -> vector<4x128xf32>
    %54 = arith.addf %48, %53 : vector<4x128xf32>
    %cst_72 = arith.constant 0.000000e+00 : f32
    %55 = vector.broadcast %cst_72 : f32 to vector<4x128xf32>
    %56 = arith.maximumf %54, %55 : vector<4x128xf32>
    %57 = arith.truncf %56 : vector<4x128xf32> to vector<4x128xbf16>
    %c0_73 = arith.constant 0 : index
    %c2_74 = arith.constant 2 : index
    %c0_75 = arith.constant 0 : index
    %c0_76 = arith.constant 0 : index
    %58 = vector.load %arg1[%c0_73, %c2_74, %c0_75, %c0_76] : memref<1x5x5x256xbf16, #tpu.memory_space<vmem>>, vector<1x1x4x256xbf16>
    %59 = vector.shape_cast %58 : vector<1x1x4x256xbf16> to vector<4x256xbf16>
    %c0_77 = arith.constant 0 : index
    %c0_78 = arith.constant 0 : index
    %c0_79 = arith.constant 0 : index
    %c0_80 = arith.constant 0 : index
    %60 = vector.load %arg2[%c0_77, %c0_78, %c0_79, %c0_80] : memref<2x2x256x128xbf16, #tpu.memory_space<vmem>>, vector<1x1x256x128xbf16>
    %61 = vector.shape_cast %60 : vector<1x1x256x128xbf16> to vector<256x128xbf16>
    %cst_81 = arith.constant dense<0.000000e+00> : vector<4x128xf32>
    %62 = tpu.matmul %59, %61, %cst_81 {dimension_numbers = #tpu.dot_dimension_numbers<[1], [0], [0], [1], [0, 0, 1, 1], [], []>} : vector<4x256xbf16>, vector<256x128xbf16>, vector<4x128xf32> -> vector<4x128xf32>
    %63 = arith.addf %3, %62 : vector<4x128xf32>
    %c0_82 = arith.constant 0 : index
    %c2_83 = arith.constant 2 : index
    %c1_84 = arith.constant 1 : index
    %c0_85 = arith.constant 0 : index
    %64 = vector.load %arg1[%c0_82, %c2_83, %c1_84, %c0_85] : memref<1x5x5x256xbf16, #tpu.memory_space<vmem>>, vector<1x1x4x256xbf16>
    %65 = vector.shape_cast %64 : vector<1x1x4x256xbf16> to vector<4x256xbf16>
    %c0_86 = arith.constant 0 : index
    %c1_87 = arith.constant 1 : index
    %c0_88 = arith.constant 0 : index
    %c0_89 = arith.constant 0 : index
    %66 = vector.load %arg2[%c0_86, %c1_87, %c0_88, %c0_89] : memref<2x2x256x128xbf16, #tpu.memory_space<vmem>>, vector<1x1x256x128xbf16>
    %67 = vector.shape_cast %66 : vector<1x1x256x128xbf16> to vector<256x128xbf16>
    %cst_90 = arith.constant dense<0.000000e+00> : vector<4x128xf32>
    %68 = tpu.matmul %65, %67, %cst_90 {dimension_numbers = #tpu.dot_dimension_numbers<[1], [0], [0], [1], [0, 0, 1, 1], [], []>} : vector<4x256xbf16>, vector<256x128xbf16>, vector<4x128xf32> -> vector<4x128xf32>
    %69 = arith.addf %63, %68 : vector<4x128xf32>
    %c0_91 = arith.constant 0 : index
    %c3 = arith.constant 3 : index
    %c0_92 = arith.constant 0 : index
    %c0_93 = arith.constant 0 : index
    %70 = vector.load %arg1[%c0_91, %c3, %c0_92, %c0_93] : memref<1x5x5x256xbf16, #tpu.memory_space<vmem>>, vector<1x1x4x256xbf16>
    %71 = vector.shape_cast %70 : vector<1x1x4x256xbf16> to vector<4x256xbf16>
    %c1_94 = arith.constant 1 : index
    %c0_95 = arith.constant 0 : index
    %c0_96 = arith.constant 0 : index
    %c0_97 = arith.constant 0 : index
    %72 = vector.load %arg2[%c1_94, %c0_95, %c0_96, %c0_97] : memref<2x2x256x128xbf16, #tpu.memory_space<vmem>>, vector<1x1x256x128xbf16>
    %73 = vector.shape_cast %72 : vector<1x1x256x128xbf16> to vector<256x128xbf16>
    %cst_98 = arith.constant dense<0.000000e+00> : vector<4x128xf32>
    %74 = tpu.matmul %71, %73, %cst_98 {dimension_numbers = #tpu.dot_dimension_numbers<[1], [0], [0], [1], [0, 0, 1, 1], [], []>} : vector<4x256xbf16>, vector<256x128xbf16>, vector<4x128xf32> -> vector<4x128xf32>
    %75 = arith.addf %69, %74 : vector<4x128xf32>
    %c0_99 = arith.constant 0 : index
    %c3_100 = arith.constant 3 : index
    %c1_101 = arith.constant 1 : index
    %c0_102 = arith.constant 0 : index
    %76 = vector.load %arg1[%c0_99, %c3_100, %c1_101, %c0_102] : memref<1x5x5x256xbf16, #tpu.memory_space<vmem>>, vector<1x1x4x256xbf16>
    %77 = vector.shape_cast %76 : vector<1x1x4x256xbf16> to vector<4x256xbf16>
    %c1_103 = arith.constant 1 : index
    %c1_104 = arith.constant 1 : index
    %c0_105 = arith.constant 0 : index
    %c0_106 = arith.constant 0 : index
    %78 = vector.load %arg2[%c1_103, %c1_104, %c0_105, %c0_106] : memref<2x2x256x128xbf16, #tpu.memory_space<vmem>>, vector<1x1x256x128xbf16>
    %79 = vector.shape_cast %78 : vector<1x1x256x128xbf16> to vector<256x128xbf16>
    %cst_107 = arith.constant dense<0.000000e+00> : vector<4x128xf32>
    %80 = tpu.matmul %77, %79, %cst_107 {dimension_numbers = #tpu.dot_dimension_numbers<[1], [0], [0], [1], [0, 0, 1, 1], [], []>} : vector<4x256xbf16>, vector<256x128xbf16>, vector<4x128xf32> -> vector<4x128xf32>
    %81 = arith.addf %75, %80 : vector<4x128xf32>
    %cst_108 = arith.constant 0.000000e+00 : f32
    %82 = vector.broadcast %cst_108 : f32 to vector<4x128xf32>
    %83 = arith.maximumf %81, %82 : vector<4x128xf32>
    %84 = arith.truncf %83 : vector<4x128xf32> to vector<4x128xbf16>
    %c0_109 = arith.constant 0 : index
    %c3_110 = arith.constant 3 : index
    %c0_111 = arith.constant 0 : index
    %c0_112 = arith.constant 0 : index
    %85 = vector.load %arg1[%c0_109, %c3_110, %c0_111, %c0_112] : memref<1x5x5x256xbf16, #tpu.memory_space<vmem>>, vector<1x1x4x256xbf16>
    %86 = vector.shape_cast %85 : vector<1x1x4x256xbf16> to vector<4x256xbf16>
    %c0_113 = arith.constant 0 : index
    %c0_114 = arith.constant 0 : index
    %c0_115 = arith.constant 0 : index
    %c0_116 = arith.constant 0 : index
    %87 = vector.load %arg2[%c0_113, %c0_114, %c0_115, %c0_116] : memref<2x2x256x128xbf16, #tpu.memory_space<vmem>>, vector<1x1x256x128xbf16>
    %88 = vector.shape_cast %87 : vector<1x1x256x128xbf16> to vector<256x128xbf16>
    %cst_117 = arith.constant dense<0.000000e+00> : vector<4x128xf32>
    %89 = tpu.matmul %86, %88, %cst_117 {dimension_numbers = #tpu.dot_dimension_numbers<[1], [0], [0], [1], [0, 0, 1, 1], [], []>} : vector<4x256xbf16>, vector<256x128xbf16>, vector<4x128xf32> -> vector<4x128xf32>
    %90 = arith.addf %3, %89 : vector<4x128xf32>
    %c0_118 = arith.constant 0 : index
    %c3_119 = arith.constant 3 : index
    %c1_120 = arith.constant 1 : index
    %c0_121 = arith.constant 0 : index
    %91 = vector.load %arg1[%c0_118, %c3_119, %c1_120, %c0_121] : memref<1x5x5x256xbf16, #tpu.memory_space<vmem>>, vector<1x1x4x256xbf16>
    %92 = vector.shape_cast %91 : vector<1x1x4x256xbf16> to vector<4x256xbf16>
    %c0_122 = arith.constant 0 : index
    %c1_123 = arith.constant 1 : index
    %c0_124 = arith.constant 0 : index
    %c0_125 = arith.constant 0 : index
    %93 = vector.load %arg2[%c0_122, %c1_123, %c0_124, %c0_125] : memref<2x2x256x128xbf16, #tpu.memory_space<vmem>>, vector<1x1x256x128xbf16>
    %94 = vector.shape_cast %93 : vector<1x1x256x128xbf16> to vector<256x128xbf16>
    %cst_126 = arith.constant dense<0.000000e+00> : vector<4x128xf32>
    %95 = tpu.matmul %92, %94, %cst_126 {dimension_numbers = #tpu.dot_dimension_numbers<[1], [0], [0], [1], [0, 0, 1, 1], [], []>} : vector<4x256xbf16>, vector<256x128xbf16>, vector<4x128xf32> -> vector<4x128xf32>
    %96 = arith.addf %90, %95 : vector<4x128xf32>
    %c0_127 = arith.constant 0 : index
    %c4 = arith.constant 4 : index
    %c0_128 = arith.constant 0 : index
    %c0_129 = arith.constant 0 : index
    %97 = vector.load %arg1[%c0_127, %c4, %c0_128, %c0_129] : memref<1x5x5x256xbf16, #tpu.memory_space<vmem>>, vector<1x1x4x256xbf16>
    %98 = vector.shape_cast %97 : vector<1x1x4x256xbf16> to vector<4x256xbf16>
    %c1_130 = arith.constant 1 : index
    %c0_131 = arith.constant 0 : index
    %c0_132 = arith.constant 0 : index
    %c0_133 = arith.constant 0 : index
    %99 = vector.load %arg2[%c1_130, %c0_131, %c0_132, %c0_133] : memref<2x2x256x128xbf16, #tpu.memory_space<vmem>>, vector<1x1x256x128xbf16>
    %100 = vector.shape_cast %99 : vector<1x1x256x128xbf16> to vector<256x128xbf16>
    %cst_134 = arith.constant dense<0.000000e+00> : vector<4x128xf32>
    %101 = tpu.matmul %98, %100, %cst_134 {dimension_numbers = #tpu.dot_dimension_numbers<[1], [0], [0], [1], [0, 0, 1, 1], [], []>} : vector<4x256xbf16>, vector<256x128xbf16>, vector<4x128xf32> -> vector<4x128xf32>
    %102 = arith.addf %96, %101 : vector<4x128xf32>
    %c0_135 = arith.constant 0 : index
    %c4_136 = arith.constant 4 : index
    %c1_137 = arith.constant 1 : index
    %c0_138 = arith.constant 0 : index
    %103 = vector.load %arg1[%c0_135, %c4_136, %c1_137, %c0_138] : memref<1x5x5x256xbf16, #tpu.memory_space<vmem>>, vector<1x1x4x256xbf16>
    %104 = vector.shape_cast %103 : vector<1x1x4x256xbf16> to vector<4x256xbf16>
    %c1_139 = arith.constant 1 : index
    %c1_140 = arith.constant 1 : index
    %c0_141 = arith.constant 0 : index
    %c0_142 = arith.constant 0 : index
    %105 = vector.load %arg2[%c1_139, %c1_140, %c0_141, %c0_142] : memref<2x2x256x128xbf16, #tpu.memory_space<vmem>>, vector<1x1x256x128xbf16>
    %106 = vector.shape_cast %105 : vector<1x1x256x128xbf16> to vector<256x128xbf16>
    %cst_143 = arith.constant dense<0.000000e+00> : vector<4x128xf32>
    %107 = tpu.matmul %104, %106, %cst_143 {dimension_numbers = #tpu.dot_dimension_numbers<[1], [0], [0], [1], [0, 0, 1, 1], [], []>} : vector<4x256xbf16>, vector<256x128xbf16>, vector<4x128xf32> -> vector<4x128xf32>
    %108 = arith.addf %102, %107 : vector<4x128xf32>
    %cst_144 = arith.constant 0.000000e+00 : f32
    %109 = vector.broadcast %cst_144 : f32 to vector<4x128xf32>
    %110 = arith.maximumf %108, %109 : vector<4x128xf32>
    %111 = arith.truncf %110 : vector<4x128xf32> to vector<4x128xbf16>
    %c0_145 = arith.constant 0 : index
    %c0_146 = arith.constant 0 : index
    %112 = vector.load %arg5[%c0_145, %c0_146] : memref<1x64xf32, #tpu.memory_space<vmem>>, vector<1x64xf32>
    %cst_147 = arith.constant 0.000000e+00 : f32
    %113 = vector.broadcast %cst_147 : f32 to vector<3x64xf32>
    %114 = vector.broadcast %112 : vector<1x64xf32> to vector<3x64xf32>
    %115 = arith.addf %114, %113 : vector<3x64xf32>
    %116 = vector.extract_strided_slice %30 {offsets = [0, 0], sizes = [3, 128], strides = [1, 1]} : vector<4x128xbf16> to vector<3x128xbf16>
    %c0_148 = arith.constant 0 : index
    %c0_149 = arith.constant 0 : index
    %c0_150 = arith.constant 0 : index
    %c0_151 = arith.constant 0 : index
    %117 = vector.load %arg4[%c0_148, %c0_149, %c0_150, %c0_151] : memref<2x2x128x64xbf16, #tpu.memory_space<vmem>>, vector<1x1x128x64xbf16>
    %118 = vector.shape_cast %117 : vector<1x1x128x64xbf16> to vector<128x64xbf16>
    %cst_152 = arith.constant dense<0.000000e+00> : vector<3x64xf32>
    %119 = tpu.matmul %116, %118, %cst_152 {dimension_numbers = #tpu.dot_dimension_numbers<[1], [0], [0], [1], [0, 0, 1, 1], [], []>} : vector<3x128xbf16>, vector<128x64xbf16>, vector<3x64xf32> -> vector<3x64xf32>
    %120 = arith.addf %115, %119 : vector<3x64xf32>
    %121 = vector.extract_strided_slice %30 {offsets = [1, 0], sizes = [3, 128], strides = [1, 1]} : vector<4x128xbf16> to vector<3x128xbf16>
    %c0_153 = arith.constant 0 : index
    %c1_154 = arith.constant 1 : index
    %c0_155 = arith.constant 0 : index
    %c0_156 = arith.constant 0 : index
    %122 = vector.load %arg4[%c0_153, %c1_154, %c0_155, %c0_156] : memref<2x2x128x64xbf16, #tpu.memory_space<vmem>>, vector<1x1x128x64xbf16>
    %123 = vector.shape_cast %122 : vector<1x1x128x64xbf16> to vector<128x64xbf16>
    %cst_157 = arith.constant dense<0.000000e+00> : vector<3x64xf32>
    %124 = tpu.matmul %121, %123, %cst_157 {dimension_numbers = #tpu.dot_dimension_numbers<[1], [0], [0], [1], [0, 0, 1, 1], [], []>} : vector<3x128xbf16>, vector<128x64xbf16>, vector<3x64xf32> -> vector<3x64xf32>
    %125 = arith.addf %120, %124 : vector<3x64xf32>
    %126 = vector.extract_strided_slice %57 {offsets = [0, 0], sizes = [3, 128], strides = [1, 1]} : vector<4x128xbf16> to vector<3x128xbf16>
    %c1_158 = arith.constant 1 : index
    %c0_159 = arith.constant 0 : index
    %c0_160 = arith.constant 0 : index
    %c0_161 = arith.constant 0 : index
    %127 = vector.load %arg4[%c1_158, %c0_159, %c0_160, %c0_161] : memref<2x2x128x64xbf16, #tpu.memory_space<vmem>>, vector<1x1x128x64xbf16>
    %128 = vector.shape_cast %127 : vector<1x1x128x64xbf16> to vector<128x64xbf16>
    %cst_162 = arith.constant dense<0.000000e+00> : vector<3x64xf32>
    %129 = tpu.matmul %126, %128, %cst_162 {dimension_numbers = #tpu.dot_dimension_numbers<[1], [0], [0], [1], [0, 0, 1, 1], [], []>} : vector<3x128xbf16>, vector<128x64xbf16>, vector<3x64xf32> -> vector<3x64xf32>
    %130 = arith.addf %125, %129 : vector<3x64xf32>
    %131 = vector.extract_strided_slice %57 {offsets = [1, 0], sizes = [3, 128], strides = [1, 1]} : vector<4x128xbf16> to vector<3x128xbf16>
    %c1_163 = arith.constant 1 : index
    %c1_164 = arith.constant 1 : index
    %c0_165 = arith.constant 0 : index
    %c0_166 = arith.constant 0 : index
    %132 = vector.load %arg4[%c1_163, %c1_164, %c0_165, %c0_166] : memref<2x2x128x64xbf16, #tpu.memory_space<vmem>>, vector<1x1x128x64xbf16>
    %133 = vector.shape_cast %132 : vector<1x1x128x64xbf16> to vector<128x64xbf16>
    %cst_167 = arith.constant dense<0.000000e+00> : vector<3x64xf32>
    %134 = tpu.matmul %131, %133, %cst_167 {dimension_numbers = #tpu.dot_dimension_numbers<[1], [0], [0], [1], [0, 0, 1, 1], [], []>} : vector<3x128xbf16>, vector<128x64xbf16>, vector<3x64xf32> -> vector<3x64xf32>
    %135 = arith.addf %130, %134 : vector<3x64xf32>
    %cst_168 = arith.constant 0.000000e+00 : f32
    %136 = vector.broadcast %cst_168 : f32 to vector<3x64xf32>
    %137 = arith.maximumf %135, %136 : vector<3x64xf32>
    %138 = arith.truncf %137 : vector<3x64xf32> to vector<3x64xbf16>
    %139 = vector.extract_strided_slice %57 {offsets = [0, 0], sizes = [3, 128], strides = [1, 1]} : vector<4x128xbf16> to vector<3x128xbf16>
    %c0_169 = arith.constant 0 : index
    %c0_170 = arith.constant 0 : index
    %c0_171 = arith.constant 0 : index
    %c0_172 = arith.constant 0 : index
    %140 = vector.load %arg4[%c0_169, %c0_170, %c0_171, %c0_172] : memref<2x2x128x64xbf16, #tpu.memory_space<vmem>>, vector<1x1x128x64xbf16>
    %141 = vector.shape_cast %140 : vector<1x1x128x64xbf16> to vector<128x64xbf16>
    %cst_173 = arith.constant dense<0.000000e+00> : vector<3x64xf32>
    %142 = tpu.matmul %139, %141, %cst_173 {dimension_numbers = #tpu.dot_dimension_numbers<[1], [0], [0], [1], [0, 0, 1, 1], [], []>} : vector<3x128xbf16>, vector<128x64xbf16>, vector<3x64xf32> -> vector<3x64xf32>
    %143 = arith.addf %115, %142 : vector<3x64xf32>
    %144 = vector.extract_strided_slice %57 {offsets = [1, 0], sizes = [3, 128], strides = [1, 1]} : vector<4x128xbf16> to vector<3x128xbf16>
    %c0_174 = arith.constant 0 : index
    %c1_175 = arith.constant 1 : index
    %c0_176 = arith.constant 0 : index
    %c0_177 = arith.constant 0 : index
    %145 = vector.load %arg4[%c0_174, %c1_175, %c0_176, %c0_177] : memref<2x2x128x64xbf16, #tpu.memory_space<vmem>>, vector<1x1x128x64xbf16>
    %146 = vector.shape_cast %145 : vector<1x1x128x64xbf16> to vector<128x64xbf16>
    %cst_178 = arith.constant dense<0.000000e+00> : vector<3x64xf32>
    %147 = tpu.matmul %144, %146, %cst_178 {dimension_numbers = #tpu.dot_dimension_numbers<[1], [0], [0], [1], [0, 0, 1, 1], [], []>} : vector<3x128xbf16>, vector<128x64xbf16>, vector<3x64xf32> -> vector<3x64xf32>
    %148 = arith.addf %143, %147 : vector<3x64xf32>
    %149 = vector.extract_strided_slice %84 {offsets = [0, 0], sizes = [3, 128], strides = [1, 1]} : vector<4x128xbf16> to vector<3x128xbf16>
    %c1_179 = arith.constant 1 : index
    %c0_180 = arith.constant 0 : index
    %c0_181 = arith.constant 0 : index
    %c0_182 = arith.constant 0 : index
    %150 = vector.load %arg4[%c1_179, %c0_180, %c0_181, %c0_182] : memref<2x2x128x64xbf16, #tpu.memory_space<vmem>>, vector<1x1x128x64xbf16>
    %151 = vector.shape_cast %150 : vector<1x1x128x64xbf16> to vector<128x64xbf16>
    %cst_183 = arith.constant dense<0.000000e+00> : vector<3x64xf32>
    %152 = tpu.matmul %149, %151, %cst_183 {dimension_numbers = #tpu.dot_dimension_numbers<[1], [0], [0], [1], [0, 0, 1, 1], [], []>} : vector<3x128xbf16>, vector<128x64xbf16>, vector<3x64xf32> -> vector<3x64xf32>
    %153 = arith.addf %148, %152 : vector<3x64xf32>
    %154 = vector.extract_strided_slice %84 {offsets = [1, 0], sizes = [3, 128], strides = [1, 1]} : vector<4x128xbf16> to vector<3x128xbf16>
    %c1_184 = arith.constant 1 : index
    %c1_185 = arith.constant 1 : index
    %c0_186 = arith.constant 0 : index
    %c0_187 = arith.constant 0 : index
    %155 = vector.load %arg4[%c1_184, %c1_185, %c0_186, %c0_187] : memref<2x2x128x64xbf16, #tpu.memory_space<vmem>>, vector<1x1x128x64xbf16>
    %156 = vector.shape_cast %155 : vector<1x1x128x64xbf16> to vector<128x64xbf16>
    %cst_188 = arith.constant dense<0.000000e+00> : vector<3x64xf32>
    %157 = tpu.matmul %154, %156, %cst_188 {dimension_numbers = #tpu.dot_dimension_numbers<[1], [0], [0], [1], [0, 0, 1, 1], [], []>} : vector<3x128xbf16>, vector<128x64xbf16>, vector<3x64xf32> -> vector<3x64xf32>
    %158 = arith.addf %153, %157 : vector<3x64xf32>
    %cst_189 = arith.constant 0.000000e+00 : f32
    %159 = vector.broadcast %cst_189 : f32 to vector<3x64xf32>
    %160 = arith.maximumf %158, %159 : vector<3x64xf32>
    %161 = arith.truncf %160 : vector<3x64xf32> to vector<3x64xbf16>
    %162 = vector.extract_strided_slice %84 {offsets = [0, 0], sizes = [3, 128], strides = [1, 1]} : vector<4x128xbf16> to vector<3x128xbf16>
    %c0_190 = arith.constant 0 : index
    %c0_191 = arith.constant 0 : index
    %c0_192 = arith.constant 0 : index
    %c0_193 = arith.constant 0 : index
    %163 = vector.load %arg4[%c0_190, %c0_191, %c0_192, %c0_193] : memref<2x2x128x64xbf16, #tpu.memory_space<vmem>>, vector<1x1x128x64xbf16>
    %164 = vector.shape_cast %163 : vector<1x1x128x64xbf16> to vector<128x64xbf16>
    %cst_194 = arith.constant dense<0.000000e+00> : vector<3x64xf32>
    %165 = tpu.matmul %162, %164, %cst_194 {dimension_numbers = #tpu.dot_dimension_numbers<[1], [0], [0], [1], [0, 0, 1, 1], [], []>} : vector<3x128xbf16>, vector<128x64xbf16>, vector<3x64xf32> -> vector<3x64xf32>
    %166 = arith.addf %115, %165 : vector<3x64xf32>
    %167 = vector.extract_strided_slice %84 {offsets = [1, 0], sizes = [3, 128], strides = [1, 1]} : vector<4x128xbf16> to vector<3x128xbf16>
    %c0_195 = arith.constant 0 : index
    %c1_196 = arith.constant 1 : index
    %c0_197 = arith.constant 0 : index
    %c0_198 = arith.constant 0 : index
    %168 = vector.load %arg4[%c0_195, %c1_196, %c0_197, %c0_198] : memref<2x2x128x64xbf16, #tpu.memory_space<vmem>>, vector<1x1x128x64xbf16>
    %169 = vector.shape_cast %168 : vector<1x1x128x64xbf16> to vector<128x64xbf16>
    %cst_199 = arith.constant dense<0.000000e+00> : vector<3x64xf32>
    %170 = tpu.matmul %167, %169, %cst_199 {dimension_numbers = #tpu.dot_dimension_numbers<[1], [0], [0], [1], [0, 0, 1, 1], [], []>} : vector<3x128xbf16>, vector<128x64xbf16>, vector<3x64xf32> -> vector<3x64xf32>
    %171 = arith.addf %166, %170 : vector<3x64xf32>
    %172 = vector.extract_strided_slice %111 {offsets = [0, 0], sizes = [3, 128], strides = [1, 1]} : vector<4x128xbf16> to vector<3x128xbf16>
    %c1_200 = arith.constant 1 : index
    %c0_201 = arith.constant 0 : index
    %c0_202 = arith.constant 0 : index
    %c0_203 = arith.constant 0 : index
    %173 = vector.load %arg4[%c1_200, %c0_201, %c0_202, %c0_203] : memref<2x2x128x64xbf16, #tpu.memory_space<vmem>>, vector<1x1x128x64xbf16>
    %174 = vector.shape_cast %173 : vector<1x1x128x64xbf16> to vector<128x64xbf16>
    %cst_204 = arith.constant dense<0.000000e+00> : vector<3x64xf32>
    %175 = tpu.matmul %172, %174, %cst_204 {dimension_numbers = #tpu.dot_dimension_numbers<[1], [0], [0], [1], [0, 0, 1, 1], [], []>} : vector<3x128xbf16>, vector<128x64xbf16>, vector<3x64xf32> -> vector<3x64xf32>
    %176 = arith.addf %171, %175 : vector<3x64xf32>
    %177 = vector.extract_strided_slice %111 {offsets = [1, 0], sizes = [3, 128], strides = [1, 1]} : vector<4x128xbf16> to vector<3x128xbf16>
    %c1_205 = arith.constant 1 : index
    %c1_206 = arith.constant 1 : index
    %c0_207 = arith.constant 0 : index
    %c0_208 = arith.constant 0 : index
    %178 = vector.load %arg4[%c1_205, %c1_206, %c0_207, %c0_208] : memref<2x2x128x64xbf16, #tpu.memory_space<vmem>>, vector<1x1x128x64xbf16>
    %179 = vector.shape_cast %178 : vector<1x1x128x64xbf16> to vector<128x64xbf16>
    %cst_209 = arith.constant dense<0.000000e+00> : vector<3x64xf32>
    %180 = tpu.matmul %177, %179, %cst_209 {dimension_numbers = #tpu.dot_dimension_numbers<[1], [0], [0], [1], [0, 0, 1, 1], [], []>} : vector<3x128xbf16>, vector<128x64xbf16>, vector<3x64xf32> -> vector<3x64xf32>
    %181 = arith.addf %176, %180 : vector<3x64xf32>
    %cst_210 = arith.constant 0.000000e+00 : f32
    %182 = vector.broadcast %cst_210 : f32 to vector<3x64xf32>
    %183 = arith.maximumf %181, %182 : vector<3x64xf32>
    %184 = arith.truncf %183 : vector<3x64xf32> to vector<3x64xbf16>
    %c0_211 = arith.constant 0 : index
    %c0_212 = arith.constant 0 : index
    %185 = vector.load %arg7[%c0_211, %c0_212] : memref<1x64xf32, #tpu.memory_space<vmem>>, vector<1x64xf32>
    %cst_213 = arith.constant 0.000000e+00 : f32
    %186 = vector.broadcast %cst_213 : f32 to vector<1x64xf32>
    %187 = arith.addf %185, %186 : vector<1x64xf32>
    %c0_214 = arith.constant 0 : index
    %c0_215 = arith.constant 0 : index
    %188 = vector.load %arg9[%c0_214, %c0_215] : memref<1x512xf32, #tpu.memory_space<vmem>>, vector<1x512xf32>
    %189 = vector.extract_strided_slice %138 {offsets = [0, 0], sizes = [1, 64], strides = [1, 1]} : vector<3x64xbf16> to vector<1x64xbf16>
    %c0_216 = arith.constant 0 : index
    %c0_217 = arith.constant 0 : index
    %c0_218 = arith.constant 0 : index
    %c0_219 = arith.constant 0 : index
    %190 = vector.load %arg6[%c0_216, %c0_217, %c0_218, %c0_219] : memref<3x3x64x64xbf16, #tpu.memory_space<vmem>>, vector<1x1x64x64xbf16>
    %191 = vector.shape_cast %190 : vector<1x1x64x64xbf16> to vector<64x64xbf16>
    %cst_220 = arith.constant dense<0.000000e+00> : vector<1x64xf32>
    %192 = tpu.matmul %189, %191, %cst_220 {dimension_numbers = #tpu.dot_dimension_numbers<[1], [0], [0], [1], [0, 0, 1, 1], [], []>} : vector<1x64xbf16>, vector<64x64xbf16>, vector<1x64xf32> -> vector<1x64xf32>
    %193 = arith.addf %187, %192 : vector<1x64xf32>
    %194 = vector.extract_strided_slice %138 {offsets = [1, 0], sizes = [1, 64], strides = [1, 1]} : vector<3x64xbf16> to vector<1x64xbf16>
    %c0_221 = arith.constant 0 : index
    %c1_222 = arith.constant 1 : index
    %c0_223 = arith.constant 0 : index
    %c0_224 = arith.constant 0 : index
    %195 = vector.load %arg6[%c0_221, %c1_222, %c0_223, %c0_224] : memref<3x3x64x64xbf16, #tpu.memory_space<vmem>>, vector<1x1x64x64xbf16>
    %196 = vector.shape_cast %195 : vector<1x1x64x64xbf16> to vector<64x64xbf16>
    %cst_225 = arith.constant dense<0.000000e+00> : vector<1x64xf32>
    %197 = tpu.matmul %194, %196, %cst_225 {dimension_numbers = #tpu.dot_dimension_numbers<[1], [0], [0], [1], [0, 0, 1, 1], [], []>} : vector<1x64xbf16>, vector<64x64xbf16>, vector<1x64xf32> -> vector<1x64xf32>
    %198 = arith.addf %193, %197 : vector<1x64xf32>
    %199 = vector.extract_strided_slice %138 {offsets = [2, 0], sizes = [1, 64], strides = [1, 1]} : vector<3x64xbf16> to vector<1x64xbf16>
    %c0_226 = arith.constant 0 : index
    %c2_227 = arith.constant 2 : index
    %c0_228 = arith.constant 0 : index
    %c0_229 = arith.constant 0 : index
    %200 = vector.load %arg6[%c0_226, %c2_227, %c0_228, %c0_229] : memref<3x3x64x64xbf16, #tpu.memory_space<vmem>>, vector<1x1x64x64xbf16>
    %201 = vector.shape_cast %200 : vector<1x1x64x64xbf16> to vector<64x64xbf16>
    %cst_230 = arith.constant dense<0.000000e+00> : vector<1x64xf32>
    %202 = tpu.matmul %199, %201, %cst_230 {dimension_numbers = #tpu.dot_dimension_numbers<[1], [0], [0], [1], [0, 0, 1, 1], [], []>} : vector<1x64xbf16>, vector<64x64xbf16>, vector<1x64xf32> -> vector<1x64xf32>
    %203 = arith.addf %198, %202 : vector<1x64xf32>
    %204 = vector.extract_strided_slice %161 {offsets = [0, 0], sizes = [1, 64], strides = [1, 1]} : vector<3x64xbf16> to vector<1x64xbf16>
    %c1_231 = arith.constant 1 : index
    %c0_232 = arith.constant 0 : index
    %c0_233 = arith.constant 0 : index
    %c0_234 = arith.constant 0 : index
    %205 = vector.load %arg6[%c1_231, %c0_232, %c0_233, %c0_234] : memref<3x3x64x64xbf16, #tpu.memory_space<vmem>>, vector<1x1x64x64xbf16>
    %206 = vector.shape_cast %205 : vector<1x1x64x64xbf16> to vector<64x64xbf16>
    %cst_235 = arith.constant dense<0.000000e+00> : vector<1x64xf32>
    %207 = tpu.matmul %204, %206, %cst_235 {dimension_numbers = #tpu.dot_dimension_numbers<[1], [0], [0], [1], [0, 0, 1, 1], [], []>} : vector<1x64xbf16>, vector<64x64xbf16>, vector<1x64xf32> -> vector<1x64xf32>
    %208 = arith.addf %203, %207 : vector<1x64xf32>
    %209 = vector.extract_strided_slice %161 {offsets = [1, 0], sizes = [1, 64], strides = [1, 1]} : vector<3x64xbf16> to vector<1x64xbf16>
    %c1_236 = arith.constant 1 : index
    %c1_237 = arith.constant 1 : index
    %c0_238 = arith.constant 0 : index
    %c0_239 = arith.constant 0 : index
    %210 = vector.load %arg6[%c1_236, %c1_237, %c0_238, %c0_239] : memref<3x3x64x64xbf16, #tpu.memory_space<vmem>>, vector<1x1x64x64xbf16>
    %211 = vector.shape_cast %210 : vector<1x1x64x64xbf16> to vector<64x64xbf16>
    %cst_240 = arith.constant dense<0.000000e+00> : vector<1x64xf32>
    %212 = tpu.matmul %209, %211, %cst_240 {dimension_numbers = #tpu.dot_dimension_numbers<[1], [0], [0], [1], [0, 0, 1, 1], [], []>} : vector<1x64xbf16>, vector<64x64xbf16>, vector<1x64xf32> -> vector<1x64xf32>
    %213 = arith.addf %208, %212 : vector<1x64xf32>
    %214 = vector.extract_strided_slice %161 {offsets = [2, 0], sizes = [1, 64], strides = [1, 1]} : vector<3x64xbf16> to vector<1x64xbf16>
    %c1_241 = arith.constant 1 : index
    %c2_242 = arith.constant 2 : index
    %c0_243 = arith.constant 0 : index
    %c0_244 = arith.constant 0 : index
    %215 = vector.load %arg6[%c1_241, %c2_242, %c0_243, %c0_244] : memref<3x3x64x64xbf16, #tpu.memory_space<vmem>>, vector<1x1x64x64xbf16>
    %216 = vector.shape_cast %215 : vector<1x1x64x64xbf16> to vector<64x64xbf16>
    %cst_245 = arith.constant dense<0.000000e+00> : vector<1x64xf32>
    %217 = tpu.matmul %214, %216, %cst_245 {dimension_numbers = #tpu.dot_dimension_numbers<[1], [0], [0], [1], [0, 0, 1, 1], [], []>} : vector<1x64xbf16>, vector<64x64xbf16>, vector<1x64xf32> -> vector<1x64xf32>
    %218 = arith.addf %213, %217 : vector<1x64xf32>
    %219 = vector.extract_strided_slice %184 {offsets = [0, 0], sizes = [1, 64], strides = [1, 1]} : vector<3x64xbf16> to vector<1x64xbf16>
    %c2_246 = arith.constant 2 : index
    %c0_247 = arith.constant 0 : index
    %c0_248 = arith.constant 0 : index
    %c0_249 = arith.constant 0 : index
    %220 = vector.load %arg6[%c2_246, %c0_247, %c0_248, %c0_249] : memref<3x3x64x64xbf16, #tpu.memory_space<vmem>>, vector<1x1x64x64xbf16>
    %221 = vector.shape_cast %220 : vector<1x1x64x64xbf16> to vector<64x64xbf16>
    %cst_250 = arith.constant dense<0.000000e+00> : vector<1x64xf32>
    %222 = tpu.matmul %219, %221, %cst_250 {dimension_numbers = #tpu.dot_dimension_numbers<[1], [0], [0], [1], [0, 0, 1, 1], [], []>} : vector<1x64xbf16>, vector<64x64xbf16>, vector<1x64xf32> -> vector<1x64xf32>
    %223 = arith.addf %218, %222 : vector<1x64xf32>
    %224 = vector.extract_strided_slice %184 {offsets = [1, 0], sizes = [1, 64], strides = [1, 1]} : vector<3x64xbf16> to vector<1x64xbf16>
    %c2_251 = arith.constant 2 : index
    %c1_252 = arith.constant 1 : index
    %c0_253 = arith.constant 0 : index
    %c0_254 = arith.constant 0 : index
    %225 = vector.load %arg6[%c2_251, %c1_252, %c0_253, %c0_254] : memref<3x3x64x64xbf16, #tpu.memory_space<vmem>>, vector<1x1x64x64xbf16>
    %226 = vector.shape_cast %225 : vector<1x1x64x64xbf16> to vector<64x64xbf16>
    %cst_255 = arith.constant dense<0.000000e+00> : vector<1x64xf32>
    %227 = tpu.matmul %224, %226, %cst_255 {dimension_numbers = #tpu.dot_dimension_numbers<[1], [0], [0], [1], [0, 0, 1, 1], [], []>} : vector<1x64xbf16>, vector<64x64xbf16>, vector<1x64xf32> -> vector<1x64xf32>
    %228 = arith.addf %223, %227 : vector<1x64xf32>
    %229 = vector.extract_strided_slice %184 {offsets = [2, 0], sizes = [1, 64], strides = [1, 1]} : vector<3x64xbf16> to vector<1x64xbf16>
    %c2_256 = arith.constant 2 : index
    %c2_257 = arith.constant 2 : index
    %c0_258 = arith.constant 0 : index
    %c0_259 = arith.constant 0 : index
    %230 = vector.load %arg6[%c2_256, %c2_257, %c0_258, %c0_259] : memref<3x3x64x64xbf16, #tpu.memory_space<vmem>>, vector<1x1x64x64xbf16>
    %231 = vector.shape_cast %230 : vector<1x1x64x64xbf16> to vector<64x64xbf16>
    %cst_260 = arith.constant dense<0.000000e+00> : vector<1x64xf32>
    %232 = tpu.matmul %229, %231, %cst_260 {dimension_numbers = #tpu.dot_dimension_numbers<[1], [0], [0], [1], [0, 0, 1, 1], [], []>} : vector<1x64xbf16>, vector<64x64xbf16>, vector<1x64xf32> -> vector<1x64xf32>
    %233 = arith.addf %228, %232 : vector<1x64xf32>
    %cst_261 = arith.constant 0.000000e+00 : f32
    %234 = vector.broadcast %cst_261 : f32 to vector<1x64xf32>
    %235 = arith.maximumf %233, %234 : vector<1x64xf32>
    %236 = arith.truncf %235 : vector<1x64xf32> to vector<1x64xbf16>
    %c0_262 = arith.constant 0 : index
    %c0_263 = arith.constant 0 : index
    %c0_264 = arith.constant 0 : index
    %c0_265 = arith.constant 0 : index
    %237 = vector.load %arg8[%c0_262, %c0_263, %c0_264, %c0_265] : memref<1x1x64x512xbf16, #tpu.memory_space<vmem>>, vector<1x1x64x512xbf16>
    %238 = vector.shape_cast %237 : vector<1x1x64x512xbf16> to vector<64x512xbf16>
    %cst_266 = arith.constant dense<0.000000e+00> : vector<1x512xf32>
    %239 = tpu.matmul %236, %238, %cst_266 {dimension_numbers = #tpu.dot_dimension_numbers<[1], [0], [0], [1], [0, 0, 1, 1], [], []>} : vector<1x64xbf16>, vector<64x512xbf16>, vector<1x512xf32> -> vector<1x512xf32>
    %240 = arith.addf %188, %239 : vector<1x512xf32>
    %cst_267 = arith.constant 0.000000e+00 : f32
    %241 = vector.broadcast %cst_267 : f32 to vector<1x512xf32>
    %242 = arith.maximumf %240, %241 : vector<1x512xf32>
    %c0_268 = arith.constant 0 : index
    %c0_269 = arith.constant 0 : index
    %243 = vector.load %arg10[%c0_268, %c0_269] : memref<512x128xf32, #tpu.memory_space<vmem>>, vector<512x128xf32>
    %cst_270 = arith.constant dense<0.000000e+00> : vector<1x128xf32>
    %244 = tpu.matmul %242, %243, %cst_270 {dimension_numbers = #tpu.dot_dimension_numbers<[1], [0], [0], [1], [0, 0, 1, 1], [], []>} : vector<1x512xf32>, vector<512x128xf32>, vector<1x128xf32> -> vector<1x128xf32>
    %c0_271 = arith.constant 0 : index
    %c0_272 = arith.constant 0 : index
    %245 = vector.load %arg11[%c0_271, %c0_272] : memref<1x128xf32, #tpu.memory_space<vmem>>, vector<1x128xf32>
    %246 = arith.addf %244, %245 : vector<1x128xf32>
    %c0_273 = arith.constant 0 : index
    %c0_274 = arith.constant 0 : index
    %c0_275 = arith.constant 0 : index
    %247 = vector.load %arg12[%c0_273, %c0_274, %c0_275] : memref<1x1x128xf32, #tpu.memory_space<vmem>>, vector<1x1x128xf32>
    %248 = vector.shape_cast %247 : vector<1x1x128xf32> to vector<1x128xf32>
    %249 = vector.shape_cast %246 : vector<1x128xf32> to vector<1x1x128xf32>
    tpu.vector_store %arg12[%c0_273, %c0_274, %c0_275], %249 {strides = array<i32>} : memref<1x1x128xf32, #tpu.memory_space<vmem>>, vector<1x1x128xf32>,
    return
  }
  func.func @transform_0(%arg0: i32) -> (i32, i32, i32, i32) {
    %c0_i32 = arith.constant 0 : i32
    %c0_i32_0 = arith.constant 0 : i32
    %c0_i32_1 = arith.constant 0 : i32
    %c0_i32_2 = arith.constant 0 : i32
    return %arg0, %c0_i32, %c0_i32_0, %c0_i32_1 : i32, i32, i32, i32
  }
  func.func @transform_1(%arg0: i32) -> (i32, i32, i32, i32) {
    %c0_i32 = arith.constant 0 : i32
    %c0_i32_0 = arith.constant 0 : i32
    %c0_i32_1 = arith.constant 0 : i32
    %c0_i32_2 = arith.constant 0 : i32
    %c0_i32_3 = arith.constant 0 : i32
    return %c0_i32, %c0_i32_0, %c0_i32_1, %c0_i32_2 : i32, i32, i32, i32
  }
  func.func @transform_2(%arg0: i32) -> (i32, i32) {
    %c0_i32 = arith.constant 0 : i32
    %c0_i32_0 = arith.constant 0 : i32
    %c0_i32_1 = arith.constant 0 : i32
    return %c0_i32, %c0_i32_0 : i32, i32
  }
  func.func @transform_3(%arg0: i32) -> (i32, i32, i32, i32) {
    %c0_i32 = arith.constant 0 : i32
    %c0_i32_0 = arith.constant 0 : i32
    %c0_i32_1 = arith.constant 0 : i32
    %c0_i32_2 = arith.constant 0 : i32
    %c0_i32_3 = arith.constant 0 : i32
    return %c0_i32, %c0_i32_0, %c0_i32_1, %c0_i32_2 : i32, i32, i32, i32
  }
  func.func @transform_4(%arg0: i32) -> (i32, i32) {
    %c0_i32 = arith.constant 0 : i32
    %c0_i32_0 = arith.constant 0 : i32
    %c0_i32_1 = arith.constant 0 : i32
    return %c0_i32, %c0_i32_0 : i32, i32
  }
  func.func @transform_5(%arg0: i32) -> (i32, i32, i32, i32) {
    %c0_i32 = arith.constant 0 : i32
    %c0_i32_0 = arith.constant 0 : i32
    %c0_i32_1 = arith.constant 0 : i32
    %c0_i32_2 = arith.constant 0 : i32
    %c0_i32_3 = arith.constant 0 : i32
    return %c0_i32, %c0_i32_0, %c0_i32_1, %c0_i32_2 : i32, i32, i32, i32
  }
  func.func @transform_6(%arg0: i32) -> (i32, i32) {
    %c0_i32 = arith.constant 0 : i32
    %c0_i32_0 = arith.constant 0 : i32
    %c0_i32_1 = arith.constant 0 : i32
    return %c0_i32, %c0_i32_0 : i32, i32
  }
  func.func @transform_7(%arg0: i32) -> (i32, i32, i32, i32) {
    %c0_i32 = arith.constant 0 : i32
    %c0_i32_0 = arith.constant 0 : i32
    %c0_i32_1 = arith.constant 0 : i32
    %c0_i32_2 = arith.constant 0 : i32
    %c0_i32_3 = arith.constant 0 : i32
    return %c0_i32, %c0_i32_0, %c0_i32_1, %c0_i32_2 : i32, i32, i32, i32
  }
  func.func @transform_8(%arg0: i32) -> (i32, i32) {
    %c0_i32 = arith.constant 0 : i32
    %c0_i32_0 = arith.constant 0 : i32
    %c0_i32_1 = arith.constant 0 : i32
    return %c0_i32, %c0_i32_0 : i32, i32
  }
  func.func @transform_9(%arg0: i32) -> (i32, i32) {
    %c0_i32 = arith.constant 0 : i32
    %c0_i32_0 = arith.constant 0 : i32
    %c0_i32_1 = arith.constant 0 : i32
    return %c0_i32, %c0_i32_0 : i32, i32
  }
  func.func @transform_10(%arg0: i32) -> (i32, i32) {
    %c0_i32 = arith.constant 0 : i32
    %c0_i32_0 = arith.constant 0 : i32
    %c0_i32_1 = arith.constant 0 : i32
    return %c0_i32, %c0_i32_0 : i32, i32
  }
  func.func @transform_11(%arg0: i32) -> (i32, i32, i32) {
    %c0_i32 = arith.constant 0 : i32
    %c0_i32_0 = arith.constant 0 : i32
    %c0_i32_1 = arith.constant 0 : i32
    return %arg0, %c0_i32, %c0_i32_0 : i32, i32, i32
  }
}

</mosaic_0001>

<bundles_post_ra>
// kernel: dqn_forward.1
= control target key start
LH: loop header
LB: loop body
LE: loop exit
PB: predicated region body
PF: predicated region fallthrough
CT: control target
= control target key end

     0   :  { %s7211_s0 = inlined_call_operand.vmem [shape: bf16[2,5,5,256], index: 0, kind: input, shape index: {}]   ;;  %s7212_s1 = inlined_call_operand.vmem [shape: bf16[2,2,256,128], index: 1, kind: input, shape index: {}]   ;;  %s7213_s2 = inlined_call_operand.vmem [shape: f32[1,128], index: 2, kind: input, shape index: {}]   ;;  %s7214_s3 = inlined_call_operand.vmem [shape: bf16[2,2,128,64], index: 3, kind: input, shape index: {}]   ;;  %s7215_s4 = inlined_call_operand.vmem [shape: f32[1,64], index: 4, kind: input, shape index: {}]   ;;  %s7216_s5 = inlined_call_operand.vmem [shape: bf16[3,3,64,64], index: 5, kind: input, shape index: {}]   ;;  %s7217_s6 = inlined_call_operand.vmem [shape: f32[1,64], index: 6, kind: input, shape index: {}]   ;;  %s7218_s7 = inlined_call_operand.vmem [shape: bf16[1,1,64,512], index: 7, kind: input, shape index: {}]   ;;  %s7219_s8 = inlined_call_operand.vmem [shape: f32[1,512], index: 8, kind: input, shape index: {}]   ;;  %s7220_s9 = inlined_call_operand.vmem [shape: f32[512,128], index: 9, kind: input, shape index: {}]   ;;  %s7221_s10 = inlined_call_operand.vmem [shape: f32[1,128], index: 10, kind: input, shape index: {}]   ;;  %s7222_s11 = inlined_call_operand.hbm [shape: f32[2,1,128], index: 11, kind: output, shape index: {}]  }
   0x1   :  { %7252 = sst [smem:[#allocation19_spill]] %s7211_s0 }
   0x2   :  { %16 = vsyncpa [#allocation3], 0 }
   0x3   :  { %18 = vsyncpa [#allocation3 + $0x1], 0  ;;  %s5588_s17 = smov 0   ;;  %s5590_s18 = smov 0  }
   0x4   :  { %s5592_s19 = smov 0   ;;  %s5594_s20 = smov 0  }
   0x5 LB: > { %s5609_s21 = sadd.s32 4294967295, %s5521_s20   ;;  %s3740_s22 = sadd.s32 4294967294, %s5521_s20   ;;  %s5521_s20 = sphi %s5594_s20, %s7291_s20   ;;  %s5517_s19 = sphi %s5592_s19, %s7290_s19   ;;  %s5513_s18 = sphi %s5590_s18, %s7289_s18   ;;  %s5509_s17 = sphi %s5588_s17, %s7288_s17  }
   0x6   : > { %s5613_s23 = sadd.s32 1, %s5521_s20   ;;  %s267_s24 = sadd.s32 1, %s5517_s19 }
   0x7   : > { %s264_s25 = ssub.s32 %s5521_s20, %s5613_s23  ;;  %p277_p0 = scmp.ne.s32.totalorder %s5517_s19, %s5513_s18 }
   0x8   : > { %p265_p1 = scmp.eq.s32.totalorder %s264_s25, 0  ;;  %p278_p2 = scmp.eq.s32.totalorder %s5609_s21, 1 }
   0x9   : > { %p283_p3 = scmp.ne.s32.totalorder %s5513_s18, %s5509_s17  ;;  %p284_p4 = scmp.eq.s32.totalorder %s3740_s22, 1 }
   0xa   : > { %s5624_s26 = scalar_select %p265_p1, %s5517_s19, %s267_s24  }
   0xb   : > { %p5626_p5 = por %p278_p2, %p277_p0  ;;  %p5630_p6 = por %p284_p4, %p283_p3 }
   0xc   : > { %p3743_p7 = scmp.ge.s32.totalorder %s5521_s20, 1  ;;  %p340_p8 = scmp.lt.s32.totalorder %s5521_s20, 3 }
   0xe   : > { %p341_p9 = pnand %p3743_p7, %p340_p8 }
  0x10   : > { %344 = sbr.rel (%p341_p9) target bundleno = 1481 (0x5c9), region = 64 }
  0x17   : > { %v5639_v0 = vld [vmem:[%s7212_s1 + $0x40] sm:$0xff]   ;;  %v5662_v4 = vld [vmem:[%s7212_s1 + $0x48] sm:$0xff]   ;;  %v5686_v8 = vld [vmem:[%s7212_s1 + $0x50] sm:$0xff]   ;;  %p379_p10 = scmp.lt.s32.totalorder %s5609_s21, 1  ;;  %s7255_s0 = sld [smem:[#allocation19_spill]]  ;;  %vm5524_vm0 = vmmov 0  }
  0x18   : > { %v5644_v1 = vld [vmem:[%s7212_s1] sm:$0xff]   ;;  %4145 = vmatprep.subr.bf16.mxu0 %v5639_v0  ;;  %v5668_v5 = vld [vmem:[%s7212_s1 + $0x8] sm:$0xff]   ;;  %v5692_v9 = vld [vmem:[%s7212_s1 + $0x10] sm:$0xff]   ;;  %vm2558_vm1 = vcmask 523264   ;;  %s377_s29 = sand.u32 1, %s5513_s18  }
  0x19   : > { %v5650_v2 = vld [vmem:[%s7212_s1 + $0xc0] sm:$0xff]   ;;  %4146 = vmatpush3.bf16.msra.mxu0 %v5644_v1  ;;  %v5674_v6 = vld [vmem:[%s7212_s1 + $0xc8] sm:$0xff]   ;;  %v5698_v10 = vld [vmem:[%s7212_s1 + $0xd0] sm:$0xff]   ;;  %s380_s16 = scalar_select %p379_p10, %s5609_s21, 1 }
  0x1a   : > { %v5656_v3 = vld [vmem:[%s7212_s1 + $0x80] sm:$0xff]   ;;  %4167 = vmatprep.subr.bf16.mxu1 %v5650_v2  ;;  %4147 = vmatprep.subr.bf16.mxu0 %v5662_v4  ;;  %v5680_v7 = vld [vmem:[%s7212_s1 + $0x88] sm:$0xff]   ;;  %v5704_v11 = vld [vmem:[%s7212_s1 + $0x90] sm:$0xff]   ;;  %s3673_s22 = scalar_lea.sflag [#allocation3], %s377_s29 }
  0x1b   : > { %4168 = vmatpush3.bf16.msra.mxu1 %v5656_v3  ;;  %v5710_v12 = vld [vmem:[%s7212_s1 + $0x58] sm:$0xff]   ;;  %v5734_v16 = vld [vmem:[%s7212_s1 + $0x60] sm:$0xff]   ;;  %v5759_v20 = vld [vmem:[%s7212_s1 + $0x68] sm:$0xff]   ;;  %s5204_s15 = smul.u32 40, %s380_s16 }
  0x1c   : > { %4169 = vmatprep.subr.bf16.mxu1 %v5674_v6  ;;  %v5716_v13 = vld [vmem:[%s7212_s1 + $0x18] sm:$0xff]   ;;  %v5740_v17 = vld [vmem:[%s7212_s1 + $0x20] sm:$0xff]   ;;  %v5765_v21 = vld [vmem:[%s7212_s1 + $0x28] sm:$0xff]  }
  0x1d   : > { %4148 = vmatpush3.bf16.msra.mxu0 %v5668_v5  ;;  %v5722_v14 = vld [vmem:[%s7212_s1 + $0xd8] sm:$0xff]   ;;  %v5746_v18 = vld [vmem:[%s7212_s1 + $0xe0] sm:$0xff]   ;;  %v5771_v22 = vld [vmem:[%s7212_s1 + $0xe8] sm:$0xff]   ;;  %s5825_s24 = scalar_lea.vmem %s7255_s0, %s5204_s15  ;;  %s378_s15 = scalar_lea.vmem [#allocation2], %s377_s29 }
  0x1e   : > { %4149 = vmatprep.subr.bf16.mxu0 %v5686_v8  ;;  %v5728_v15 = vld [vmem:[%s7212_s1 + $0x98] sm:$0xff]   ;;  %v5753_v19 = vld [vmem:[%s7212_s1 + $0xa0] sm:$0xff]   ;;  %v5778_v23 = vld [vmem:[%s7212_s1 + $0xa8] sm:$0xff]   ;;  %s3685_s16 = sshll.u32 %s378_s15, 4  ;;  %s7171_s16 = int_to_ptr.vmem [resolvable:$true] %s3685_s16 }
  0x1f   : > { %4170 = vmatpush3.bf16.msra.mxu1 %v5680_v7  ;;  %v5784_v24 = vld [vmem:[%s7212_s1 + $0x70] sm:$0xff]   ;;  %v5808_v28 = vld [vmem:[%s7212_s1 + $0x78] sm:$0xff]   ;;  %v393_v32 = vld [vmem:[%s5825_s24] sm:$0x33]  ;;  %s5459_s25 = scalar_lea.vmem %s7171_s16, 16 }
  0x20   : > { %4171 = vmatprep.subr.bf16.mxu1 %v5698_v10  ;;  %v5790_v25 = vld [vmem:[%s7212_s1 + $0x30] sm:$0xff]   ;;  %v5814_v29 = vld [vmem:[%s7212_s1 + $0x38] sm:$0xff]   ;;  %v3746_v33 = vcombine.low %v393_v32, %v393_v32  ;;  %v3747_v34 = vcombine.high %v393_v32, %v393_v32  ;;  %v5839_v35 = vld [vmem:[%s7212_s1 + $0x140] sm:$0xff]   ;;  %p5460_p11 = scmp.ne.s32.totalorder %s7171_s16, %s5459_s25 }
  0x21   : > { %4150 = vmatpush3.bf16.msra.mxu0 %v5692_v9  ;;  %v5796_v26 = vld [vmem:[%s7212_s1 + $0xf0] sm:$0xff]   ;;  %v5820_v30 = vld [vmem:[%s7212_s1 + $0xf8] sm:$0xff]   ;;  %v570_v36 = vld [vmem:[%s5825_s24] sm:$0x77] }
  0x22   : > { %4151 = vmatprep.subr.bf16.mxu0 %v5710_v12  ;;  %v5802_v27 = vld [vmem:[%s7212_s1 + $0xb0] sm:$0xff]   ;;  %v5831_v31 = vld [vmem:[%s7212_s1 + $0xb8] sm:$0xff]   ;;  %v3796_v37 = vcombine.low %v570_v36, %v570_v36  ;;  %v3797_v38 = vcombine.high %v570_v36, %v570_v36  ;;  %v5845_v39 = vld [vmem:[%s7212_s1 + $0x100] sm:$0xff]   ;;  %561 = vmatprep.mubr.bf16.mxu0 %v3747_v34  ;;  %p5461_p12 = pnand %p5460_p11, %p5626_p5 }
  0x23   : > { %4172 = vmatpush3.bf16.msra.mxu1 %v5704_v11  ;;  %v5851_v40 = vld [vmem:[%s7212_s1 + $0x1c0] sm:$0xff]   ;;  %v5858_v47 = vld [vmem:[%s7212_s1 + $0x148] sm:$0xff]   ;;  %v5880_v53 = vld [vmem:[%s7212_s1 + $0x150] sm:$0xff]  }
  0x24   : > { %4173 = vmatprep.subr.bf16.mxu1 %v5722_v14  ;;  %v617_v41 = vshrl.u32 %v3797_v38, 16  ;;  %v619_v42 = vshll.u32 %v3797_v38, 16  ;;  %v610_v43 = vshrl.u32 %v3796_v37, 16  ;;  %v612_v44 = vshll.u32 %v3796_v37, 16  ;;  %v5863_v48 = vld [vmem:[%s7212_s1 + $0x108] sm:$0xff]   ;;  %v5868_v51 = vld [vmem:[%s7212_s1 + $0x180] sm:$0xff]   ;;  %p5462_p13 = pneg %p5461_p12 }
  0x25   : > { %4152 = vmatpush3.bf16.msra.mxu0 %v5716_v13  ;;  %v5875_v52 = vld [vmem:[%s7212_s1 + $0x1c8] sm:$0xff]   ;;  %v5885_v54 = vld [vmem:[%s7212_s1 + $0x110] sm:$0xff]   ;;  %v5904_v57 = vld [vmem:[%s7212_s1 + $0x158] sm:$0xff]  }
  0x26   : > { %4153 = vmatprep.subr.bf16.mxu0 %v5734_v16  ;;  %v621_v45 = vrot.slane %v619_v42, 1  ;;  %v614_v46 = vrot.slane %v612_v44, 1  ;;  %v5891_v55 = vld [vmem:[%s7212_s1 + $0x188] sm:$0xff]   ;;  %v5899_v56 = vld [vmem:[%s7212_s1 + $0x1d0] sm:$0xff]   ;;  %v5909_v58 = vld [vmem:[%s7212_s1 + $0x118] sm:$0xff]  }
  0x27   : > { %4174 = vmatpush3.bf16.msra.mxu1 %v5728_v15  ;;  %v5915_v59 = vld [vmem:[%s7212_s1 + $0x190] sm:$0xff]   ;;  %v5923_v60 = vld [vmem:[%s7212_s1 + $0x1d8] sm:$0xff]   ;;  %v5928_v61 = vld [vmem:[%s7212_s1 + $0x160] sm:$0xff]  }
  0x28   : > { %4175 = vmatprep.subr.bf16.mxu1 %v5746_v18  ;;  %v622_v49 = vor.u32 %v621_v45, %v617_v41  ;;  %v615_v50 = vor.u32 %v614_v46, %v610_v43  ;;  %v5933_v62 = vld [vmem:[%s7212_s1 + $0x120] sm:$0xff]   ;;  %v5939_v63 = vld [vmem:[%s7212_s1 + $0x198] sm:$0xff]   ;;  %v5957_v34 = vld [vmem:[%s7212_s1 + $0x128] sm:$0xff]  }
  0x29   : > { %4154 = vmatpush3.bf16.msra.mxu0 %v5740_v17  ;;  %7256 = vst [vmem:[#allocation5_spill] sm:$0xff] %v5933_v62  ;;  %7257 = vst [vmem:[#allocation6_spill] sm:$0xff] %v5939_v63  ;;  %v5947_v32 = vld [vmem:[%s7212_s1 + $0x1e0] sm:$0xff]   ;;  %v5971_v37 = vld [vmem:[%s7212_s1 + $0x1e8] sm:$0xff]  }
  0x2a   : > { %4155 = vmatprep.subr.bf16.mxu0 %v5759_v20  ;;  %753 = vmatprep.mubr.bf16.mxu1 %v622_v49  ;;  %7258 = vst [vmem:[#allocation7_spill] sm:$0xff] %v5947_v32  ;;  %7260 = vst [vmem:[#allocation9_spill] sm:$0xff] %v5957_v34  ;;  %v5963_v36 = vld [vmem:[%s7212_s1 + $0x1a0] sm:$0xff]   ;;  %v5976_v38 = vld [vmem:[%s7212_s1 + $0x170] sm:$0xff]  }
  0x2b   : > { %4176 = vmatpush3.bf16.msra.mxu1 %v5753_v19  ;;  %7261 = vst [vmem:[#allocation10_spill] sm:$0xff] %v5963_v36  ;;  %7262 = vst [vmem:[#allocation11_spill] sm:$0xff] %v5971_v37  ;;  %v5981_v41 = vld [vmem:[%s7212_s1 + $0x130] sm:$0xff]   ;;  %v5987_v42 = vld [vmem:[%s7212_s1 + $0x1a8] sm:$0xff]  }
  0x2c   : > { %4177 = vmatprep.subr.bf16.mxu1 %v5771_v22  ;;  %7263 = vst [vmem:[#allocation12_spill] sm:$0xff] %v5976_v38  ;;  %7264 = vst [vmem:[#allocation13_spill] sm:$0xff] %v5981_v41  ;;  %v5995_v43 = vld [vmem:[%s7212_s1 + $0x1f0] sm:$0xff]   ;;  %v6000_v44 = vld [vmem:[%s7212_s1 + $0x178] sm:$0xff]  }
  0x2d   : > { %4156 = vmatpush3.bf16.msra.mxu0 %v5765_v21  ;;  %7265 = vst [vmem:[#allocation14_spill] sm:$0xff] %v5987_v42  ;;  %7266 = vst [vmem:[#allocation15_spill] sm:$0xff] %v5995_v43  ;;  %v6005_v45 = vld [vmem:[%s7212_s1 + $0x138] sm:$0xff]   ;;  %v6011_v46 = vld [vmem:[%s7212_s1 + $0x1b0] sm:$0xff]  }
  0x2e   : > { %4157 = vmatprep.subr.bf16.mxu0 %v5784_v24  ;;  %7267 = vst [vmem:[#allocation16_spill] sm:$0xff] %v6000_v44  ;;  %7268 = vst [vmem:[#allocation17_spill] sm:$0xff] %v6005_v45  ;;  %v6019_v49 = vld [vmem:[%s7212_s1 + $0x1f8] sm:$0xff]  }
  0x2f   : > { %4178 = vmatpush3.bf16.msra.mxu1 %v5778_v23  ;;  %7269 = vst [vmem:[#allocation18_spill] sm:$0xff] %v6011_v46 }
  0x30   : > { %4179 = vmatprep.subr.bf16.mxu1 %v5796_v26 }
  0x31   : > { %4158 = vmatpush3.bf16.msra.mxu0 %v5790_v25 }
  0x32   : > { %4159 = vmatprep.subr.bf16.mxu0 %v5808_v28 }
  0x33   : > { %4180 = vmatpush3.bf16.msra.mxu1 %v5802_v27 }
  0x34   : > { %4181 = vmatprep.subr.bf16.mxu1 %v5820_v30 }
  0x35   : > { %4160 = vmatpush3.bf16.msra.mxu0 %v5814_v29 }
  0x36   : > { %4189 = vmatprep.subr.bf16.mxu0 %v5839_v35 }
  0x37   : > { %4182 = vmatpush3.bf16.msra.mxu1 %v5831_v31 }
  0x38   : > { %562 = vmatmul.mubr.bf16.vlgmr.msra.gmra.mrb[0].mxu0 %v3746_v33  ;;  %4211 = vmatprep.subr.bf16.mxu1 %v5851_v40  ;;  %v5952_v33 = vld [vmem:[%s7212_s1 + $0x168] sm:$0xff]  }
  0x39   : > { %4190 = vmatpush3.bf16.msra.mxu0 %v5845_v39  ;;  %7259 = vst [vmem:[#allocation8_spill] sm:$0xff] %v5952_v33 }
  0x3a   : > { %4191 = vmatprep.subr.bf16.mxu0 %v5858_v47  ;;  %754 = vmatmul.mubr.bf16.vlgmr.msra.gmra.mrb[0].mxu1 %v615_v50  ;;  %v3814_v50 = vld [vmem:[%s5825_s24 + $0x8] sm:$0x33] }
  0x3b   : > { %4212 = vmatpush3.bf16.msra.mxu1 %v5868_v51 }
  0x3c   : > { %4213 = vmatprep.subr.bf16.mxu1 %v5875_v52 }
  0x3d   : > { %4192 = vmatpush3.bf16.msra.mxu0 %v5863_v48 }
  0x3e   : > { %4193 = vmatprep.subr.bf16.mxu0 %v5880_v53 }
  0x3f   : > { %4214 = vmatpush3.bf16.msra.mxu1 %v5891_v55 }
  0x40   : > { %4215 = vmatprep.subr.bf16.mxu1 %v5899_v56 }
  0x41   : > { %4194 = vmatpush3.bf16.msra.mxu0 %v5885_v54 }
  0x42   : > { %4195 = vmatprep.subr.bf16.mxu0 %v5904_v57 }
  0x43   : > { %4216 = vmatpush3.bf16.msra.mxu1 %v5915_v59 }
  0x44   : > { %4217 = vmatprep.subr.bf16.mxu1 %v5923_v60 }
  0x45   : > { %4196 = vmatpush3.bf16.msra.mxu0 %v5909_v58 }
  0x46   : > { %4197 = vmatprep.subr.bf16.mxu0 %v5928_v61 }
  0x47   : > { %4218 = vmatpush3.bf16.msra.mxu1 %v5939_v63 }
  0x48   : > { %4219 = vmatprep.subr.bf16.mxu1 %v5947_v32 }
  0x49   : > { %4198 = vmatpush3.bf16.msra.mxu0 %v5933_v62 }
  0x4a   : > { %4199 = vmatprep.subr.bf16.mxu0 %v5952_v33 }
  0x4b   : > { %4220 = vmatpush3.bf16.msra.mxu1 %v5963_v36  ;;  %v3848_v36 = vcombine.high %v3814_v50, %v3814_v50 }
  0x4c   : > { %4221 = vmatprep.subr.bf16.mxu1 %v5971_v37  ;;  %v3847_v37 = vcombine.low %v3814_v50, %v3814_v50 }
  0x4d   : > { %4200 = vmatpush3.bf16.msra.mxu0 %v5957_v34  ;;  %932 = vmatprep.mubr.bf16.mxu0 %v3848_v36 }
  0x4e   : > { %4201 = vmatprep.subr.bf16.mxu0 %v5976_v38 }
  0x4f   : > { %4222 = vmatpush3.bf16.msra.mxu1 %v5987_v42  ;;  %v6026_v42 = vld [vmem:[%s7212_s1 + $0x1b8] sm:$0xff]  }
  0x50   : > { %4223 = vmatprep.subr.bf16.mxu1 %v5995_v43  ;;  %v6030_v43 = vld [vmem:[%s5825_s24 + $0x10] sm:$0x77] }
  0x51   : > { %4202 = vmatpush3.bf16.msra.mxu0 %v5981_v41  ;;  %v3865_v41 = vld [vmem:[%s5825_s24 + $0x8] sm:$0x77] }
  0x52   : > { %4203 = vmatprep.subr.bf16.mxu0 %v6000_v44  ;;  %v3898_v38 = vcombine.low %v3865_v41, %v3865_v41  ;;  %v3899_v44 = vcombine.high %v3865_v41, %v3865_v41 }
  0x53   : > { %4224 = vmatpush3.bf16.msra.mxu1 %v6011_v46 }
  0x54   : > { %v988_v34 = vshrl.u32 %v3899_v44, 16  ;;  %v990_v32 = vshll.u32 %v3899_v44, 16  ;;  %v981_v63 = vshrl.u32 %v3898_v38, 16  ;;  %v983_v33 = vshll.u32 %v3898_v38, 16  ;;  %4225 = vmatprep.subr.bf16.mxu1 %v6019_v49  ;;  %v7278_v38 = vld [vmem:[#allocation13_spill] sm:$0xff]  ;;  %v7279_v44 = vld [vmem:[#allocation16_spill] sm:$0xff] }
  0x55   : > { %4204 = vmatpush3.bf16.msra.mxu0 %v6005_v45  ;;  %v3921_v45 = vcombine.high %v6030_v43, %v6030_v43 }
  0x56   : > { %4233 = vmatprep.subr.bf16.mxu0 %v5639_v0  ;;  %v992_v50 = vrot.slane %v990_v32, 1  ;;  %v985_v62 = vrot.slane %v983_v33, 1  ;;  %v7275_v33 = vld [vmem:[#allocation12_spill] sm:$0xff] }
  0x57   : > { %4226 = vmatpush3.bf16.msra.mxu1 %v6026_v42  ;;  %v1283_v46 = vshll.u32 %v3921_v45, 16  ;;  %v1281_v32 = vshrl.u32 %v3921_v45, 16 }
  0x58   : > { %933 = vmatmul.mubr.bf16.vlgmr.msra.gmra.mrb[4].mxu0 %v3847_v37  ;;  %v993_v0 = vor.u32 %v992_v50, %v988_v34  ;;  %v986_v41 = vor.u32 %v985_v62, %v981_v63  ;;  %4255 = vmatprep.subr.bf16.mxu1 %v5650_v2  ;;  %v3916_v2 = vld [vmem:[%s5825_s24 + $0x10] sm:$0x33]  ;;  %v7274_v63 = vld [vmem:[#allocation9_spill] sm:$0xff]  ;;  %v3920_v34 = vcombine.low %v6030_v43, %v6030_v43 }
  0x59   : > { %4234 = vmatpush3.bf16.msra.mxu0 %v5644_v1  ;;  %1167 = vmatprep.mubr.bf16.mxu0 %v3848_v36  ;;  %v1285_v1 = vrot.slane %v1283_v46, 1  ;;  %v7273_v62 = vld [vmem:[#allocation7_spill] sm:$0xff]  ;;  %v7276_v36 = vld [vmem:[#allocation10_spill] sm:$0xff]  ;;  %v6103_v43 = vld [vmem:[%s7212_s1 + $0x40] sm:$0xff]  }
  0x5a   : > { %4235 = vmatprep.subr.bf16.mxu0 %v5662_v4  ;;  %1124 = vmatprep.mubr.bf16.mxu1 %v993_v0  ;;  %v1276_v45 = vshll.u32 %v3920_v34, 16  ;;  %v7280_v46 = vld [vmem:[#allocation14_spill] sm:$0xff]  ;;  %v7281_v50 = vld [vmem:[#allocation15_spill] sm:$0xff] }
  0x5b   : > { %1125 = vmatmul.mubr.bf16.vlgmr.msra.gmra.mrb[4].mxu1 %v986_v41  ;;  %v1286_v4 = vor.u32 %v1285_v1, %v1281_v32  ;;  %v1274_v32 = vshrl.u32 %v3920_v34, 16  ;;  %v6124_v34 = vld [vmem:[%s7212_s1 + $0xc0] sm:$0xff]  }
  0x5c   : > { %4256 = vmatpush3.bf16.msra.mxu1 %v5656_v3  ;;  %1208 = vmatprep.mubr.bf16.mxu1 %v993_v0  ;;  %v3918_v3 = vcombine.high %v3916_v2, %v3916_v2  ;;  %v3917_v0 = vcombine.low %v3916_v2, %v3916_v2  ;;  %v1278_v1 = vrot.slane %v1276_v45, 1  ;;  %v6111_v2 = vld [vmem:[%s7212_s1] sm:$0xff]  }
  0x5d   : > { %4236 = vmatpush3.bf16.msra.mxu0 %v5668_v5  ;;  %4257 = vmatprep.subr.bf16.mxu1 %v5674_v6  ;;  %v7270_v5 = vld [vmem:[#allocation5_spill] sm:$0xff]  ;;  %v7271_v6 = vld [vmem:[#allocation8_spill] sm:$0xff] }
  0x5e   : > { %4237 = vmatprep.subr.bf16.mxu0 %v5686_v8  ;;  %7283 = vst [vmem:[#allocation5_spill] sm:$0xff] %v6103_v43  ;;  %v6137_v45 = vld [vmem:[%s7212_s1 + $0x80] sm:$0xff]  }
  0x60   : > { %4258 = vmatpush3.bf16.msra.mxu1 %v5680_v7  ;;  %v7272_v7 = vld [vmem:[#allocation6_spill] sm:$0xff] }
  0x61   : > { %4238 = vmatpush3.bf16.msra.mxu0 %v5692_v9  ;;  %4259 = vmatprep.subr.bf16.mxu1 %v5698_v10 }
  0x62   : > { %4239 = vmatprep.subr.bf16.mxu0 %v5710_v12 }
  0x64   : > { %4260 = vmatpush3.bf16.msra.mxu1 %v5704_v11 }
  0x65   : > { %4240 = vmatpush3.bf16.msra.mxu0 %v5716_v13  ;;  %4261 = vmatprep.subr.bf16.mxu1 %v5722_v14 }
  0x66   : > { %4241 = vmatprep.subr.bf16.mxu0 %v5734_v16 }
  0x68   : > { %4262 = vmatpush3.bf16.msra.mxu1 %v5728_v15 }
  0x69   : > { %4242 = vmatpush3.bf16.msra.mxu0 %v5740_v17  ;;  %4263 = vmatprep.subr.bf16.mxu1 %v5746_v18 }
  0x6a   : > { %4243 = vmatprep.subr.bf16.mxu0 %v5759_v20 }
  0x6c   : > { %4264 = vmatpush3.bf16.msra.mxu1 %v5753_v19 }
  0x6d   : > { %4244 = vmatpush3.bf16.msra.mxu0 %v5765_v21  ;;  %4265 = vmatprep.subr.bf16.mxu1 %v5771_v22 }
  0x6e   : > { %4245 = vmatprep.subr.bf16.mxu0 %v5784_v24 }
  0x70   : > { %4266 = vmatpush3.bf16.msra.mxu1 %v5778_v23 }
  0x71   : > { %4246 = vmatpush3.bf16.msra.mxu0 %v5790_v25  ;;  %4267 = vmatprep.subr.bf16.mxu1 %v5796_v26 }
  0x72   : > { %4247 = vmatprep.subr.bf16.mxu0 %v5808_v28 }
  0x74   : > { %4268 = vmatpush3.bf16.msra.mxu1 %v5802_v27 }
  0x75   : > { %4248 = vmatpush3.bf16.msra.mxu0 %v5814_v29  ;;  %4269 = vmatprep.subr.bf16.mxu1 %v5820_v30 }
  0x76   : > { %4277 = vmatprep.subr.bf16.mxu0 %v5839_v35 }
  0x78   : > { %1168 = vmatmul.mubr.bf16.vlgmr.msra.gmra.mrb[8].mxu0 %v3847_v37  ;;  %4270 = vmatpush3.bf16.msra.mxu1 %v5831_v31  ;;  %v7277_v37 = vld [vmem:[#allocation11_spill] sm:$0xff] }
  0x79   : > { %4278 = vmatpush3.bf16.msra.mxu0 %v5845_v39  ;;  %1258 = vmatprep.mubr.bf16.mxu0 %v3918_v3 }
  0x7a   : > { %4279 = vmatprep.subr.bf16.mxu0 %v5858_v47  ;;  %4299 = vmatprep.subr.bf16.mxu1 %v5851_v40 }
  0x7b   : > { %1209 = vmatmul.mubr.bf16.vlgmr.msra.gmra.mrb[8].mxu1 %v986_v41  ;;  %v7282_v41 = vld [vmem:[#allocation17_spill] sm:$0xff] }
  0x7c   : > { %4300 = vmatpush3.bf16.msra.mxu1 %v5868_v51  ;;  %1321 = vmatprep.mubr.bf16.mxu1 %v1286_v4 }
  0x7d   : > { %4280 = vmatpush3.bf16.msra.mxu0 %v5863_v48  ;;  %4301 = vmatprep.subr.bf16.mxu1 %v5875_v52 }
  0x7e   : > { %4281 = vmatprep.subr.bf16.mxu0 %v5880_v53 }
  0x80   : > { %4302 = vmatpush3.bf16.msra.mxu1 %v5891_v55 }
  0x81   : > { %4282 = vmatpush3.bf16.msra.mxu0 %v5885_v54  ;;  %4303 = vmatprep.subr.bf16.mxu1 %v5899_v56 }
  0x82   : > { %4283 = vmatprep.subr.bf16.mxu0 %v5904_v57 }
  0x84   : > { %4304 = vmatpush3.bf16.msra.mxu1 %v5915_v59 }
  0x85   : > { %4284 = vmatpush3.bf16.msra.mxu0 %v5909_v58  ;;  %4305 = vmatprep.subr.bf16.mxu1 %v5923_v60 }
  0x86   : > { %4285 = vmatprep.subr.bf16.mxu0 %v5928_v61 }
  0x88   : > { %4306 = vmatpush3.bf16.msra.mxu1 %v7272_v7 }
  0x89   : > { %4286 = vmatpush3.bf16.msra.mxu0 %v7270_v5  ;;  %4307 = vmatprep.subr.bf16.mxu1 %v7273_v62 }
  0x8a   : > { %4287 = vmatprep.subr.bf16.mxu0 %v7271_v6 }
  0x8c   : > { %4308 = vmatpush3.bf16.msra.mxu1 %v7276_v36 }
  0x8d   : > { %4288 = vmatpush3.bf16.msra.mxu0 %v7274_v63  ;;  %4309 = vmatprep.subr.bf16.mxu1 %v7277_v37 }
  0x8e   : > { %4289 = vmatprep.subr.bf16.mxu0 %v7275_v33 }
  0x90   : > { %4310 = vmatpush3.bf16.msra.mxu1 %v7280_v46 }
  0x91   : > { %4290 = vmatpush3.bf16.msra.mxu0 %v7278_v38  ;;  %4311 = vmatprep.subr.bf16.mxu1 %v7281_v50  ;;  %v7284_v38 = vld [vmem:[#allocation18_spill] sm:$0xff] }
  0x92   : > { %4291 = vmatprep.subr.bf16.mxu0 %v7279_v44 }
  0x94   : > { %4312 = vmatpush3.bf16.msra.mxu1 %v7284_v38 }
  0x95   : > { %4292 = vmatpush3.bf16.msra.mxu0 %v7282_v41  ;;  %4313 = vmatprep.subr.bf16.mxu1 %v6019_v49  ;;  %v1279_v41 = vor.u32 %v1278_v1, %v1274_v32  ;;  %v6143_v32 = vld [vmem:[%s7212_s1 + $0xc8] sm:$0xff]  }
  0x96   : > { %4321 = vmatprep.subr.bf16.mxu0 %v6103_v43  ;;  %v6117_v43 = vld [vmem:[%s7212_s1 + $0x48] sm:$0xff]  }
  0x97   : > { %v5444_v1 = vld [vmem:[%s7212_s1 + $0x28] sm:$0xff]  }
  0x98   : > { %1259 = vmatmul.mubr.bf16.vlgmr.msra.gmra.mrb[12].mxu0 %v3917_v0  ;;  %4314 = vmatpush3.bf16.msra.mxu1 %v6026_v42 }
  0x99   : > { %4322 = vmatpush3.bf16.msra.mxu0 %v6111_v2  ;;  %1364 = vmatprep.mubr.bf16.mxu0 %v3918_v3  ;;  %v6130_v3 = vld [vmem:[%s7212_s1 + $0x8] sm:$0xff]  }
  0x9a   : > { %4323 = vmatprep.subr.bf16.mxu0 %v6117_v43  ;;  %4343 = vmatprep.subr.bf16.mxu1 %v6124_v34 }
  0x9b   : > { %1322 = vmatmul.mubr.bf16.vlgmr.msra.gmra.mrb[12].mxu1 %v1279_v41 }
  0x9c   : > { %4344 = vmatpush3.bf16.msra.mxu1 %v6137_v45  ;;  %1405 = vmatprep.mubr.bf16.mxu1 %v1286_v4  ;;  %v5441_v4 = vld [vmem:[%s7212_s1 + $0x68] sm:$0xff]  }
  0x9d   : > { %4324 = vmatpush3.bf16.msra.mxu0 %v6130_v3  ;;  %4345 = vmatprep.subr.bf16.mxu1 %v6143_v32 }
  0x9e   : > { %4325 = vmatprep.subr.bf16.mxu0 %v5686_v8  ;;  %v6151_v8 = vld [vmem:[%s7212_s1 + $0x88] sm:$0xff]  }
  0xa0   : > { %4346 = vmatpush3.bf16.msra.mxu1 %v6151_v8 }
  0xa1   : > { %4326 = vmatpush3.bf16.msra.mxu0 %v5692_v9  ;;  %4347 = vmatprep.subr.bf16.mxu1 %v5698_v10  ;;  %v3925_v9 = vld [vmem:[%s5825_s24 + $0x18] sm:$0x77] }
  0xa2   : > { %4327 = vmatprep.subr.bf16.mxu0 %v5710_v12  ;;  %v3927_v10 = vcombine.high %v3925_v9, %v3925_v9 }
  0xa4   : > { %4348 = vmatpush3.bf16.msra.mxu1 %v5704_v11  ;;  %v3922_v11 = vld [vmem:[%s5825_s24 + $0x18] sm:$0x33]  ;;  %v1480_v12 = vshll.u32 %v3927_v10, 16 }
  0xa5   : > { %4328 = vmatpush3.bf16.msra.mxu0 %v5716_v13  ;;  %4349 = vmatprep.subr.bf16.mxu1 %v5722_v14  ;;  %v3924_v13 = vcombine.high %v3922_v11, %v3922_v11  ;;  %v1478_v14 = vshrl.u32 %v3927_v10, 16  ;;  %v5450_v10 = vld [vmem:[%s7212_s1 + $0xa8] sm:$0xff]  }
  0xa6   : > { %4329 = vmatprep.subr.bf16.mxu0 %v5734_v16 }
  0xa8   : > { %4350 = vmatpush3.bf16.msra.mxu1 %v5728_v15  ;;  %v1482_v15 = vrot.slane %v1480_v12, 1  ;;  %v5451_v12 = vld [vmem:[%s7212_s1 + $0xf0] sm:$0xff]  }
  0xa9   : > { %4330 = vmatpush3.bf16.msra.mxu0 %v5740_v17  ;;  %4351 = vmatprep.subr.bf16.mxu1 %v5746_v18  ;;  %v3926_v17 = vcombine.low %v3925_v9, %v3925_v9  ;;  %v7285_v18 = vld [vmem:[#allocation13_spill] sm:$0xff] }
  0xaa   : > { %4331 = vmatprep.subr.bf16.mxu0 %v5759_v20  ;;  %v1483_v16 = vor.u32 %v1482_v15, %v1478_v14  ;;  %v6205_v20 = vcombine.low %v3922_v11, %v3922_v11  ;;  %v6283_v9 = vld [vmem:[%s5825_s24 + $0x20] sm:$0x33] }
  0xab   : > { %v3930_v14 = vcombine.high %v6283_v9, %v6283_v9  ;;  %v5453_v15 = vld [vmem:[%s7212_s1 + $0x140] sm:$0xff]  }
  0xac   : > { %4352 = vmatpush3.bf16.msra.mxu1 %v5753_v19  ;;  %v1473_v19 = vshll.u32 %v3926_v17, 16 }
  0xad   : > { %4332 = vmatpush3.bf16.msra.mxu0 %v5765_v21  ;;  %4353 = vmatprep.subr.bf16.mxu1 %v5771_v22  ;;  %v7286_v21 = vld [vmem:[#allocation17_spill] sm:$0xff] }
  0xae   : > { %4333 = vmatprep.subr.bf16.mxu0 %v5784_v24  ;;  %v7287_v22 = vld [vmem:[#allocation5_spill] sm:$0xff]  ;;  %v1475_v24 = vrot.slane %v1473_v19, 1 }
  0xb0   : > { %4354 = vmatpush3.bf16.msra.mxu1 %v5778_v23  ;;  %v1471_v23 = vshrl.u32 %v3926_v17, 16 }
  0xb1   : > { %4334 = vmatpush3.bf16.msra.mxu0 %v5790_v25  ;;  %4355 = vmatprep.subr.bf16.mxu1 %v5796_v26  ;;  %v5432_v26 = vld [vmem:[%s7212_s1 + $0x50] sm:$0xff]  }
  0xb2   : > { %4335 = vmatprep.subr.bf16.mxu0 %v5808_v28  ;;  %v6213_v25 = vor.u32 %v1475_v24, %v1471_v23  ;;  %v5434_v28 = vld [vmem:[%s7212_s1 + $0x58] sm:$0xff]   ;;  %v5456_v23 = vld [vmem:[%s7212_s1 + $0x100] sm:$0xff]  }
  0xb3   : > { %v5457_v24 = vld [vmem:[%s7212_s1 + $0xb8] sm:$0xff]  }
  0xb4   : > { %4356 = vmatpush3.bf16.msra.mxu1 %v5802_v27  ;;  %v5433_v27 = vld [vmem:[%s7212_s1 + $0x10] sm:$0xff]  }
  0xb5   : > { %4336 = vmatpush3.bf16.msra.mxu0 %v5814_v29  ;;  %4357 = vmatprep.subr.bf16.mxu1 %v5820_v30  ;;  %v5435_v29 = vld [vmem:[%s7212_s1 + $0xd0] sm:$0xff]   ;;  %v5436_v30 = vld [vmem:[%s7212_s1 + $0x18] sm:$0xff]  }
  0xb6   : > { %4365 = vmatprep.subr.bf16.mxu0 %v5839_v35  ;;  %v5438_v35 = vld [vmem:[%s7212_s1 + $0x90] sm:$0xff]  }
  0xb8   : > { %1365 = vmatmul.mubr.bf16.vlgmr.msra.gmra.mrb[16].mxu0 %v3917_v0  ;;  %4358 = vmatpush3.bf16.msra.mxu1 %v5831_v31  ;;  %v5437_v31 = vld [vmem:[%s7212_s1 + $0x60] sm:$0xff]   ;;  %v5442_v0 = vld [vmem:[%s7212_s1 + $0x98] sm:$0xff]  }
  0xb9   : > { %4366 = vmatpush3.bf16.msra.mxu0 %v5845_v39  ;;  %1455 = vmatprep.mubr.bf16.mxu0 %v3924_v13  ;;  %v5439_v39 = vld [vmem:[%s7212_s1 + $0xd8] sm:$0xff]  }
  0xba   : > { %4367 = vmatprep.subr.bf16.mxu0 %v5858_v47  ;;  %4387 = vmatprep.subr.bf16.mxu1 %v5851_v40  ;;  %v5440_v40 = vld [vmem:[%s7212_s1 + $0x20] sm:$0xff]  }
  0xbb   : > { %1406 = vmatmul.mubr.bf16.vlgmr.msra.gmra.mrb[16].mxu1 %v1279_v41  ;;  %v5443_v41 = vld [vmem:[%s7212_s1 + $0xe0] sm:$0xff]  }
  0xbc   : > { %4388 = vmatpush3.bf16.msra.mxu1 %v5868_v51  ;;  %1518 = vmatprep.mubr.bf16.mxu1 %v1483_v16 }
  0xbd   : > { %4368 = vmatpush3.bf16.msra.mxu0 %v5863_v48  ;;  %4389 = vmatprep.subr.bf16.mxu1 %v5875_v52 }
  0xbe   : > { %4369 = vmatprep.subr.bf16.mxu0 %v5880_v53 }
  0xc0   : > { %4390 = vmatpush3.bf16.msra.mxu1 %v5891_v55 }
  0xc1   : > { %4370 = vmatpush3.bf16.msra.mxu0 %v5885_v54  ;;  %4391 = vmatprep.subr.bf16.mxu1 %v5899_v56 }
  0xc2   : > { %4371 = vmatprep.subr.bf16.mxu0 %v5904_v57 }
  0xc4   : > { %4392 = vmatpush3.bf16.msra.mxu1 %v5915_v59 }
  0xc5   : > { %4372 = vmatpush3.bf16.msra.mxu0 %v5909_v58  ;;  %4393 = vmatprep.subr.bf16.mxu1 %v5923_v60 }
  0xc6   : > { %4373 = vmatprep.subr.bf16.mxu0 %v5928_v61 }
  0xc8   : > { %4394 = vmatpush3.bf16.msra.mxu1 %v7272_v7 }
  0xc9   : > { %4374 = vmatpush3.bf16.msra.mxu0 %v7270_v5  ;;  %4395 = vmatprep.subr.bf16.mxu1 %v7273_v62 }
  0xca   : > { %4375 = vmatprep.subr.bf16.mxu0 %v7271_v6 }
  0xcc   : > { %4396 = vmatpush3.bf16.msra.mxu1 %v7276_v36 }
  0xcd   : > { %4376 = vmatpush3.bf16.msra.mxu0 %v7274_v63  ;;  %4397 = vmatprep.subr.bf16.mxu1 %v7277_v37 }
  0xce   : > { %4377 = vmatprep.subr.bf16.mxu0 %v7275_v33 }
  0xd0   : > { %4398 = vmatpush3.bf16.msra.mxu1 %v7280_v46 }
  0xd1   : > { %4378 = vmatpush3.bf16.msra.mxu0 %v7285_v18  ;;  %4399 = vmatprep.subr.bf16.mxu1 %v7281_v50 }
  0xd2   : > { %4379 = vmatprep.subr.bf16.mxu0 %v7279_v44 }
  0xd4   : > { %4400 = vmatpush3.bf16.msra.mxu1 %v7284_v38 }
  0xd5   : > { %4380 = vmatpush3.bf16.msra.mxu0 %v7286_v21  ;;  %4401 = vmatprep.subr.bf16.mxu1 %v6019_v49 }
  0xd6   : > { %4409 = vmatprep.subr.bf16.mxu0 %v7287_v22  ;;  %v5455_v22 = vld [vmem:[%s7212_s1 + $0xf8] sm:$0xff]  }
  0xd8   : > { %1456 = vmatmul.mubr.bf16.vlgmr.msra.gmra.mrb[20].mxu0 %v6205_v20  ;;  %4402 = vmatpush3.bf16.msra.mxu1 %v6026_v42 }
  0xd9   : > { %4410 = vmatpush3.bf16.msra.mxu0 %v6111_v2  ;;  %1561 = vmatprep.mubr.bf16.mxu0 %v3924_v13  ;;  %v5445_v2 = vld [vmem:[%s7212_s1 + $0x70] sm:$0xff]   ;;  %v5452_v13 = vld [vmem:[%s7212_s1 + $0x38] sm:$0xff]  }
  0xda   : > { %4411 = vmatprep.subr.bf16.mxu0 %v6117_v43  ;;  %4431 = vmatprep.subr.bf16.mxu1 %v6124_v34  ;;  %v6260_v43 = vld [vmem:[%s5825_s24 + $0x20] sm:$0x77]  ;;  %s4142_s24 = sshll.u32 %s5609_s21, 4  ;;  %s5527_s21 = smov [#allocation2]  }
  0xdb   : > { %1519 = vmatmul.mubr.bf16.vlgmr.msra.gmra.mrb[20].mxu1 %v6213_v25  ;;  %v5446_v34 = vld [vmem:[%s7212_s1 + $0xa0] sm:$0xff]   ;;  %s7169_s0 = scalar_lea.hbm %s7222_s11, %s4142_s24  ;;  %s5463_s30 = sshll.u32 %s5527_s21, 4  ;;  %s5464_s30 = int_to_ptr.vmem [resolvable:$false] %s5463_s30 }
  0xdc   : > { %4432 = vmatpush3.bf16.msra.mxu1 %v6137_v45  ;;  %1602 = vmatprep.mubr.bf16.mxu1 %v1483_v16  ;;  %v5447_v45 = vld [vmem:[%s7212_s1 + $0xe8] sm:$0xff]   ;;  %v5454_v16 = vld [vmem:[%s7212_s1 + $0xb0] sm:$0xff]   ;;  %s5465_s12 = scalar_lea.vmem %s5464_s30, 32  ;;  %p5466_p0 = scmp.lt.s32.totalorder %s7171_s16, %s5464_s30 }
  0xdd   : > { %4412 = vmatpush3.bf16.msra.mxu0 %v6130_v3  ;;  %4433 = vmatprep.subr.bf16.mxu1 %v6143_v32  ;;  %v3933_v3 = vcombine.high %v6260_v43, %v6260_v43  ;;  %v5448_v32 = vld [vmem:[%s7212_s1 + $0x30] sm:$0xff]   ;;  %p5467_p1 = scmp.lt.s32.totalorder %s5465_s12, %s5459_s25 }
  0xde   : > { %4413 = vmatprep.subr.bf16.mxu0 %v5432_v26 }
  0xdf   : > { %v1677_v11 = vshll.u32 %v3933_v3, 16  ;;  %v1675_v17 = vshrl.u32 %v3933_v3, 16  ;;  %v6458_v3 = vld [vmem:[%s7214_s3 + $0x58] sm:$0xff]   ;;  %p5468_p2 = por %p5467_p1, %p5466_p0 }
  0xe0   : > { %4434 = vmatpush3.bf16.msra.mxu1 %v6151_v8  ;;  %v5449_v8 = vld [vmem:[%s7212_s1 + $0x78] sm:$0xff]  }
  0xe1   : > { %4414 = vmatpush3.bf16.msra.mxu0 %v5433_v27  ;;  %4435 = vmatprep.subr.bf16.mxu1 %v5435_v29  ;;  %v1679_v19 = vrot.slane %v1677_v11, 1  ;;  %v5458_v27 = vld [vmem:[%s7212_s1 + $0x1c0] sm:$0xff]   ;;  %p5469_p3 = pnand %p5468_p2, %p5462_p13 }
  0xe2   : > { %4415 = vmatprep.subr.bf16.mxu0 %v5434_v28 }
  0xe3   : > { %v1680_v26 = vor.u32 %v1679_v19, %v1675_v17 }
  0xe4   : > { %4436 = vmatpush3.bf16.msra.mxu1 %v5438_v35 }
  0xe5   : > { %4416 = vmatpush3.bf16.msra.mxu0 %v5436_v30  ;;  %4437 = vmatprep.subr.bf16.mxu1 %v5439_v39 }
  0xe6   : > { %4417 = vmatprep.subr.bf16.mxu0 %v5437_v31  ;;  %v6422_v31 = vld [vmem:[%s7214_s3 + $0x38] sm:$0xff]  }
  0xe8   : > { %4438 = vmatpush3.bf16.msra.mxu1 %v5442_v0 }
  0xe9   : > { %4418 = vmatpush3.bf16.msra.mxu0 %v5440_v40  ;;  %4439 = vmatprep.subr.bf16.mxu1 %v5443_v41 }
  0xea   : > { %4419 = vmatprep.subr.bf16.mxu0 %v5441_v4 }
  0xec   : > { %4440 = vmatpush3.bf16.msra.mxu1 %v5446_v34  ;;  %v6451_v34 = vld [vmem:[%s7214_s3 + $0x50] sm:$0xff]  }
  0xed   : > { %4420 = vmatpush3.bf16.msra.mxu0 %v5444_v1  ;;  %4441 = vmatprep.subr.bf16.mxu1 %v5447_v45  ;;  %v6465_v45 = vld [vmem:[%s7214_s3 + $0x60] sm:$0xff]  }
  0xee   : > { %4421 = vmatprep.subr.bf16.mxu0 %v5445_v2  ;;  %v6441_v2 = vld [vmem:[%s7214_s3 + $0x48] sm:$0xff]  }
  0xf0   : > { %4442 = vmatpush3.bf16.msra.mxu1 %v5450_v10 }
  0xf1   : > { %4422 = vmatpush3.bf16.msra.mxu0 %v5448_v32  ;;  %4443 = vmatprep.subr.bf16.mxu1 %v5451_v12 }
  0xf2   : > { %4423 = vmatprep.subr.bf16.mxu0 %v5449_v8 }
  0xf4   : > { %4444 = vmatpush3.bf16.msra.mxu1 %v5454_v16 }
  0xf5   : > { %4424 = vmatpush3.bf16.msra.mxu0 %v5452_v13  ;;  %4445 = vmatprep.subr.bf16.mxu1 %v5455_v22  ;;  %v6479_v13 = vld [vmem:[%s7214_s3 + $0x70] sm:$0xff]  }
  0xf6   : > { %4453 = vmatprep.subr.bf16.mxu0 %v5453_v15 }
  0xf8   : > { %1562 = vmatmul.mubr.bf16.vlgmr.msra.gmra.mrb[24].mxu0 %v6205_v20  ;;  %4446 = vmatpush3.bf16.msra.mxu1 %v5457_v24  ;;  %v6487_v24 = vld [vmem:[%s7214_s3 + $0x78] sm:$0xff]  }
  0xf9   : > { %4454 = vmatpush3.bf16.msra.mxu0 %v5456_v23  ;;  %1652 = vmatprep.mubr.bf16.mxu0 %v3930_v14 }
  0xfa   : > { %4455 = vmatprep.subr.bf16.mxu0 %v5858_v47  ;;  %4475 = vmatprep.subr.bf16.mxu1 %v5458_v27 }
  0xfb   : > { %1603 = vmatmul.mubr.bf16.vlgmr.msra.gmra.mrb[24].mxu1 %v6213_v25  ;;  %v6413_v25 = vld [vmem:[%s7214_s3 + $0x30] sm:$0xff]  }
  0xfc   : > { %4476 = vmatpush3.bf16.msra.mxu1 %v5868_v51  ;;  %1715 = vmatprep.mubr.bf16.mxu1 %v1680_v26 }
  0xfd   : > { %4456 = vmatpush3.bf16.msra.mxu0 %v5863_v48  ;;  %4477 = vmatprep.subr.bf16.mxu1 %v5875_v52 }
  0xfe   : > { %4457 = vmatprep.subr.bf16.mxu0 %v5880_v53 }
 0x100   : > { %4478 = vmatpush3.bf16.msra.mxu1 %v5891_v55  ;;  %v3932_v55 = vcombine.low %v6260_v43, %v6260_v43  ;;  %v6433_v43 = vld [vmem:[%s7214_s3 + $0x40] sm:$0xff]  }
 0x101   : > { %4458 = vmatpush3.bf16.msra.mxu0 %v5885_v54  ;;  %4479 = vmatprep.subr.bf16.mxu1 %v5899_v56  ;;  %v6337_v54 = vld [vmem:[%s7213_s2] ss:$0 sm:$0xff] }
 0x102   : > { %4459 = vmatprep.subr.bf16.mxu0 %v5904_v57 }
 0x104   : > { %4480 = vmatpush3.bf16.msra.mxu1 %v5915_v59  ;;  %v1670_v59 = vshll.u32 %v3932_v55, 16 }
 0x105   : > { %4460 = vmatpush3.bf16.msra.mxu0 %v5909_v58  ;;  %4481 = vmatprep.subr.bf16.mxu1 %v5923_v60 }
 0x106   : > { %4461 = vmatprep.subr.bf16.mxu0 %v5928_v61 }
 0x108   : > { %4482 = vmatpush3.bf16.msra.mxu1 %v7272_v7 }
 0x109   : > { %4462 = vmatpush3.bf16.msra.mxu0 %v7270_v5  ;;  %4483 = vmatprep.subr.bf16.mxu1 %v7273_v62  ;;  %v6355_v62 = vld [vmem:[%s7214_s3] sm:$0xff]  }
 0x10a   : > { %4463 = vmatprep.subr.bf16.mxu0 %v7271_v6  ;;  %v3929_v6 = vcombine.low %v6283_v9, %v6283_v9  ;;  %v6472_v9 = vld [vmem:[%s7214_s3 + $0x68] sm:$0xff]  }
 0x10b   : > { %v4161_v47 = vpop.f32.mrb[0].mxu0 }
 0x10c   : > { %v4162_v48 = vpop.f32.mrb[1].mxu0  ;;  %4484 = vmatpush3.bf16.msra.mxu1 %v7276_v36  ;;  %v1672_v36 = vrot.slane %v1670_v59, 1  ;;  %v6531_v59 = vld [vmem:[%s7214_s3 + $0xa8] sm:$0xff]  }
 0x10d   : > { %v4163_v51 = vadd.f32 %v4162_v48, %v4161_v47  ;;  %v4164_v52 = vpop.f32.mrb[2].mxu0  ;;  %4464 = vmatpush3.bf16.msra.mxu0 %v7274_v63  ;;  %4485 = vmatprep.subr.bf16.mxu1 %v7277_v37  ;;  %v4183_v57 = vpop.f32.mrb[0].mxu1  ;;  %v5523_v63 = vmov 0.0   ;;  %v6364_v37 = vld [vmem:[%s7214_s3 + $0x8] sm:$0xff]   ;;  %v6494_v48 = vld [vmem:[%s7214_s3 + $0x80] sm:$0xff]  }
 0x10e   : > { %v4165_v53 = vpop.f32.mrb[3].mxu0  ;;  %4465 = vmatprep.subr.bf16.mxu0 %v7275_v33  ;;  %v4184_v58 = vpop.f32.mrb[1].mxu1  ;;  %v1668_v33 = vshrl.u32 %v3932_v55, 16  ;;  %v6501_v52 = vld [vmem:[%s7214_s3 + $0x88] sm:$0xff]   ;;  %v6517_v55 = vld [vmem:[%s7214_s3 + $0x98] sm:$0xff]  }
 0x10f   : > { %v569_v56 = vadd.f32 %v4163_v51, %v6337_v54  ;;  %v4185_v60 = vadd.f32 %v4184_v58, %v4183_v57  ;;  %v4186_v61 = vpop.f32.mrb[2].mxu1  ;;  %v6510_v53 = vld [vmem:[%s7214_s3 + $0x90] sm:$0xff]  }
 0x110   : > { %4486 = vmatpush3.bf16.msra.mxu1 %v7280_v46  ;;  %v4187_v5 = vpop.f32.mrb[3].mxu1  ;;  %v6404_v46 = vld [vmem:[%s7214_s3 + $0x28] sm:$0xff]  }
 0x111   : > { %4466 = vmatpush3.bf16.msra.mxu0 %v7285_v18  ;;  %4487 = vmatprep.subr.bf16.mxu1 %v7281_v50  ;;  %v761_v7 = vadd.f32 %v4185_v60, %v569_v56  ;;  %v6524_v56 = vld [vmem:[%s7214_s3 + $0xa0] sm:$0xff]  }
 0x112   : > { %4467 = vmatprep.subr.bf16.mxu0 %v7279_v44  ;;  %v1673_v44 = vor.u32 %v1672_v36, %v1668_v33 }
 0x114   : > { %4488 = vmatpush3.bf16.msra.mxu1 %v7284_v38  ;;  %v6395_v38 = vld [vmem:[%s7214_s3 + $0x20] sm:$0xff]  }
 0x115   : > { %4468 = vmatpush3.bf16.msra.mxu0 %v7286_v21  ;;  %4489 = vmatprep.subr.bf16.mxu1 %v6019_v49  ;;  %v6375_v49 = vld [vmem:[%s7214_s3 + $0x10] sm:$0xff]  }
 0x116   : > { %4720 = vmatprep.subr.bf16.mxu0 %v5523_v63 }
 0x118   : > { %1653 = vmatmul.mubr.bf16.vlgmr.msra.gmra.mrb[28].mxu0 %v3929_v6  ;;  %4490 = vmatpush3.bf16.msra.mxu1 %v6026_v42  ;;  %v6386_v42 = vld [vmem:[%s7214_s3 + $0x18] sm:$0xff]  }
 0x119   : > { %4721 = vmatpush3.bf16.msra.mxu0 %v6355_v62  ;;  %4736 = vmatprep.mubr.msk.bf16.mxu0 %vm5524_vm0, %v5523_v63 }
 0x11a   : > { %4722 = vmatprep.subr.bf16.mxu0 %v5523_v63  ;;  %4800 = vmatprep.subr.bf16.mxu1 %v5523_v63 }
 0x11b   : > { %1716 = vmatmul.mubr.bf16.vlgmr.msra.gmra.mrb[28].mxu1 %v1673_v44 }
 0x11c   : > { %4801 = vmatpush3.bf16.msra.mxu1 %v6355_v62  ;;  %4816 = vmatprep.mubr.msk.bf16.mxu1 %vm5524_vm0, %v5523_v63 }
 0x11d   : > { %4723 = vmatpush3.bf16.msra.mxu0 %v6364_v37  ;;  %4802 = vmatprep.subr.bf16.mxu1 %v5523_v63 }
 0x11e   : > { %4724 = vmatprep.subr.bf16.mxu0 %v5523_v63 }
 0x120   : > { %4803 = vmatpush3.bf16.msra.mxu1 %v6364_v37 }
 0x121   : > { %4725 = vmatpush3.bf16.msra.mxu0 %v6375_v49  ;;  %4804 = vmatprep.subr.bf16.mxu1 %v5523_v63 }
 0x122   : > { %4726 = vmatprep.subr.bf16.mxu0 %v5523_v63 }
 0x124   : > { %4805 = vmatpush3.bf16.msra.mxu1 %v6375_v49 }
 0x125   : > { %4727 = vmatpush3.bf16.msra.mxu0 %v6386_v42  ;;  %4806 = vmatprep.subr.bf16.mxu1 %v5523_v63 }
 0x126   : > { %4728 = vmatprep.subr.bf16.mxu0 %v5523_v63 }
 0x128   : > { %4807 = vmatpush3.bf16.msra.mxu1 %v6386_v42 }
 0x129   : > { %4729 = vmatpush3.bf16.msra.mxu0 %v6395_v38  ;;  %4808 = vmatprep.subr.bf16.mxu1 %v5523_v63 }
 0x12a   : > { %4730 = vmatprep.subr.bf16.mxu0 %v5523_v63 }
 0x12b   : > { %v4205_v50 = vpop.f32.mrb[4].mxu0 }
 0x12c   : > { %v4206_v18 = vpop.f32.mrb[5].mxu0  ;;  %4809 = vmatpush3.bf16.msra.mxu1 %v6395_v38 }
 0x12d   : > { %v4207_v20 = vadd.f32 %v4206_v18, %v4205_v50  ;;  %v4208_v21 = vpop.f32.mrb[6].mxu0  ;;  %4731 = vmatpush3.bf16.msra.mxu0 %v6404_v46  ;;  %4810 = vmatprep.subr.bf16.mxu1 %v5523_v63 }
 0x12e   : > { %v4209_v28 = vpop.f32.mrb[7].mxu0  ;;  %4732 = vmatprep.subr.bf16.mxu0 %v5523_v63  ;;  %v4227_v30 = vpop.f32.mrb[4].mxu1 }
 0x12f   : > { %v940_v29 = vadd.f32 %v4207_v20, %v761_v7  ;;  %v4228_v35 = vpop.f32.mrb[5].mxu1  ;;  %v6538_v7 = vld [vmem:[%s7214_s3 + $0xb0] sm:$0xff]   ;;  %v6545_v20 = vld [vmem:[%s7214_s3 + $0xb8] sm:$0xff]  }
 0x130   : > { %v4229_v39 = vadd.f32 %v4228_v35, %v4227_v30  ;;  %v4230_v40 = vpop.f32.mrb[6].mxu1  ;;  %4811 = vmatpush3.bf16.msra.mxu1 %v6404_v46  ;;  %v6560_v35 = vld [vmem:[%s7214_s3 + $0xc8] sm:$0xff]  }
 0x131   : > { %4733 = vmatpush3.bf16.msra.mxu0 %v6413_v25  ;;  %v4231_v4 = vpop.f32.mrb[7].mxu1  ;;  %4812 = vmatprep.subr.bf16.mxu1 %v5523_v63  ;;  %v6582_v40 = vld [vmem:[%s7214_s3 + $0xd8] sm:$0xff]  }
 0x132   : > { %4734 = vmatprep.subr.bf16.mxu0 %v5523_v63  ;;  %v1132_v0 = vadd.f32 %v4229_v39, %v940_v29  ;;  %v6552_v29 = vld [vmem:[%s7214_s3 + $0xc0] sm:$0xff]   ;;  %v6573_v39 = vld [vmem:[%s7214_s3 + $0xd0] sm:$0xff]  }
 0x133   : > { %v6591_v4 = vld [vmem:[%s7214_s3 + $0xe0] sm:$0xff]  }
 0x134   : > { %v1133_v41 = vmax.f32 %v1132_v0, 0.0  ;;  %4813 = vmatpush3.bf16.msra.mxu1 %v6413_v25 }
 0x135   : > { %4735 = vmatpush3.bf16.msra.mxu0 %v6422_v31  ;;  %4814 = vmatprep.subr.bf16.mxu1 %v5523_v63 }
 0x136   : > { %4740 = vmatprep.subr.bf16.mxu0 %v5523_v63  ;;  %v1134_v1 = vpack.c.bf16 %v1133_v41, %v1133_v41 }
 0x138   : > { %4737 = vmatmul.mubr.bf16.vlgmr.msra.gmra.mrb[32].mxu0 %v1134_v1  ;;  %4815 = vmatpush3.bf16.msra.mxu1 %v6422_v31  ;;  %v1859_v14 = vshll.u32 %v1134_v1, 16  ;;  %v1857_v47 = vshrl.u32 %v1134_v1, 16  ;;  %v6600_v1 = vld [vmem:[%s7214_s3 + $0xe8] sm:$0xff]  }
 0x139   : > { %4741 = vmatpush3.bf16.msra.mxu0 %v6433_v43  ;;  %4756 = vmatprep.mubr.msk.bf16.mxu0 %vm5524_vm0, %v5523_v63 }
 0x13a   : > { %4742 = vmatprep.subr.bf16.mxu0 %v5523_v63  ;;  %4820 = vmatprep.subr.bf16.mxu1 %v5523_v63  ;;  %v1861_v26 = vrot.slane %v1859_v14, 1 }
 0x13c   : > { %v1862_v51 = vor.u32 %v1861_v26, %v1857_v47 }
 0x13d   : > { %4743 = vmatpush3.bf16.msra.mxu0 %v6441_v2 }
 0x13e   : > { %4744 = vmatprep.subr.bf16.mxu0 %v5523_v63 }
 0x141   : > { %4745 = vmatpush3.bf16.msra.mxu0 %v6451_v34 }
 0x142   : > { %4746 = vmatprep.subr.bf16.mxu0 %v5523_v63 }
 0x145   : > { %4747 = vmatpush3.bf16.msra.mxu0 %v6458_v3 }
 0x146   : > { %4748 = vmatprep.subr.bf16.mxu0 %v5523_v63 }
 0x149   : > { %4749 = vmatpush3.bf16.msra.mxu0 %v6465_v45 }
 0x14a   : > { %4750 = vmatprep.subr.bf16.mxu0 %v5523_v63 }
 0x14b   : > { %v4249_v32 = vpop.f32.mrb[8].mxu0 }
 0x14c   : > { %v4250_v8 = vpop.f32.mrb[9].mxu0 }
 0x14d   : > { %v4251_v10 = vadd.f32 %v4250_v8, %v4249_v32  ;;  %v4252_v11 = vpop.f32.mrb[10].mxu0  ;;  %4751 = vmatpush3.bf16.msra.mxu0 %v6472_v9 }
 0x14e   : > { %v4253_v12 = vpop.f32.mrb[11].mxu0  ;;  %v4271_v16 = vpop.f32.mrb[8].mxu1  ;;  %4752 = vmatprep.subr.bf16.mxu0 %v5523_v63  ;;  %v6609_v11 = vld [vmem:[%s7214_s3 + $0xf0] sm:$0xff]  }
 0x14f   : > { %v1175_v15 = vadd.f32 %v4251_v10, %v6337_v54  ;;  %v4272_v17 = vpop.f32.mrb[9].mxu1 }
 0x150   : > { %v4273_v19 = vadd.f32 %v4272_v17, %v4271_v16  ;;  %v4274_v22 = vpop.f32.mrb[10].mxu1 }
 0x151   : > { %v4275_v23 = vpop.f32.mrb[11].mxu1  ;;  %4753 = vmatpush3.bf16.msra.mxu0 %v6479_v13 }
 0x152   : > { %v1216_v27 = vadd.f32 %v4273_v19, %v1175_v15  ;;  %4754 = vmatprep.subr.bf16.mxu0 %v5523_v63  ;;  %v6619_v23 = vld [vmem:[%s7214_s3 + $0xf8] sm:$0xff]  }
 0x155   : > { %4755 = vmatpush3.bf16.msra.mxu0 %v6487_v24 }
 0x156   : > { %4760 = vmatprep.subr.bf16.mxu0 %v5523_v63 }
 0x158   : > { %4757 = vmatmul.mubr.bf16.vlgmr.msra.gmra.mrb[32].mxu0 %v1862_v51 }
 0x159   : > { %4761 = vmatpush3.bf16.msra.mxu0 %v6494_v48  ;;  %4776 = vmatprep.mubr.msk.bf16.mxu0 %vm5524_vm0, %v5523_v63 }
 0x15a   : > { %4762 = vmatprep.subr.bf16.mxu0 %v5523_v63 }
 0x15d   : > { %4763 = vmatpush3.bf16.msra.mxu0 %v6501_v52 }
 0x15e   : > { %4764 = vmatprep.subr.bf16.mxu0 %v5523_v63 }
 0x161   : > { %4765 = vmatpush3.bf16.msra.mxu0 %v6510_v53 }
 0x162   : > { %4766 = vmatprep.subr.bf16.mxu0 %v5523_v63 }
 0x165   : > { %4767 = vmatpush3.bf16.msra.mxu0 %v6517_v55 }
 0x166   : > { %4768 = vmatprep.subr.bf16.mxu0 %v5523_v63 }
 0x169   : > { %4769 = vmatpush3.bf16.msra.mxu0 %v6524_v56 }
 0x16a   : > { %4770 = vmatprep.subr.bf16.mxu0 %v5523_v63 }
 0x16b   : > { %v4293_v57 = vpop.f32.mrb[12].mxu0 }
 0x16c   : > { %v4294_v58 = vpop.f32.mrb[13].mxu0 }
 0x16d   : > { %v4295_v60 = vadd.f32 %v4294_v58, %v4293_v57  ;;  %v4296_v61 = vpop.f32.mrb[14].mxu0  ;;  %4771 = vmatpush3.bf16.msra.mxu0 %v6531_v59 }
 0x16e   : > { %v4297_v5 = vpop.f32.mrb[15].mxu0  ;;  %v4315_v33 = vpop.f32.mrb[12].mxu1  ;;  %4772 = vmatprep.subr.bf16.mxu0 %v5523_v63 }
 0x16f   : > { %v1266_v6 = vadd.f32 %v4295_v60, %v1216_v27  ;;  %v4316_v36 = vpop.f32.mrb[13].mxu1 }
 0x170   : > { %v4317_v44 = vadd.f32 %v4316_v36, %v4315_v33  ;;  %v4318_v50 = vpop.f32.mrb[14].mxu1 }
 0x171   : > { %v4319_v18 = vpop.f32.mrb[15].mxu1  ;;  %4773 = vmatpush3.bf16.msra.mxu0 %v6538_v7 }
 0x172   : > { %v1329_v21 = vadd.f32 %v4317_v44, %v1266_v6  ;;  %4774 = vmatprep.subr.bf16.mxu0 %v5523_v63 }
 0x174   : > { %v1330_v28 = vmax.f32 %v1329_v21, 0.0 }
 0x175   : > { %4775 = vmatpush3.bf16.msra.mxu0 %v6545_v20 }
 0x176   : > { %v1331_v30 = vpack.c.bf16 %v1330_v28, %v1330_v28  ;;  %4780 = vmatprep.subr.bf16.mxu0 %v5523_v63 }
 0x178   : > { %4817 = vmatmul.mubr.bf16.vlgmr.msra.gmra.mrb[32].mxu1 %v1331_v30  ;;  %4777 = vmatmul.mubr.bf16.vlgmr.msra.gmra.mrb[32].mxu0 %v1331_v30  ;;  %v2079_v15 = vshll.u32 %v1331_v30, 16  ;;  %v2077_v47 = vshrl.u32 %v1331_v30, 16 }
 0x179   : > { %4821 = vmatpush3.bf16.msra.mxu1 %v6433_v43  ;;  %4781 = vmatpush3.bf16.msra.mxu0 %v6552_v29 }
 0x17a   : > { %4822 = vmatprep.subr.bf16.mxu1 %v5523_v63  ;;  %4782 = vmatprep.subr.bf16.mxu0 %v5523_v63  ;;  %v2081_v27 = vrot.slane %v2079_v15, 1 }
 0x17b   : > { %4836 = vmatprep.mubr.msk.bf16.mxu1 %vm5524_vm0, %v5523_v63  ;;  %4796 = vmatprep.mubr.msk.bf16.mxu0 %vm5524_vm0, %v5523_v63 }
 0x17c   : > { %v2082_v51 = vor.u32 %v2081_v27, %v2077_v47  ;;  %v5368_v27 = vld [vmem:[%s7216_s5 + $0x20] sm:$0xff]   ;;  %v5369_v47 = vld [vmem:[%s7216_s5 + $0x28] sm:$0xff]  }
 0x17d   : > { %4823 = vmatpush3.bf16.msra.mxu1 %v6441_v2  ;;  %4783 = vmatpush3.bf16.msra.mxu0 %v6560_v35 }
 0x17e   : > { %4824 = vmatprep.subr.bf16.mxu1 %v5523_v63  ;;  %4784 = vmatprep.subr.bf16.mxu0 %v5523_v63 }
 0x181   : > { %4825 = vmatpush3.bf16.msra.mxu1 %v6451_v34  ;;  %4785 = vmatpush3.bf16.msra.mxu0 %v6573_v39 }
 0x182   : > { %4826 = vmatprep.subr.bf16.mxu1 %v5523_v63  ;;  %4786 = vmatprep.subr.bf16.mxu0 %v5523_v63 }
 0x185   : > { %4827 = vmatpush3.bf16.msra.mxu1 %v6458_v3  ;;  %4787 = vmatpush3.bf16.msra.mxu0 %v6582_v40 }
 0x186   : > { %4828 = vmatprep.subr.bf16.mxu1 %v5523_v63  ;;  %4788 = vmatprep.subr.bf16.mxu0 %v5523_v63 }
 0x189   : > { %4829 = vmatpush3.bf16.msra.mxu1 %v6465_v45  ;;  %4789 = vmatpush3.bf16.msra.mxu0 %v6591_v4 }
 0x18a   : > { %4830 = vmatprep.subr.bf16.mxu1 %v5523_v63  ;;  %4790 = vmatprep.subr.bf16.mxu0 %v5523_v63 }
 0x18b   : > { %v4337_v0 = vpop.f32.mrb[16].mxu0 }
 0x18c   : > { %v4338_v41 = vpop.f32.mrb[17].mxu0 }
 0x18d   : > { %v4339_v32 = vadd.f32 %v4338_v41, %v4337_v0  ;;  %v4340_v8 = vpop.f32.mrb[18].mxu0  ;;  %4831 = vmatpush3.bf16.msra.mxu1 %v6472_v9  ;;  %4791 = vmatpush3.bf16.msra.mxu0 %v6600_v1 }
 0x18e   : > { %v4341_v10 = vpop.f32.mrb[19].mxu0  ;;  %v4359_v14 = vpop.f32.mrb[16].mxu1  ;;  %4832 = vmatprep.subr.bf16.mxu1 %v5523_v63  ;;  %4792 = vmatprep.subr.bf16.mxu0 %v5523_v63 }
 0x18f   : > { %v1372_v12 = vadd.f32 %v4339_v32, %v6337_v54  ;;  %v4360_v16 = vpop.f32.mrb[17].mxu1 }
 0x190   : > { %v4361_v17 = vadd.f32 %v4360_v16, %v4359_v14  ;;  %v4362_v19 = vpop.f32.mrb[18].mxu1 }
 0x191   : > { %4833 = vmatpush3.bf16.msra.mxu1 %v6479_v13  ;;  %v4363_v22 = vpop.f32.mrb[19].mxu1  ;;  %4793 = vmatpush3.bf16.msra.mxu0 %v6609_v11 }
 0x192   : > { %v1413_v26 = vadd.f32 %v4361_v17, %v1372_v12  ;;  %4834 = vmatprep.subr.bf16.mxu1 %v5523_v63  ;;  %4794 = vmatprep.subr.bf16.mxu0 %v5523_v63 }
 0x195   : > { %4835 = vmatpush3.bf16.msra.mxu1 %v6487_v24  ;;  %4795 = vmatpush3.bf16.msra.mxu0 %v6619_v23 }
 0x196   : > { %4840 = vmatprep.subr.bf16.mxu1 %v5523_v63  ;;  %4880 = vmatprep.subr.bf16.mxu0 %v5523_v63 }
 0x198   : > { %4837 = vmatmul.mubr.bf16.vlgmr.msra.gmra.mrb[32].mxu1 %v2082_v51  ;;  %4797 = vmatmul.mubr.bf16.vlgmr.msra.gmra.mrb[32].mxu0 %v2082_v51  ;;  %v5370_v51 = vld [vmem:[%s7216_s5 + $0x30] sm:$0xff]  }
 0x199   : > { %4841 = vmatpush3.bf16.msra.mxu1 %v6494_v48  ;;  %4881 = vmatpush3.bf16.msra.mxu0 %v6355_v62 }
 0x19a   : > { %4842 = vmatprep.subr.bf16.mxu1 %v5523_v63  ;;  %4882 = vmatprep.subr.bf16.mxu0 %v5523_v63 }
 0x19b   : > { %4856 = vmatprep.mubr.msk.bf16.mxu1 %vm5524_vm0, %v5523_v63  ;;  %4896 = vmatprep.mubr.msk.bf16.mxu0 %vm5524_vm0, %v5523_v63 }
 0x19d   : > { %4843 = vmatpush3.bf16.msra.mxu1 %v6501_v52  ;;  %4883 = vmatpush3.bf16.msra.mxu0 %v6364_v37 }
 0x19e   : > { %4844 = vmatprep.subr.bf16.mxu1 %v5523_v63  ;;  %4884 = vmatprep.subr.bf16.mxu0 %v5523_v63 }
 0x1a1   : > { %4845 = vmatpush3.bf16.msra.mxu1 %v6510_v53  ;;  %4885 = vmatpush3.bf16.msra.mxu0 %v6375_v49 }
 0x1a2   : > { %4846 = vmatprep.subr.bf16.mxu1 %v5523_v63  ;;  %4886 = vmatprep.subr.bf16.mxu0 %v5523_v63 }
 0x1a5   : > { %4847 = vmatpush3.bf16.msra.mxu1 %v6517_v55  ;;  %4887 = vmatpush3.bf16.msra.mxu0 %v6386_v42 }
 0x1a6   : > { %4848 = vmatprep.subr.bf16.mxu1 %v5523_v63  ;;  %4888 = vmatprep.subr.bf16.mxu0 %v5523_v63 }
 0x1a9   : > { %4849 = vmatpush3.bf16.msra.mxu1 %v6524_v56  ;;  %4889 = vmatpush3.bf16.msra.mxu0 %v6395_v38 }
 0x1aa   : > { %4850 = vmatprep.subr.bf16.mxu1 %v5523_v63  ;;  %4890 = vmatprep.subr.bf16.mxu0 %v5523_v63 }
 0x1ab   : > { %v4381_v62 = vpop.f32.mrb[20].mxu0 }
 0x1ac   : > { %v4382_v37 = vpop.f32.mrb[21].mxu0 }
 0x1ad   : > { %v4383_v49 = vadd.f32 %v4382_v37, %v4381_v62  ;;  %v4384_v57 = vpop.f32.mrb[22].mxu0  ;;  %4851 = vmatpush3.bf16.msra.mxu1 %v6531_v59  ;;  %4891 = vmatpush3.bf16.msra.mxu0 %v6404_v46  ;;  %v5371_v62 = vld [vmem:[%s7216_s5 + $0x38] sm:$0xff]   ;;  %v5372_v37 = vld [vmem:[%s7216_s5 + $0x40] sm:$0xff]  }
 0x1ae   : > { %v4385_v58 = vpop.f32.mrb[23].mxu0  ;;  %v4403_v42 = vpop.f32.mrb[20].mxu1  ;;  %4852 = vmatprep.subr.bf16.mxu1 %v5523_v63  ;;  %4892 = vmatprep.subr.bf16.mxu0 %v5523_v63  ;;  %v5373_v57 = vld [vmem:[%s7216_s5 + $0x48] sm:$0xff]  }
 0x1af   : > { %v1463_v60 = vadd.f32 %v4383_v49, %v1413_v26  ;;  %v4404_v61 = vpop.f32.mrb[21].mxu1  ;;  %v5374_v58 = vld [vmem:[%s7216_s5 + $0x50] sm:$0xff]  }
 0x1b0   : > { %v4405_v38 = vadd.f32 %v4404_v61, %v4403_v42  ;;  %v4406_v5 = vpop.f32.mrb[22].mxu1  ;;  %v5376_v42 = vld [vmem:[%s7216_s5 + $0x60] sm:$0xff]  }
 0x1b1   : > { %v4407_v6 = vpop.f32.mrb[23].mxu1  ;;  %4853 = vmatpush3.bf16.msra.mxu1 %v6538_v7  ;;  %4893 = vmatpush3.bf16.msra.mxu0 %v6413_v25  ;;  %v5402_v5 = vld [vmem:[%s7218_s7 + $0x4] ss:$16 sps:$4 sm:$0xff]  }
 0x1b2   : > { %v1526_v33 = vadd.f32 %v4405_v38, %v1463_v60  ;;  %4854 = vmatprep.subr.bf16.mxu1 %v5523_v63  ;;  %4894 = vmatprep.subr.bf16.mxu0 %v5523_v63  ;;  %v5375_v60 = vld [vmem:[%s7216_s5 + $0x58] sm:$0xff]   ;;  %v5400_v38 = vld [vmem:[%s7218_s7] ss:$16 sps:$4 sm:$0xff]   ;;  %v5377_v6 = vld [vmem:[%s7216_s5 + $0x68] sm:$0xff]  }
 0x1b4   : > { %v1527_v36 = vmax.f32 %v1526_v33, 0.0  ;;  %v5405_v33 = vld [vmem:[%s7218_s7 + $0x24] ss:$16 sps:$4 sm:$0xff]  }
 0x1b5   : > { %4855 = vmatpush3.bf16.msra.mxu1 %v6545_v20  ;;  %4895 = vmatpush3.bf16.msra.mxu0 %v6422_v31 }
 0x1b6   : > { %v1528_v46 = vpack.c.bf16 %v1527_v36, %v1527_v36  ;;  %4860 = vmatprep.subr.bf16.mxu1 %v5523_v63  ;;  %4900 = vmatprep.subr.bf16.mxu0 %v5523_v63  ;;  %v5403_v36 = vld [vmem:[%s7218_s7 + $0x20] ss:$16 sps:$4 sm:$0xff]  }
 0x1b8   : > { %4857 = vmatmul.mubr.bf16.vlgmr.msra.gmra.mrb[32].mxu1 %v1528_v46  ;;  %4897 = vmatmul.mubr.bf16.vlgmr.msra.gmra.mrb[36].mxu0 %v1528_v46 }
 0x1b9   : > { %4861 = vmatpush3.bf16.msra.mxu1 %v6552_v29  ;;  %4901 = vmatpush3.bf16.msra.mxu0 %v6433_v43 }
 0x1ba   : > { %4862 = vmatprep.subr.bf16.mxu1 %v5523_v63  ;;  %4902 = vmatprep.subr.bf16.mxu0 %v5523_v63 }
 0x1bb   : > { %4876 = vmatprep.mubr.msk.bf16.mxu1 %vm5524_vm0, %v5523_v63  ;;  %4916 = vmatprep.mubr.msk.bf16.mxu0 %vm5524_vm0, %v5523_v63 }
 0x1bd   : > { %4863 = vmatpush3.bf16.msra.mxu1 %v6560_v35  ;;  %4903 = vmatpush3.bf16.msra.mxu0 %v6441_v2 }
 0x1be   : > { %4864 = vmatprep.subr.bf16.mxu1 %v5523_v63  ;;  %4904 = vmatprep.subr.bf16.mxu0 %v5523_v63 }
 0x1c1   : > { %4865 = vmatpush3.bf16.msra.mxu1 %v6573_v39  ;;  %4905 = vmatpush3.bf16.msra.mxu0 %v6451_v34 }
 0x1c2   : > { %4866 = vmatprep.subr.bf16.mxu1 %v5523_v63  ;;  %4906 = vmatprep.subr.bf16.mxu0 %v5523_v63 }
 0x1c5   : > { %4867 = vmatpush3.bf16.msra.mxu1 %v6582_v40  ;;  %4907 = vmatpush3.bf16.msra.mxu0 %v6458_v3 }
 0x1c6   : > { %4868 = vmatprep.subr.bf16.mxu1 %v5523_v63  ;;  %4908 = vmatprep.subr.bf16.mxu0 %v5523_v63 }
 0x1c9   : > { %4869 = vmatpush3.bf16.msra.mxu1 %v6591_v4  ;;  %4909 = vmatpush3.bf16.msra.mxu0 %v6465_v45  ;;  %v2301_v45 = vshll.u32 %v1528_v46, 16 }
 0x1ca   : > { %4870 = vmatprep.subr.bf16.mxu1 %v5523_v63  ;;  %4910 = vmatprep.subr.bf16.mxu0 %v5523_v63 }
 0x1cb   : > { %v4425_v25 = vpop.f32.mrb[24].mxu0 }
 0x1cc   : > { %v4426_v31 = vpop.f32.mrb[25].mxu0 }
 0x1cd   : > { %v4427_v43 = vadd.f32 %v4426_v31, %v4425_v25  ;;  %v4428_v2 = vpop.f32.mrb[26].mxu0  ;;  %4871 = vmatpush3.bf16.msra.mxu1 %v6600_v1  ;;  %4911 = vmatpush3.bf16.msra.mxu0 %v6472_v9  ;;  %v2299_v9 = vshrl.u32 %v1528_v46, 16  ;;  %v5408_v46 = vld [vmem:[%s7218_s7 + $0x44] ss:$16 sps:$4 sm:$0xff]   ;;  %v5406_v31 = vld [vmem:[%s7218_s7 + $0x40] ss:$16 sps:$4 sm:$0xff]  }
 0x1ce   : > { %v4429_v34 = vpop.f32.mrb[27].mxu0  ;;  %v4447_v44 = vpop.f32.mrb[24].mxu1  ;;  %4872 = vmatprep.subr.bf16.mxu1 %v5523_v63  ;;  %4912 = vmatprep.subr.bf16.mxu0 %v5523_v63  ;;  %v5378_v25 = vld [vmem:[%s7216_s5 + $0x70] sm:$0xff]  }
 0x1cf   : > { %v1569_v3 = vadd.f32 %v4427_v43, %v6337_v54  ;;  %v4448_v50 = vpop.f32.mrb[25].mxu1  ;;  %v2303_v54 = vrot.slane %v2301_v45, 1  ;;  %v5379_v43 = vld [vmem:[%s7216_s5 + $0x78] sm:$0xff]  }
 0x1d0   : > { %v4449_v18 = vadd.f32 %v4448_v50, %v4447_v44  ;;  %v4450_v21 = vpop.f32.mrb[26].mxu1 }
 0x1d1   : > { %4873 = vmatpush3.bf16.msra.mxu1 %v6609_v11  ;;  %v4451_v28 = vpop.f32.mrb[27].mxu1  ;;  %4913 = vmatpush3.bf16.msra.mxu0 %v6479_v13  ;;  %v2304_v0 = vor.u32 %v2303_v54, %v2299_v9  ;;  %v5364_v13 = vld [vmem:[%s7216_s5] sm:$0xff]   ;;  %v5383_v54 = vld [vmem:[%s7216_s5 + $0x98] sm:$0xff]  }
 0x1d2   : > { %v1610_v30 = vadd.f32 %v4449_v18, %v1569_v3  ;;  %4874 = vmatprep.subr.bf16.mxu1 %v5523_v63  ;;  %4914 = vmatprep.subr.bf16.mxu0 %v5523_v63  ;;  %v5380_v18 = vld [vmem:[%s7216_s5 + $0x80] sm:$0xff]   ;;  %v5381_v28 = vld [vmem:[%s7216_s5 + $0x88] sm:$0xff]  }
 0x1d3   : > { %v5384_v9 = vld [vmem:[%s7216_s5 + $0xa0] sm:$0xff]  }
 0x1d5   : > { %4875 = vmatpush3.bf16.msra.mxu1 %v6619_v23  ;;  %4915 = vmatpush3.bf16.msra.mxu0 %v6487_v24  ;;  %v5365_v24 = vld [vmem:[%s7216_s5 + $0x8] sm:$0xff]  }
 0x1d6   : > { %4920 = vmatprep.subr.bf16.mxu0 %v5523_v63  ;;  %4960 = vmatprep.subr.bf16.mxu1 %v5523_v63 }
 0x1d8   : > { %4877 = vmatmul.mubr.bf16.vlgmr.msra.gmra.mrb[32].mxu1 %v2304_v0  ;;  %4917 = vmatmul.mubr.bf16.vlgmr.msra.gmra.mrb[36].mxu0 %v2304_v0 }
 0x1d9   : > { %4921 = vmatpush3.bf16.msra.mxu0 %v6494_v48  ;;  %4936 = vmatprep.mubr.msk.bf16.mxu0 %vm5524_vm0, %v5523_v63  ;;  %v5366_v48 = vld [vmem:[%s7216_s5 + $0x10] sm:$0xff]  }
 0x1da   : > { %4922 = vmatprep.subr.bf16.mxu0 %v5523_v63  ;;  %4961 = vmatpush3.bf16.msra.mxu1 %v5364_v13  ;;  %v5385_v13 = vld [vmem:[%s7216_s5 + $0xa8] sm:$0xff]  }
 0x1db   : > { %4962 = vmatprep.subr.bf16.mxu1 %v5523_v63  ;;  %4968 = vmatprep.mubr.msk.bf16.mxu1 %vm5524_vm0, %v5523_v63 }
 0x1dd   : > { %4923 = vmatpush3.bf16.msra.mxu0 %v6501_v52 }
 0x1de   : > { %4924 = vmatprep.subr.bf16.mxu0 %v5523_v63  ;;  %4963 = vmatpush3.bf16.msra.mxu1 %v5365_v24  ;;  %v5386_v24 = vld [vmem:[%s7216_s5 + $0xb0] sm:$0xff]  }
 0x1df   : > { %4964 = vmatprep.subr.bf16.mxu1 %v5523_v63 }
 0x1e1   : > { %4925 = vmatpush3.bf16.msra.mxu0 %v6510_v53 }
 0x1e2   : > { %4926 = vmatprep.subr.bf16.mxu0 %v5523_v63  ;;  %4965 = vmatpush3.bf16.msra.mxu1 %v5366_v48  ;;  %v5387_v48 = vld [vmem:[%s7216_s5 + $0xb8] sm:$0xff]  }
 0x1e3   : > { %4966 = vmatprep.subr.bf16.mxu1 %v5523_v63 }
 0x1e5   : > { %4927 = vmatpush3.bf16.msra.mxu0 %v6517_v55  ;;  %v5367_v55 = vld [vmem:[%s7216_s5 + $0x18] sm:$0xff]  }
 0x1e6   : > { %4928 = vmatprep.subr.bf16.mxu0 %v5523_v63  ;;  %4967 = vmatpush3.bf16.msra.mxu1 %v5367_v55 }
 0x1e7   : > { %4972 = vmatprep.subr.bf16.mxu1 %v5523_v63 }
 0x1e9   : > { %4929 = vmatpush3.bf16.msra.mxu0 %v6524_v56 }
 0x1ea   : > { %4930 = vmatprep.subr.bf16.mxu0 %v5523_v63 }
 0x1eb   : > { %v4469_v52 = vpop.f32.mrb[28].mxu0 }
 0x1ec   : > { %v4470_v41 = vpop.f32.mrb[29].mxu0 }
 0x1ed   : > { %v4471_v32 = vadd.f32 %v4470_v41, %v4469_v52  ;;  %v4472_v8 = vpop.f32.mrb[30].mxu0  ;;  %4931 = vmatpush3.bf16.msra.mxu0 %v6531_v59  ;;  %v5388_v52 = vld [vmem:[%s7216_s5 + $0xc0] sm:$0xff]  }
 0x1ee   : > { %v4473_v10 = vpop.f32.mrb[31].mxu0  ;;  %v4491_v53 = vpop.f32.mrb[28].mxu1  ;;  %4932 = vmatprep.subr.bf16.mxu0 %v5523_v63  ;;  %v5390_v8 = vld [vmem:[%s7216_s5 + $0xd0] sm:$0xff]  }
 0x1ef   : > { %v1660_v12 = vadd.f32 %v4471_v32, %v1610_v30  ;;  %v4492_v14 = vpop.f32.mrb[29].mxu1  ;;  %v5382_v30 = vld [vmem:[%s7216_s5 + $0x90] sm:$0xff]   ;;  %v5389_v32 = vld [vmem:[%s7216_s5 + $0xc8] sm:$0xff]   ;;  %v5391_v10 = vld [vmem:[%s7216_s5 + $0xd8] sm:$0xff]  }
 0x1f0   : > { %v4493_v15 = vadd.f32 %v4492_v14, %v4491_v53  ;;  %v4494_v16 = vpop.f32.mrb[30].mxu1 }
 0x1f1   : > { %v4495_v56 = vpop.f32.mrb[31].mxu1  ;;  %4933 = vmatpush3.bf16.msra.mxu0 %v6538_v7 }
 0x1f2   : > { %v1723_v17 = vadd.f32 %v4493_v15, %v1660_v12  ;;  %4934 = vmatprep.subr.bf16.mxu0 %v5523_v63  ;;  %v5392_v56 = vld [vmem:[%s7216_s5 + $0xe0] sm:$0xff]  }
 0x1f4   : > { %v1724_v59 = vmax.f32 %v1723_v17, 0.0 }
 0x1f5   : > { %4935 = vmatpush3.bf16.msra.mxu0 %v6545_v20 }
 0x1f6   : > { %v1725_v19 = vpack.c.bf16 %v1724_v59, %v1724_v59  ;;  %4940 = vmatprep.subr.bf16.mxu0 %v5523_v63  ;;  %v5393_v59 = vld [vmem:[%s7216_s5 + $0xe8] sm:$0xff]  }
 0x1f8   : > { %4937 = vmatmul.mubr.bf16.vlgmr.msra.gmra.mrb[36].mxu0 %v1725_v19  ;;  %v2475_v7 = vshll.u32 %v1725_v19, 16 }
 0x1f9   : > { %4941 = vmatpush3.bf16.msra.mxu0 %v6552_v29  ;;  %4956 = vmatprep.mubr.msk.bf16.mxu0 %vm5524_vm0, %v5523_v63  ;;  %v2473_v29 = vshrl.u32 %v1725_v19, 16  ;;  %v5394_v19 = vld [vmem:[%s7216_s5 + $0xf0] sm:$0xff]  }
 0x1fa   : > { %4942 = vmatprep.subr.bf16.mxu0 %v5523_v63  ;;  %v2477_v20 = vrot.slane %v2475_v7, 1  ;;  %v5395_v7 = vld [vmem:[%s7216_s5 + $0xf8] sm:$0xff]  }
 0x1fd   : > { %4943 = vmatpush3.bf16.msra.mxu0 %v6560_v35  ;;  %v2478_v35 = vor.u32 %v2477_v20, %v2473_v29  ;;  %v5396_v20 = vld [vmem:[%s7216_s5 + $0x100] sm:$0xff]  }
 0x1fe   : > { %4944 = vmatprep.subr.bf16.mxu0 %v5523_v63 }
 0x201   : > { %4945 = vmatpush3.bf16.msra.mxu0 %v6573_v39  ;;  %v6756_v39 = vld [vmem:[%s7215_s4] ss:$0 sm:$0xff] }
 0x202   : > { %4946 = vmatprep.subr.bf16.mxu0 %v5523_v63 }
 0x205   : > { %4947 = vmatpush3.bf16.msra.mxu0 %v6582_v40 }
 0x206   : > { %4948 = vmatprep.subr.bf16.mxu0 %v5523_v63 }
 0x209   : > { %4949 = vmatpush3.bf16.msra.mxu0 %v6591_v4 }
 0x20a   : > { %4950 = vmatprep.subr.bf16.mxu0 %v5523_v63 }
 0x20d   : > { %4951 = vmatpush3.bf16.msra.mxu0 %v6600_v1 }
 0x20e   : > { %4952 = vmatprep.subr.bf16.mxu0 %v5523_v63 }
 0x211   : > { %4953 = vmatpush3.bf16.msra.mxu0 %v6609_v11 }
 0x212   : > { %4954 = vmatprep.subr.bf16.mxu0 %v5523_v63 }
 0x215   : > { %4955 = vmatpush3.bf16.msra.mxu0 %v6619_v23 }
 0x216   : > { %3332 = vmatprep.subr.bf16.mxu0 %v5402_v5  ;;  %v5421_v5 = vld [vmem:[%s7218_s7 + $0x68] ss:$16 sps:$4 sm:$0xff]  }
 0x218   : > { %4957 = vmatmul.mubr.bf16.vlgmr.msra.gmra.mrb[36].mxu0 %v2478_v35  ;;  %v5397_v35 = vld [vmem:[%s7216_s5 + $0x108] sm:$0xff]  }
 0x219   : > { %3333 = vmatpush1.bf16.msra.mxu0 %v5400_v38  ;;  %v5423_v38 = vld [vmem:[%s7218_s7 + $0x6c] ss:$16 sps:$4 sm:$0xff]  }
 0x21a   : > { %3334 = vmatprep.subr.bf16.mxu0 %v5405_v33  ;;  %v3462_v33 = vld [vmem:[%s7220_s9 + $0x88] sm:$0xff] }
 0x21d   : > { %3335 = vmatpush1.bf16.msra.mxu0 %v5403_v36  ;;  %v3493_v36 = vld [vmem:[%s7220_s9 + $0x180] sm:$0xff] }
 0x21e   : > { %3336 = vmatprep.subr.bf16.mxu0 %v5408_v46 }
 0x221   : > { %3337 = vmatpush1.bf16.msra.mxu0 %v5406_v31  ;;  %v3445_v31 = vld [vmem:[%s7220_s9] sm:$0xff] }
 0x26b   : > { %v2166_v40 = vpop.f32.mrb[32].mxu0 }
 0x26c   : > { %v5132_v4 = vadd.f32 %v6756_v39, %v2166_v40  ;;  %v4798_v1 = vpop.f32.mrb[33].mxu0  ;;  %v5399_v40 = vld [vmem:[%s7216_s5 + $0x118] sm:$0xff]  }
 0x26d   : > { %v2169_v22 = vpop.f32.mrb[34].mxu0  ;;  %v5411_v1 = vld [vmem:[%s7218_s7 + $0x64] ss:$16 sps:$4 sm:$0xff]  }
 0x26e   : > { %v2173_v26 = vmax.f32 %v5132_v4, 0.0  ;;  %v4799_v11 = vpop.f32.mrb[35].mxu0  ;;  %v5409_v22 = vld [vmem:[%s7218_s7 + $0x60] ss:$16 sps:$4 sm:$0xff]   ;;  %3338 = vmatprep.subr.bf16.mxu0 %v5411_v1  ;;  %v3484_v1 = vld [vmem:[%s7220_s9 + $0x138] sm:$0xff] }
 0x26f   : > { %3339 = vmatpush1.bf16.msra.mxu0 %v5409_v22  ;;  %v5525_v11 = vmov 0  }
 0x270   : > { %v2174_v23 = vpack.c.bf16 %v2173_v26, %v2173_v26  ;;  %v5414_v26 = vld [vmem:[%s7218_s7 + $0xc] ss:$16 sps:$4 sm:$0xff]   ;;  %3364 = vmatprep.mubr.bf16.mxu0 %v5525_v11 }
 0x271   : > { %3373 = vmatprep.subr.bf16.mxu0 %v5414_v26 }
 0x272   : > { %4969 = vmatmul.mubr.msk.bf16.vlgmr.msra.gmra.mrb[36].mxu1 %vm2558_vm1, %v2174_v23  ;;  %v2612_v49 = vshrl.u32 %v2174_v23, 16  ;;  %v2692_v61 = vrot.slane %v2174_v23, 1 }
 0x273   : > { %4973 = vmatpush3.bf16.msra.mxu1 %v5368_v27  ;;  %4980 = vmatprep.mubr.msk.bf16.mxu1 %vm5524_vm0, %v5523_v63 }
 0x274   : > { %4974 = vmatprep.subr.bf16.mxu1 %v5523_v63 }
 0x277   : > { %4975 = vmatpush3.bf16.msra.mxu1 %v5369_v47 }
 0x278   : > { %4976 = vmatprep.subr.bf16.mxu1 %v5523_v63 }
 0x27b   : > { %4977 = vmatpush3.bf16.msra.mxu1 %v5370_v51 }
 0x27c   : > { %4978 = vmatprep.subr.bf16.mxu1 %v5523_v63 }
 0x27f   : > { %4979 = vmatpush3.bf16.msra.mxu1 %v5371_v62 }
 0x280   : > { %4984 = vmatprep.subr.bf16.mxu1 %v5523_v63 }
 0x282   : > { %4981 = vmatmul.mubr.msk.bf16.vlgmr.msra.gmra.mrb[36].mxu1 %vm2558_vm1, %v2612_v49  ;;  %v5412_v49 = vld [vmem:[%s7218_s7 + $0x8] ss:$16 sps:$4 sm:$0xff]  }
 0x283   : > { %4985 = vmatpush3.bf16.msra.mxu1 %v5372_v37  ;;  %4992 = vmatprep.mubr.msk.bf16.mxu1 %vm5524_vm0, %v5523_v63 }
 0x284   : > { %4986 = vmatprep.subr.bf16.mxu1 %v5523_v63 }
 0x287   : > { %4987 = vmatpush3.bf16.msra.mxu1 %v5373_v57 }
 0x288   : > { %4988 = vmatprep.subr.bf16.mxu1 %v5523_v63 }
 0x28b   : > { %4989 = vmatpush3.bf16.msra.mxu1 %v5374_v58  ;;  %v5417_v58 = vld [vmem:[%s7218_s7 + $0x2c] ss:$16 sps:$4 sm:$0xff]  }
 0x28c   : > { %4990 = vmatprep.subr.bf16.mxu1 %v5523_v63 }
 0x28f   : > { %4991 = vmatpush3.bf16.msra.mxu1 %v5375_v60  ;;  %v5415_v60 = vld [vmem:[%s7218_s7 + $0x28] ss:$16 sps:$4 sm:$0xff]  }
 0x290   : > { %4996 = vmatprep.subr.bf16.mxu1 %v5523_v63 }
 0x292   : > { %4993 = vmatmul.mubr.msk.bf16.vlgmr.msra.gmra.mrb[36].mxu1 %vm2558_vm1, %v2692_v61  ;;  %v5418_v61 = vld [vmem:[%s7218_s7 + $0x48] ss:$16 sps:$4 sm:$0xff]  }
 0x293   : > { %4997 = vmatpush3.bf16.msra.mxu1 %v5376_v42  ;;  %5004 = vmatprep.mubr.msk.bf16.mxu1 %vm5524_vm0, %v5523_v63  ;;  %v5420_v42 = vld [vmem:[%s7218_s7 + $0x4c] ss:$16 sps:$4 sm:$0xff]  }
 0x294   : > { %4998 = vmatprep.subr.bf16.mxu1 %v5523_v63 }
 0x297   : > { %4999 = vmatpush3.bf16.msra.mxu1 %v5377_v6  ;;  %v3461_v6 = vld [vmem:[%s7220_s9 + $0x80] sm:$0xff] }
 0x298   : > { %5000 = vmatprep.subr.bf16.mxu1 %v5523_v63  ;;  %v5068_v46 = vpack.c.bf16 %v3462_v33, %v3461_v6  ;;  %v3504_v6 = vld [vmem:[%s7220_s9 + $0x1d8] sm:$0xff]  ;;  %v3455_v33 = vld [vmem:[%s7220_s9 + $0x50] sm:$0xff] }
 0x29b   : > { %5001 = vmatpush3.bf16.msra.mxu1 %v5378_v25  ;;  %v3494_v25 = vld [vmem:[%s7220_s9 + $0x188] sm:$0xff] }
 0x29c   : > { %5002 = vmatprep.subr.bf16.mxu1 %v5523_v63 }
 0x29f   : > { %5003 = vmatpush3.bf16.msra.mxu1 %v5379_v43  ;;  %v3446_v43 = vld [vmem:[%s7220_s9 + $0x8] sm:$0xff] }
 0x2a0   : > { %5008 = vmatprep.subr.bf16.mxu1 %v5523_v63 }
 0x2ab   : > { %v2340_v2 = vpop.f32.mrb[32].mxu1 }
 0x2ac   : > { %v5133_v34 = vadd.f32 %v6756_v39, %v2340_v2  ;;  %v4878_v3 = vpop.f32.mrb[33].mxu1  ;;  %v5100_v2 = vpack.c.bf16 %v3494_v25, %v3493_v36  ;;  %v3456_v36 = vld [vmem:[%s7220_s9 + $0x58] sm:$0xff] }
 0x2ad   : > { %v2343_v44 = vpop.f32.mrb[34].mxu1  ;;  %v3477_v3 = vld [vmem:[%s7220_s9 + $0x100] sm:$0xff]  ;;  %v5090_v25 = vpack.c.bf16 %v3456_v36, %v3455_v33 }
 0x2ae   : > { %v2347_v45 = vmax.f32 %v5133_v34, 0.0  ;;  %v4879_v50 = vpop.f32.mrb[35].mxu1  ;;  %v5070_v34 = vpack.c.bf16 %v3446_v43, %v3445_v31  ;;  %v3478_v44 = vld [vmem:[%s7220_s9 + $0x108] sm:$0xff]  ;;  %v3487_v31 = vld [vmem:[%s7220_s9 + $0x150] sm:$0xff]  ;;  %v3488_v43 = vld [vmem:[%s7220_s9 + $0x158] sm:$0xff] }
 0x2af   : > { %v3463_v50 = vld [vmem:[%s7220_s9 + $0x90] sm:$0xff]  ;;  %v3509_v33 = vld [vmem:[%s7221_s10] sm:$0x1] }
 0x2b0   : > { %v2348_v21 = vpack.c.bf16 %v2347_v45, %v2347_v45  ;;  %v5102_v45 = vpack.c.bf16 %v3478_v44, %v3477_v3  ;;  %v3474_v3 = vld [vmem:[%s7220_s9 + $0xe8] sm:$0xff]  ;;  %v3505_v44 = vld [vmem:[%s7220_s9 + $0x1e0] sm:$0xff] }
 0x2b2   : > { %5005 = vmatmul.mubr.msk.bf16.vlgmr.msra.gmra.mrb[36].mxu1 %vm2558_vm1, %v2348_v21  ;;  %v2847_v0 = vshrl.u32 %v2348_v21, 16  ;;  %v2927_v41 = vrot.slane %v2348_v21, 1  ;;  %v3495_v21 = vld [vmem:[%s7220_s9 + $0x190] sm:$0xff] }
 0x2b3   : > { %5009 = vmatpush3.bf16.msra.mxu1 %v5380_v18  ;;  %5016 = vmatprep.mubr.msk.bf16.mxu1 %vm5524_vm0, %v5523_v63  ;;  %v3464_v18 = vld [vmem:[%s7220_s9 + $0x98] sm:$0xff] }
 0x2b4   : > { %5010 = vmatprep.subr.bf16.mxu1 %v5523_v63 }
 0x2b7   : > { %5011 = vmatpush3.bf16.msra.mxu1 %v5381_v28  ;;  %v5072_v28 = vpack.c.bf16 %v3464_v18, %v3463_v50  ;;  %v3506_v50 = vld [vmem:[%s7220_s9 + $0x1e8] sm:$0xff]  ;;  %v3457_v18 = vld [vmem:[%s7220_s9 + $0x60] sm:$0xff] }
 0x2b8   : > { %5012 = vmatprep.subr.bf16.mxu1 %v5523_v63 }
 0x2bb   : > { %5013 = vmatpush3.bf16.msra.mxu1 %v5382_v30  ;;  %v3496_v30 = vld [vmem:[%s7220_s9 + $0x198] sm:$0xff] }
 0x2bc   : > { %5014 = vmatprep.subr.bf16.mxu1 %v5523_v63 }
 0x2bf   : > { %5015 = vmatpush3.bf16.msra.mxu1 %v5383_v54  ;;  %v3447_v54 = vld [vmem:[%s7220_s9 + $0x10] sm:$0xff] }
 0x2c0   : > { %5020 = vmatprep.subr.bf16.mxu1 %v5523_v63 }
 0x2c2   : > { %5017 = vmatmul.mubr.msk.bf16.vlgmr.msra.gmra.mrb[36].mxu1 %vm2558_vm1, %v2847_v0  ;;  %v5104_v0 = vpack.c.bf16 %v3496_v30, %v3495_v21  ;;  %v3458_v21 = vld [vmem:[%s7220_s9 + $0x68] sm:$0xff] }
 0x2c3   : > { %5021 = vmatpush3.bf16.msra.mxu1 %v5384_v9  ;;  %5028 = vmatprep.mubr.msk.bf16.mxu1 %vm5524_vm0, %v5523_v63  ;;  %v3448_v9 = vld [vmem:[%s7220_s9 + $0x18] sm:$0xff]  ;;  %v5094_v30 = vpack.c.bf16 %v3458_v21, %v3457_v18 }
 0x2c4   : > { %5022 = vmatprep.subr.bf16.mxu1 %v5523_v63 }
 0x2c7   : > { %5023 = vmatpush3.bf16.msra.mxu1 %v5385_v13  ;;  %v5074_v13 = vpack.c.bf16 %v3448_v9, %v3447_v54  ;;  %v3489_v54 = vld [vmem:[%s7220_s9 + $0x160] sm:$0xff]  ;;  %v3490_v9 = vld [vmem:[%s7220_s9 + $0x168] sm:$0xff] }
 0x2c8   : > { %5024 = vmatprep.subr.bf16.mxu1 %v5523_v63 }
 0x2cb   : > { %5025 = vmatpush3.bf16.msra.mxu1 %v5386_v24  ;;  %v3479_v24 = vld [vmem:[%s7220_s9 + $0x110] sm:$0xff] }
 0x2cc   : > { %5026 = vmatprep.subr.bf16.mxu1 %v5523_v63 }
 0x2cf   : > { %5027 = vmatpush3.bf16.msra.mxu1 %v5387_v48  ;;  %v3480_v48 = vld [vmem:[%s7220_s9 + $0x118] sm:$0xff] }
 0x2d0   : > { %5032 = vmatprep.subr.bf16.mxu1 %v5523_v63 }
 0x2d2   : > { %5029 = vmatmul.mubr.msk.bf16.vlgmr.msra.gmra.mrb[36].mxu1 %vm2558_vm1, %v2927_v41  ;;  %v5106_v41 = vpack.c.bf16 %v3480_v48, %v3479_v24  ;;  %v3476_v24 = vld [vmem:[%s7220_s9 + $0xf8] sm:$0xff]  ;;  %v3507_v48 = vld [vmem:[%s7220_s9 + $0x1f0] sm:$0xff] }
 0x2d3   : > { %5033 = vmatpush3.bf16.msra.mxu1 %v5388_v52  ;;  %5040 = vmatprep.mubr.msk.bf16.mxu1 %vm5524_vm0, %v5523_v63  ;;  %v3465_v52 = vld [vmem:[%s7220_s9 + $0xa0] sm:$0xff] }
 0x2d4   : > { %5034 = vmatprep.subr.bf16.mxu1 %v5523_v63 }
 0x2d7   : > { %5035 = vmatpush3.bf16.msra.mxu1 %v5389_v32  ;;  %v3466_v32 = vld [vmem:[%s7220_s9 + $0xa8] sm:$0xff] }
 0x2d8   : > { %5036 = vmatprep.subr.bf16.mxu1 %v5523_v63 }
 0x2db   : > { %5037 = vmatpush3.bf16.msra.mxu1 %v5390_v8  ;;  %v3497_v8 = vld [vmem:[%s7220_s9 + $0x1a0] sm:$0xff] }
 0x2dc   : > { %5038 = vmatprep.subr.bf16.mxu1 %v5523_v63 }
 0x2df   : > { %5039 = vmatpush3.bf16.msra.mxu1 %v5391_v10  ;;  %v3498_v10 = vld [vmem:[%s7220_s9 + $0x1a8] sm:$0xff] }
 0x2e0   : > { %5044 = vmatprep.subr.bf16.mxu1 %v5523_v63 }
 0x2eb   : > { %v2514_v12 = vpop.f32.mrb[36].mxu0 }
 0x2ec   : > { %v5134_v53 = vadd.f32 %v6756_v39, %v2514_v12  ;;  %v4958_v55 = vpop.f32.mrb[37].mxu0  ;;  %v5398_v39 = vld [vmem:[%s7216_s5 + $0x110] sm:$0xff]   ;;  %v5076_v12 = vpack.c.bf16 %v3466_v32, %v3465_v52 }
 0x2ed   : > { %v2517_v14 = vpop.f32.mrb[38].mxu0  ;;  %v3449_v55 = vld [vmem:[%s7220_s9 + $0x20] sm:$0xff]  ;;  %v3459_v32 = vld [vmem:[%s7220_s9 + $0x70] sm:$0xff] }
 0x2ee   : > { %v2521_v15 = vmax.f32 %v5134_v53, 0.0  ;;  %v4959_v16 = vpop.f32.mrb[39].mxu0  ;;  %v5108_v53 = vpack.c.bf16 %v3498_v10, %v3497_v8  ;;  %v3450_v14 = vld [vmem:[%s7220_s9 + $0x28] sm:$0xff]  ;;  %v3460_v8 = vld [vmem:[%s7220_s9 + $0x78] sm:$0xff] }
 0x2ef   : > { %v5078_v16 = vpack.c.bf16 %v3450_v14, %v3449_v55  ;;  %v3492_v55 = vld [vmem:[%s7220_s9 + $0x178] sm:$0xff] }
 0x2f0   : > { %v2522_v17 = vpack.c.bf16 %v2521_v15, %v2521_v15  ;;  %v3481_v15 = vld [vmem:[%s7220_s9 + $0x120] sm:$0xff] }
 0x2f2   : > { %5041 = vmatmul.mubr.msk.bf16.vlgmr.msra.gmra.mrb[36].mxu1 %vm2558_vm1, %v2522_v17  ;;  %v3082_v29 = vshrl.u32 %v2522_v17, 16  ;;  %v3162_v4 = vrot.slane %v2522_v17, 1  ;;  %v3467_v17 = vld [vmem:[%s7220_s9 + $0xb0] sm:$0xff] }
 0x2f3   : > { %5045 = vmatpush3.bf16.msra.mxu1 %v5392_v56  ;;  %5052 = vmatprep.mubr.msk.bf16.mxu1 %vm5524_vm0, %v5523_v63  ;;  %v3482_v56 = vld [vmem:[%s7220_s9 + $0x128] sm:$0xff] }
 0x2f4   : > { %5046 = vmatprep.subr.bf16.mxu1 %v5523_v63 }
 0x2f7   : > { %5047 = vmatpush3.bf16.msra.mxu1 %v5393_v59  ;;  %v3468_v59 = vld [vmem:[%s7220_s9 + $0xb8] sm:$0xff] }
 0x2f8   : > { %5048 = vmatprep.subr.bf16.mxu1 %v5523_v63 }
 0x2fb   : > { %5049 = vmatpush3.bf16.msra.mxu1 %v5394_v19  ;;  %v5110_v19 = vpack.c.bf16 %v3482_v56, %v3481_v15 }
 0x2fc   : > { %5050 = vmatprep.subr.bf16.mxu1 %v5523_v63 }
 0x2ff   : > { %5051 = vmatpush3.bf16.msra.mxu1 %v5395_v7  ;;  %v5080_v7 = vpack.c.bf16 %v3468_v59, %v3467_v17 }
 0x300   : > { %5056 = vmatprep.subr.bf16.mxu1 %v5523_v63 }
 0x302   : > { %5053 = vmatmul.mubr.msk.bf16.vlgmr.msra.gmra.mrb[36].mxu1 %vm2558_vm1, %v3082_v29  ;;  %v3500_v29 = vld [vmem:[%s7220_s9 + $0x1b8] sm:$0xff] }
 0x303   : > { %5057 = vmatpush3.bf16.msra.mxu1 %v5396_v20  ;;  %5064 = vmatprep.mubr.msk.bf16.mxu1 %vm5524_vm0, %v5523_v63  ;;  %v3499_v20 = vld [vmem:[%s7220_s9 + $0x1b0] sm:$0xff] }
 0x304   : > { %5058 = vmatprep.subr.bf16.mxu1 %v5523_v63 }
 0x307   : > { %5059 = vmatpush3.bf16.msra.mxu1 %v5397_v35  ;;  %v3451_v35 = vld [vmem:[%s7220_s9 + $0x30] sm:$0xff] }
 0x308   : > { %5060 = vmatprep.subr.bf16.mxu1 %v5523_v63 }
 0x30b   : > { %5061 = vmatpush3.bf16.msra.mxu1 %v5398_v39  ;;  %v5112_v39 = vpack.c.bf16 %v3500_v29, %v3499_v20  ;;  %v3423_v20 = vlaneseq }
 0x30c   : > { %5062 = vmatprep.subr.bf16.mxu1 %v5523_v63  ;;  %v2523_v63 = vld [vmem:[%s7217_s6] sm:$0x1] }
 0x30f   : > { %5063 = vmatpush3.bf16.msra.mxu1 %v5399_v40  ;;  %v3452_v40 = vld [vmem:[%s7220_s9 + $0x38] sm:$0xff] }
 0x310   : > { %5069 = vmatprep.subr.bf16.mxu1 %v5068_v46  ;;  %v5082_v22 = vpack.c.bf16 %v3452_v40, %v3451_v35  ;;  %v3424_v35 = vshrl.u32 %v3423_v20, 7 }
 0x312   : > { %5065 = vmatmul.mubr.msk.bf16.vlgmr.msra.gmra.mrb[36].mxu1 %vm2558_vm1, %v3162_v4  ;;  %v3483_v4 = vld [vmem:[%s7220_s9 + $0x130] sm:$0xff] }
 0x313   : > { %5071 = vmatpush3.bf16.msra.mxu1 %v5070_v34  ;;  %v5114_v26 = vpack.c.bf16 %v3484_v1, %v3483_v4  ;;  %v3473_v34 = vld [vmem:[%s7220_s9 + $0xe0] sm:$0xff] }
 0x314   : > { %5073 = vmatprep.subr.bf16.mxu1 %v5072_v28  ;;  %v5124_v28 = vpack.c.bf16 %v3506_v50, %v3505_v44 }
 0x317   : > { %5075 = vmatpush3.bf16.msra.mxu1 %v5074_v13  ;;  %v3475_v13 = vld [vmem:[%s7220_s9 + $0xf0] sm:$0xff] }
 0x318   : > { %5077 = vmatprep.subr.bf16.mxu1 %v5076_v12  ;;  %v5096_v52 = vpack.c.bf16 %v3476_v24, %v3475_v13  ;;  %v5098_v12 = vpack.c.bf16 %v3460_v8, %v3459_v32 }
 0x31b   : > { %5079 = vmatpush3.bf16.msra.mxu1 %v5078_v16 }
 0x31c   : > { %5081 = vmatprep.subr.bf16.mxu1 %v5080_v7 }
 0x31f   : > { %5083 = vmatpush3.bf16.msra.mxu1 %v5082_v22 }
 0x3e5   : > { %v3224_v27 = vpop.f32.mrb[36].mxu1 }
 0x3e6   : > { %v5135_v23 = vadd.f32 %v3224_v27, %v2523_v63  ;;  %v5066_v47 = vpop.f32.mrb[37].mxu1  ;;  %v3470_v63 = vld [vmem:[%s7220_s9 + $0xc8] sm:$0xff]  ;;  %v3501_v27 = vld [vmem:[%s7220_s9 + $0x1c0] sm:$0xff] }
 0x3e7   : > { %v3227_v51 = vpop.f32.mrb[38].mxu1  ;;  %v3502_v47 = vld [vmem:[%s7220_s9 + $0x1c8] sm:$0xff] }
 0x3e8   : > { %v3231_v62 = vmax.f32 %v5135_v23, 0.0  ;;  %v5067_v37 = vpop.f32.mrb[39].mxu1  ;;  %v3453_v51 = vld [vmem:[%s7220_s9 + $0x40] sm:$0xff] }
 0x3e9   : > { %v3454_v37 = vld [vmem:[%s7220_s9 + $0x48] sm:$0xff] }
 0x3ea   : > { %v3232_v57 = vpack.c.bf16 %v3231_v62, %v3231_v62  ;;  %v5116_v62 = vpack.c.bf16 %v3502_v47, %v3501_v27 }
 0x3ec   : > { %4140 = vmatmul.mubr.msk.bf16.vlgmr.msra.gmra.mrb[40].mxu0 %vm2558_vm1, %v3232_v57 }
 0x3ed   : > { %3374 = vmatpush1.bf16.msra.mxu0 %v5412_v49  ;;  %3405 = vmatprep.mubr.bf16.mxu0 %v5525_v11  ;;  %v3469_v11 = vld [vmem:[%s7220_s9 + $0xc0] sm:$0xff] }
 0x3ee   : > { %3375 = vmatprep.subr.bf16.mxu0 %v5417_v58  ;;  %v5084_v23 = vpack.c.bf16 %v3470_v63, %v3469_v11  ;;  %v3485_v49 = vld [vmem:[%s7220_s9 + $0x140] sm:$0xff]  ;;  %v5086_v58 = vpack.c.bf16 %v3454_v37, %v3453_v51  ;;  %v3517_v51 = vsub.s32 1, %v3424_v35  ;;  %v3525_v37 = vsub.s32 3, %v3424_v35 }
 0x3f0   : > { %5085 = vmatprep.subr.bf16.mxu1 %v5084_v23  ;;  %v2525_v23 = vld [vmem:[%s7219_s8] sm:$0xf] }
 0x3f1   : > { %3376 = vmatpush1.bf16.msra.mxu0 %v5415_v60  ;;  %5087 = vmatpush3.bf16.msra.mxu1 %v5086_v58 }
 0x3f2   : > { %3377 = vmatprep.subr.bf16.mxu0 %v5420_v42  ;;  %v3471_v42 = vld [vmem:[%s7220_s9 + $0xd0] sm:$0xff] }
 0x3f5   : > { %3378 = vmatpush1.bf16.msra.mxu0 %v5418_v61  ;;  %v3472_v61 = vld [vmem:[%s7220_s9 + $0xd8] sm:$0xff] }
 0x3f6   : > { %3379 = vmatprep.subr.bf16.mxu0 %v5423_v38  ;;  %v3503_v38 = vld [vmem:[%s7220_s9 + $0x1d0] sm:$0xff] }
 0x3f7   : > { %v5120_v46 = vpack.c.bf16 %v3504_v6, %v3503_v38 }
 0x3f9   : > { %3380 = vmatpush1.bf16.msra.mxu0 %v5421_v5  ;;  %v5088_v5 = vpack.c.bf16 %v3472_v61, %v3471_v42 }
 0x3fa   : > { %5101 = vmatprep.subr.bf16.mxu0 %v5100_v2  ;;  %v5122_v2 = vpack.c.bf16 %v3488_v43, %v3487_v31 }
 0x3fb   : > { %5089 = vmatprep.subr.bf16.mxu1 %v5088_v5 }
 0x3fc   : > { %4141 = vmatmul.mubr.msk.bf16.vlgmr.msra.gmra.mrb[44].mxu0 %vm2558_vm1, %v3232_v57  ;;  %v3486_v57 = vld [vmem:[%s7220_s9 + $0x148] sm:$0xff]  ;;  %5091 = vmatpush3.bf16.msra.mxu1 %v5090_v25 }
 0x3fd   : > { %5103 = vmatpush3.bf16.msra.mxu0 %v5102_v45  ;;  %v5118_v60 = vpack.c.bf16 %v3486_v57, %v3485_v49  ;;  %v5092_v45 = vpack.c.bf16 %v3474_v3, %v3473_v34  ;;  %v3513_v49 = vsub.s32 0, %v3424_v35  ;;  %v3521_v57 = vsub.s32 2, %v3424_v35 }
 0x3fe   : > { %5105 = vmatprep.subr.bf16.mxu0 %v5104_v0  ;;  %v5126_v0 = vpack.c.bf16 %v3490_v9, %v3489_v54 }
 0x3ff   : > { %5093 = vmatprep.subr.bf16.mxu1 %v5092_v45 }
 0x400   : > { %5095 = vmatpush3.bf16.msra.mxu1 %v5094_v30 }
 0x401   : > { %5107 = vmatpush3.bf16.msra.mxu0 %v5106_v41  ;;  %v3508_v41 = vld [vmem:[%s7220_s9 + $0x1f8] sm:$0xff]  ;;  %5097 = vmatprep.subr.bf16.mxu1 %v5096_v52 }
 0x402   : > { %5109 = vmatprep.subr.bf16.mxu0 %v5108_v53  ;;  %v5128_v10 = vpack.c.bf16 %v3508_v41, %v3507_v48  ;;  %v3491_v53 = vld [vmem:[%s7220_s9 + $0x170] sm:$0xff] }
 0x403   : > { %v5130_v14 = vpack.c.bf16 %v3492_v55, %v3491_v53 }
 0x404   : > { %5099 = vmatpush3.bf16.msra.mxu1 %v5098_v12 }
 0x405   : > { %5111 = vmatpush3.bf16.msra.mxu0 %v5110_v19  ;;  %v5526_v19 = vmov 1966171168  }
 0x406   : > { %5113 = vmatprep.subr.bf16.mxu0 %v5112_v39  ;;  %v3421_v7 = vunpack.c.l.s4 %v5526_v19 }
 0x408   : > { %v3422_v29 = vunpack.c.0.s8 %v3421_v7 }
 0x409   : > { %5115 = vmatpush3.bf16.msra.mxu0 %v5114_v26 }
 0x40a   : > { %5117 = vmatprep.subr.bf16.mxu0 %v5116_v62  ;;  %v3425_v39 = vsub.s32 %v3422_v29, %v3424_v35 }
 0x40d   : > { %5119 = vmatpush3.bf16.msra.mxu0 %v5118_v60 }
 0x40e   : > { %5121 = vmatprep.subr.bf16.mxu0 %v5120_v46 }
 0x411   : > { %5123 = vmatpush3.bf16.msra.mxu0 %v5122_v2 }
 0x412   : > { %5125 = vmatprep.subr.bf16.mxu0 %v5124_v28 }
 0x415   : > { %5127 = vmatpush3.bf16.msra.mxu0 %v5126_v0 }
 0x416   : > { %5129 = vmatprep.subr.bf16.mxu0 %v5128_v10 }
 0x419   : > { %5131 = vmatpush3.bf16.msra.mxu0 %v5130_v14 }
 0x4bf   : > { %v3366_v15 = vpop.f32.mrb[40].mxu0 }
 0x4c0   : > { %v3368_v16 = vpop.f32.mrb[41].mxu0 }
 0x4c1   : > { %v3418_v56 = vcombine.low %v3366_v15, %v3368_v16  ;;  %v3370_v17 = vpop.f32.mrb[42].mxu0 }
 0x4c2   : > { %v3371_v59 = vpop.f32.mrb[43].mxu0 }
 0x4c3   : > { %v3426_v11 = vrot.slane %v3418_v56, %v3425_v39 }
 0x4cf   : > { %v3407_v40 = vpop.f32.mrb[44].mxu0 }
 0x4d0   : > { %v3409_v4 = vpop.f32.mrb[45].mxu0 }
 0x4d1   : > { %v3419_v1 = vcombine.low %v3407_v40, %v3409_v4  ;;  %v3411_v22 = vpop.f32.mrb[46].mxu0 }
 0x4d2   : > { %v3412_v26 = vpop.f32.mrb[47].mxu0 }
 0x4d3   : > { %v3433_v63 = vrot.slane %v3419_v1, %v3425_v39 }
 0x4d5   : > { %v3434_v27 = vcombine.low %v3426_v11, %v3433_v63 }
 0x4d7   : > { %v3441_v47 = vrot.slane %v3434_v27, %v3425_v39 }
 0x4d9   : > { %v3443_v62 = vadd.f32 %v3441_v47, %v2525_v23 }
 0x4db   : > { %v3444_v58 = vmax.f32 %v3443_v62, 0.0 }
 0x4dd   : > { %v3518_v60 = vrot.slane %v3444_v58, %v3517_v51  ;;  %v3526_v42 = vrot.slane %v3444_v58, %v3525_v37  ;;  %v3514_v61 = vrot.slane %v3444_v58, %v3513_v49  ;;  %v3522_v38 = vrot.slane %v3444_v58, %v3521_v57 }
 0x4df   : > { %3595 = vmatprep.mubr.f32.mxu1 %v3518_v60  ;;  %3665 = vmatprep.mubr.f32.mxu0 %v3526_v42 }
 0x4e0   : > { %3596 = vmatmul.mubr.f32.vlgmr.msra.gmra.mrb[40].mxu1 %v3514_v61  ;;  %3666 = vmatmul.mubr.f32.vlgmr.msra.gmra.mrb[48].mxu0 %v3522_v38 }
 0x5b3   : > { %v4682_v5 = vpop.f32.mrb[40].mxu1  ;;  %v4717_v6 = vpop.f32.mrb[48].mxu0 }
 0x5b4   : > { %v4683_v36 = vpop.f32.mrb[41].mxu1  ;;  %v4718_v46 = vpop.f32.mrb[49].mxu0 }
 0x5b5   : > { %v4684_v25 = vadd.f32 %v4683_v36, %v4682_v5  ;;  %v4719_v31 = vadd.f32 %v4718_v46, %v4717_v6 }
 0x5b7   : > { %v3598_v43 = vadd.f32 %v4684_v25, %v3509_v33 }
 0x5b9   : > { %v3668_v2 = vadd.f32 %v4719_v31, %v3598_v43 }
 0x5bb   : > { %3671 = vst [vmem:[%s378_s15] sm:$0x1] %v3668_v2 }
 0x5bc   : > { %5472 = shalt.err (!%p5469_p3)
}
 0x5bd   : > { %s5473_s29 = scalar_lea.hbm %s7169_s0, 16  ;;  %s5477_s13 = scalar_lea.hbm %s7222_s11, 32 }
 0x5be   : > { %p5474_p4 = scmp.ne.s32.totalorder %s7169_s0, %s5473_s29  ;;  %p5478_p9 = scmp.lt.u32.totalorder %s7169_s0, %s7222_s11 }
 0x5bf   : > { %p5479_p10 = scmp.lt.u32.totalorder %s5477_s13, %s5473_s29  ;;  %p5481_p12 = scmp.lt.u32.totalorder %s5473_s29, %s7169_s0 }
 0x5c0   : > { %p5475_p7 = pnand %p5474_p4, %p5626_p5 }
 0x5c1   : > { %p5480_p11 = por %p5479_p10, %p5478_p9 }
 0x5c2   : > { %p5476_p8 = pneg %p5475_p7 }
 0x5c3   : > { %p5482_p13 = por %p5481_p12, %p5480_p11 }
 0x5c5   : > { %p5483_p0 = pnand %p5482_p13, %p5476_p8 }
 0x5c7   : > { %5486 = shalt.err (!%p5483_p0)
}
 0x5c8   : > { %5205 = dma.vmem_to_hbm [thread:$0]  (%p5626_p5), %s7171_s16, 16, %s7169_s0, %s3673_s22  }
 0x5c9 PF: > { %p5211_p1 = scmp.ge.s32.totalorder %s5521_s20, 2  ;;  %s3697_s25 = sand.u32 1, %s5509_s17  }
 0x5ca   : > { %s3698_s30 = scalar_lea.sflag [#allocation3], %s3697_s25 }
 0x5cb   : > { %p5208_p2 = pnand %p5211_p1, %p5630_p6 }
 0x5cd   : > { %5504 = dma.done.wait (!%p5208_p2), %s3698_s30, 16  }
 0x5ce   : > { %5506 = vsyncadd (!%p5208_p2), %s3698_s30, 4294967280  ;;  %p21_p3 = scmp.ge.s32.totalorder %s5613_s23, 4   ;;  %s7288_s17 = smov %s5513_s18 }
 0x5cf   : > { %s7289_s18 = smov %s5517_s19  ;;  %s7290_s19 = smov %s5624_s26 }
 0x5d0   : > { %s7291_s20 = smov %s5613_s23  ;;  %23 = sbr.rel (!%p21_p3) target bundleno = 5 (0x5), region = 117 }
 0x5d7   :  { %3702 = vsyncpa [#allocation3], 1 }
 0x5d8   :  { %3704 = vsyncpa [#allocation3 + $0x1], 1 }

</bundles_post_ra>
